<compile_context>
chip_gen: v5e
topology: v5e:2x2
jax: 0.10.0
libtpu: 0.0.40
codegen_flags: <defaults>
</compile_context>

<pallas_src>
import math

import jax
import jax.numpy as jnp
import numpy as np
from jax.experimental import pallas as pl
from jax.experimental.pallas import tpu as pltpu

NU = 0.01 / math.pi

# Network architecture: Linear(2,32)+Tanh, Linear(32,32)+Tanh, Linear(32,1)
LAYERS = [2, 32, 32, 1]


def _make_burgers_loss_kernel(n_layers, chunk, bc_chunk, n_f, hidden):
    """Kernel for an MLP with `n_layers` linear layers, input dim 2, output dim 1."""
    inv_nf = 1.0 / float(n_f)
    c = chunk
    H = hidden

    def kernel(x_ref, bc_ref, tgt_ref, wgt_ref, *rest):
        wb_refs = rest[:2 * n_layers]
        out_ref = rest[2 * n_layers]
        stack_ref = rest[2 * n_layers + 1]   # persistent VMEM scratch

        ws = [wb_refs[2 * i][...] for i in range(n_layers)]
        bs = [wb_refs[2 * i + 1][...] for i in range(n_layers)]

        # ---------------- layer 0, specialized ------------------------------
        # Input Jacobian of (x, t) is one-hot, so derivative seeds are rows of
        # W1; the K=2 value contraction is a VPU FMA (no degenerate matmul).
        a_in = x_ref[...]                    # (chunk, 2) collocation, cols (x, t)
        bc_in = bc_ref[...]                  # (bc_chunk, 2) fused IC + boundary batch
        w1, b1 = ws[0], bs[0]
        w1x = jnp.broadcast_to(w1[0:1, :], (c, H))   # hoisted: reused 3x below
        w1t = jnp.broadcast_to(w1[1:2, :], (c, H))
        z = a_in[:, 0:1] * w1x + a_in[:, 1:2] * w1t + b1
        h = jnp.tanh(z)
        s = 1.0 - h * h                      # tanh'
        dx = s * w1x
        dt = s * w1t
        dxx = -2.0 * h * dx * w1x            # tanh'' = -2 h tanh'
        h_bc = jnp.tanh(bc_in[:, 0:1] * w1[0:1, :]
                        + bc_in[:, 1:2] * w1[1:2, :] + b1)

        # ---------------- hidden layers: one fused stacked matmul each -------
        for i in range(1, n_layers - 1):
            w, b = ws[i], bs[i]
            stack_ref[0:c, :] = h
            stack_ref[c:2 * c, :] = dx
            stack_ref[2 * c:3 * c, :] = dt
            stack_ref[3 * c:4 * c, :] = dxx
            stack_ref[4 * c:4 * c + bc_chunk, :] = h_bc
            zz = jnp.dot(stack_ref[...], w, preferred_element_type=jnp.float32)
            z = zz[0:c] + b
            zx = zz[c:2 * c]
            zt = zz[2 * c:3 * c]
            zxx = zz[3 * c:4 * c]
            h = jnp.tanh(z)
            s = 1.0 - h * h
            hx = s * zx
            dx = hx
            dt = s * zt
            # d2h/dx2 = tanh''(z)*zx^2 + tanh'(z)*zxx ; tanh'' = -2 h tanh'
            dxx = s * zxx - 2.0 * h * hx * zx
            h_bc = jnp.tanh(zz[4 * c:4 * c + bc_chunk] + b)

        # ---------------- final linear layer (fan_out == 1) ------------------
        # VPU multiply by broadcast weight row + 32-lane reduce instead of a
        # degenerate N=1 MXU matmul.
        wlT = ws[-1]                         # (1, H): pre-transposed in wrapper
        bl = bs[-1]                          # (1, 1)
        lin = dt - NU * dxx                  # fuse u_t - nu*u_xx before the reduce
        u = jnp.sum(h * wlT, axis=-1, keepdims=True) + bl          # (chunk, 1)
        u_x = jnp.sum(dx * wlT, axis=-1, keepdims=True)
        ut_m = jnp.sum(lin * wlT, axis=-1, keepdims=True)
        f = ut_m + u * u_x
        loss_f = jnp.sum(f * f, keepdims=True) * inv_nf            # (1, 1)

        # BC / IC: weighted per-point squared error (weights carry 1/n0, 1/nb).
        ubc = jnp.sum(h_bc * wlT, axis=-1, keepdims=True) + bl     # (bc_chunk, 1)
        d = ubc - tgt_ref[...]
        loss_bc = jnp.sum(wgt_ref[...] * (d * d), keepdims=True)   # (1, 1)

        total = loss_f + loss_bc
        out_ref[...] = jnp.broadcast_to(total.reshape(1, 1, 1), out_ref.shape)

    return kernel


def burgers_pinn_loss(x_f, x_0, t_0, u_0, xb_left, tb, xb_right, params, *,
                      chunk=None):
    """Pallas implementation of BurgersPINN.forward -> scalar total loss."""
    n_f = x_f.shape[0]
    n_0 = x_0.shape[0]
    n_b = tb.shape[0]
    n_layers = len(params)
    H = params[0][0].shape[1]

    assert params[-1][0].shape[1] == 1, "final layer must have a single output"
    for w, _ in params[1:]:
        assert w.shape[0] == H, "hidden widths must be uniform"

    if chunk is None:
        chunk = n_f              # grid = 1: amortize all per-grid-step overhead
    assert n_f % chunk == 0 and chunk % 8 == 0, "collocation count must tile cleanly"
    grid = n_f // chunk
    n_bc = n_0 + 2 * n_b
    assert n_bc % grid == 0 and (n_bc // grid) % 8 == 0, \
        "IC/boundary batch must split evenly (multiples of 8) across grid blocks"
    bc_chunk = n_bc // grid

    # Glue: same concatenations the PyTorch forward performs, plus fusing the
    # three boundary/IC point sets into one batch and folding their three
    # mean-squared losses into a single weighted per-point sum so the BC work
    # splits evenly across grid blocks (no pl.when imbalance on megacore).
    x0t0 = jnp.concatenate([x_0, t_0], axis=1)
    xbl = jnp.concatenate([xb_left, tb], axis=1)
    xbr = jnp.concatenate([xb_right, tb], axis=1)
    bc_pts = jnp.concatenate([x0t0, xbl, xbr], axis=0)                # (n_bc, 2)
    bc_tgt = jnp.concatenate([u_0, jnp.zeros((2 * n_b, 1), jnp.float32)], axis=0)
    bc_wgt = jnp.concatenate(
        [jnp.full((n_0, 1), 1.0 / n_0, jnp.float32),
         jnp.full((2 * n_b, 1), 1.0 / n_b, jnp.float32)], axis=0)     # (n_bc, 1)

    flat_params = []
    for li, (w, b) in enumerate(params):
        if li == n_layers - 1:
            flat_params += [w.T, b]          # final weight pre-transposed: (1, H)
        else:
            flat_params += [w, b]

    kernel = _make_burgers_loss_kernel(n_layers, chunk, bc_chunk, n_f, H)

    def const_spec(arr):
        # whole (small) array resident in VMEM, same block for every grid step
        return pl.BlockSpec(arr.shape, lambda i: (0,) * arr.ndim)

    in_specs = (
        [pl.BlockSpec((chunk, 2), lambda i: (i, 0)),
         pl.BlockSpec((bc_chunk, 2), lambda i: (i, 0)),
         pl.BlockSpec((bc_chunk, 1), lambda i: (i, 0)),
         pl.BlockSpec((bc_chunk, 1), lambda i: (i, 0))]
        + [const_spec(p) for p in flat_params])

    # Lane-dense per-block partial-loss output (one (8,128) tile per grid step).
    out_spec = pl.BlockSpec((1, 8, 128), lambda i: (i, 0, 0))

    # Advisory cost estimate.
    flops = 4 * (n_f + n_bc) * H + 8 * n_f * H              # layer 0 (VPU)
    trans = (n_f + n_bc) * H
    for _ in range(1, n_layers - 1):
        flops += 2 * (4 * n_f + n_bc) * H * H                # fused stacked matmul
        flops += 12 * n_f * H + 2 * n_bc * H                 # elementwise updates
        trans += (n_f + n_bc) * H
    flops += 2 * (4 * n_f + n_bc) * H + 8 * n_f              # final reduces + residual
    bytes_accessed = sum(int(np.prod(a.shape)) * 4 for a in
                         ([x_f, bc_pts, bc_tgt, bc_wgt] + flat_params))
    bytes_accessed += grid * 8 * 128 * 4

    partials = pl.pallas_call(
        kernel,
        out_shape=jax.ShapeDtypeStruct((grid, 8, 128), jnp.float32),
        grid=(grid,),
        in_specs=in_specs,
        out_specs=out_spec,
        scratch_shapes=[pltpu.VMEM((4 * chunk + bc_chunk, H), jnp.float32)],
        compiler_params=pltpu.CompilerParams(
            dimension_semantics=("parallel",)),
        cost_estimate=pl.CostEstimate(flops=int(flops),
                                      transcendentals=int(trans),
                                      bytes_accessed=int(bytes_accessed)),
    )(x_f, bc_pts, bc_tgt, bc_wgt, *flat_params)

    if grid == 1:
        return partials[0, 0, 0]             # no wrapper-side reduce needed
    return jnp.sum(partials[:, 0, 0])


# ----------------------------- pure-JAX reference -----------------------------
def _mlp_ref(X, params):
    h = X
    for i, (w, b) in enumerate(params):
        h = h @ w + b
        if i < len(params) - 1:
            h = jnp.tanh(h)
    return h


def _reference_loss(x_f, x_0, t_0, u_0, xb_left, tb, xb_right, params):
    def u_pt(pt):
        return _mlp_ref(pt[None, :], params)[0, 0]

    du = jax.grad(u_pt)

    def u_x_pt(pt):
        return du(pt)[0]

    d2u = jax.grad(u_x_pt)

    u = jax.vmap(u_pt)(x_f)
    g = jax.vmap(du)(x_f)
    u_x, u_t = g[:, 0], g[:, 1]
    u_xx = jax.vmap(d2u)(x_f)[:, 0]
    f = u_t + u * u_x - NU * u_xx
    loss_f = jnp.mean(f ** 2)

    u0_pred = _mlp_ref(jnp.concatenate([x_0, t_0], 1), params)
    loss_0 = jnp.mean((u0_pred - u_0) ** 2)

    ubl = _mlp_ref(jnp.concatenate([xb_left, tb], 1), params)
    ubr = _mlp_ref(jnp.concatenate([xb_right, tb], 1), params)
    loss_b = jnp.mean(ubl ** 2) + jnp.mean(ubr ** 2)
    return loss_f + loss_0 + loss_b


if __name__ == "__main__":
    key = jax.random.PRNGKey(0)

    # Deterministic parameter init (PyTorch Linear default: U(-1/sqrt(fan_in), ..)).
    params = []
    for fan_in, fan_out in zip(LAYERS[:-1], LAYERS[1:]):
        key, kw, kb = jax.random.split(key, 3)
        bound = 1.0 / math.sqrt(fan_in)
        w = jax.random.uniform(kw, (fan_in, fan_out), jnp.float32, -bound, bound)
        b = jax.random.uniform(kb, (1, fan_out), jnp.float32, -bound, bound)
        params.append((w, b))

    Nf, N0, Nb = 256, 64, 64
    key, k1, k2, k3 = jax.random.split(key, 4)
    x_f = jax.random.uniform(k1, (Nf, 2), jnp.float32, -1.0, 1.0)   # (x, t) collocation
    x_0 = jax.random.uniform(k2, (N0, 1), jnp.float32, -1.0, 1.0)
    t_0 = jnp.zeros((N0, 1), jnp.float32)
    u_0 = -jnp.sin(math.pi * x_0)
    xb_left = -jnp.ones((Nb, 1), jnp.float32)
    xb_right = jnp.ones((Nb, 1), jnp.float32)
    tb = jax.random.uniform(k3, (Nb, 1), jnp.float32, 0.0, 1.0)

    total_loss = burgers_pinn_loss(x_f, x_0, t_0, u_0, xb_left, tb, xb_right, params)
    total_loss = jax.block_until_ready(total_loss)

    ref = jax.block_until_ready(
        _reference_loss(x_f, x_0, t_0, u_0, xb_left, tb, xb_right, params))

    assert np.isfinite(float(total_loss))
    assert abs(float(total_loss) - float(ref)) <= 1e-4 * max(1.0, abs(float(ref))), (
        f"kernel={float(total_loss)} ref={float(ref)}")

    print("KERNEL_OK")
</pallas_src>

<mosaic_0001>
module attributes {stable_mosaic.version = 11 : i64} {
  func.func @kernel(%arg0: i32, %arg1: memref<256x2xf32, #tpu.memory_space<vmem>>, %arg2: memref<192x2xf32, #tpu.memory_space<vmem>>, %arg3: memref<192x1xf32, #tpu.memory_space<vmem>>, %arg4: memref<192x1xf32, #tpu.memory_space<vmem>>, %arg5: memref<2x32xf32, #tpu.memory_space<vmem>>, %arg6: memref<1x32xf32, #tpu.memory_space<vmem>>, %arg7: memref<32x32xf32, #tpu.memory_space<vmem>>, %arg8: memref<1x32xf32, #tpu.memory_space<vmem>>, %arg9: memref<1x32xf32, #tpu.memory_space<vmem>>, %arg10: memref<1x1xf32, #tpu.memory_space<vmem>>, %arg11: memref<1x8x128xf32, #tpu.memory_space<vmem>>, %arg12: memref<1216x32xf32, #tpu.memory_space<vmem>>) attributes {dimension_semantics = [#tpu.dimension_semantics<parallel>], iteration_bounds = array<i64: 1>, scalar_prefetch = 0 : i64, scratch_operands = 1 : i64, tpu.core_type = #tpu.core_type<tc>, window_params = [{transform_indices = @transform_0, window_bounds = array<i64: 256, 2>}, {transform_indices = @transform_1, window_bounds = array<i64: 192, 2>}, {transform_indices = @transform_2, window_bounds = array<i64: 192, 1>}, {transform_indices = @transform_3, window_bounds = array<i64: 192, 1>}, {pipeline_mode = #tpu.pipeline_mode<synchronous>, transform_indices = @transform_4, window_bounds = array<i64: 2, 32>}, {pipeline_mode = #tpu.pipeline_mode<synchronous>, transform_indices = @transform_5, window_bounds = array<i64: 1, 32>}, {pipeline_mode = #tpu.pipeline_mode<synchronous>, transform_indices = @transform_6, window_bounds = array<i64: 32, 32>}, {pipeline_mode = #tpu.pipeline_mode<synchronous>, transform_indices = @transform_7, window_bounds = array<i64: 1, 32>}, {pipeline_mode = #tpu.pipeline_mode<synchronous>, transform_indices = @transform_8, window_bounds = array<i64: 1, 32>}, {pipeline_mode = #tpu.pipeline_mode<synchronous>, transform_indices = @transform_9, window_bounds = array<i64: 1, 1>}, {transform_indices = @transform_10, window_bounds = array<i64: 1, 8, 128>}]} {
    %c0 = arith.constant 0 : index
    %c0_0 = arith.constant 0 : index
    %0 = vector.load %arg5[%c0, %c0_0] : memref<2x32xf32, #tpu.memory_space<vmem>>, vector<2x32xf32>
    %c0_1 = arith.constant 0 : index
    %c0_2 = arith.constant 0 : index
    %1 = vector.load %arg7[%c0_1, %c0_2] : memref<32x32xf32, #tpu.memory_space<vmem>>, vector<32x32xf32>
    %c0_3 = arith.constant 0 : index
    %c0_4 = arith.constant 0 : index
    %2 = vector.load %arg9[%c0_3, %c0_4] : memref<1x32xf32, #tpu.memory_space<vmem>>, vector<1x32xf32>
    %c0_5 = arith.constant 0 : index
    %c0_6 = arith.constant 0 : index
    %3 = vector.load %arg6[%c0_5, %c0_6] : memref<1x32xf32, #tpu.memory_space<vmem>>, vector<1x32xf32>
    %c0_7 = arith.constant 0 : index
    %c0_8 = arith.constant 0 : index
    %4 = vector.load %arg8[%c0_7, %c0_8] : memref<1x32xf32, #tpu.memory_space<vmem>>, vector<1x32xf32>
    %c0_9 = arith.constant 0 : index
    %c0_10 = arith.constant 0 : index
    %5 = vector.load %arg10[%c0_9, %c0_10] : memref<1x1xf32, #tpu.memory_space<vmem>>, vector<1x1xf32>
    %c0_11 = arith.constant 0 : index
    %c0_12 = arith.constant 0 : index
    %6 = vector.load %arg1[%c0_11, %c0_12] : memref<256x2xf32, #tpu.memory_space<vmem>>, vector<256x2xf32>
    %c0_13 = arith.constant 0 : index
    %c0_14 = arith.constant 0 : index
    %7 = vector.load %arg2[%c0_13, %c0_14] : memref<192x2xf32, #tpu.memory_space<vmem>>, vector<192x2xf32>
    %8 = vector.extract_strided_slice %0 {offsets = [0, 0], sizes = [1, 32], strides = [1, 1]} : vector<2x32xf32> to vector<1x32xf32>
    %9 = vector.shape_cast %8 : vector<1x32xf32> to vector<1x32xf32>
    %10 = vector.broadcast %9 : vector<1x32xf32> to vector<256x32xf32>
    %11 = vector.extract_strided_slice %0 {offsets = [1, 0], sizes = [1, 32], strides = [1, 1]} : vector<2x32xf32> to vector<1x32xf32>
    %12 = vector.shape_cast %11 : vector<1x32xf32> to vector<1x32xf32>
    %13 = vector.broadcast %12 : vector<1x32xf32> to vector<256x32xf32>
    %14 = vector.extract_strided_slice %6 {offsets = [0, 0], sizes = [256, 1], strides = [1, 1]} : vector<256x2xf32> to vector<256x1xf32>
    %15 = vector.broadcast %14 : vector<256x1xf32> to vector<256x32xf32>
    %16 = arith.mulf %15, %10 : vector<256x32xf32>
    %17 = vector.extract_strided_slice %6 {offsets = [0, 1], sizes = [256, 1], strides = [1, 1]} : vector<256x2xf32> to vector<256x1xf32>
    %18 = vector.broadcast %17 : vector<256x1xf32> to vector<256x32xf32>
    %19 = arith.mulf %18, %13 : vector<256x32xf32>
    %20 = arith.addf %16, %19 : vector<256x32xf32>
    %21 = vector.broadcast %3 : vector<1x32xf32> to vector<256x32xf32>
    %22 = arith.addf %20, %21 : vector<256x32xf32>
    %23 = math.tanh %22 : vector<256x32xf32>
    %24 = arith.mulf %23, %23 : vector<256x32xf32>
    %cst = arith.constant 1.000000e+00 : f32
    %25 = vector.broadcast %cst : f32 to vector<256x32xf32>
    %26 = arith.subf %25, %24 : vector<256x32xf32>
    %27 = arith.mulf %26, %10 : vector<256x32xf32>
    %28 = arith.mulf %26, %13 : vector<256x32xf32>
    %cst_15 = arith.constant -2.000000e+00 : f32
    %29 = vector.broadcast %cst_15 : f32 to vector<256x32xf32>
    %30 = arith.mulf %29, %23 : vector<256x32xf32>
    %31 = arith.mulf %30, %27 : vector<256x32xf32>
    %32 = arith.mulf %31, %10 : vector<256x32xf32>
    %33 = vector.extract_strided_slice %7 {offsets = [0, 0], sizes = [192, 1], strides = [1, 1]} : vector<192x2xf32> to vector<192x1xf32>
    %34 = vector.extract_strided_slice %0 {offsets = [0, 0], sizes = [1, 32], strides = [1, 1]} : vector<2x32xf32> to vector<1x32xf32>
    %35 = vector.broadcast %33 : vector<192x1xf32> to vector<192x32xf32>
    %36 = vector.broadcast %34 : vector<1x32xf32> to vector<192x32xf32>
    %37 = arith.mulf %35, %36 : vector<192x32xf32>
    %38 = vector.extract_strided_slice %7 {offsets = [0, 1], sizes = [192, 1], strides = [1, 1]} : vector<192x2xf32> to vector<192x1xf32>
    %39 = vector.extract_strided_slice %0 {offsets = [1, 0], sizes = [1, 32], strides = [1, 1]} : vector<2x32xf32> to vector<1x32xf32>
    %40 = vector.broadcast %38 : vector<192x1xf32> to vector<192x32xf32>
    %41 = vector.broadcast %39 : vector<1x32xf32> to vector<192x32xf32>
    %42 = arith.mulf %40, %41 : vector<192x32xf32>
    %43 = arith.addf %37, %42 : vector<192x32xf32>
    %44 = vector.broadcast %3 : vector<1x32xf32> to vector<192x32xf32>
    %45 = arith.addf %43, %44 : vector<192x32xf32>
    %46 = math.tanh %45 : vector<192x32xf32>
    %c0_16 = arith.constant 0 : index
    %c0_17 = arith.constant 0 : index
    %47 = vector.load %arg12[%c0_16, %c0_17] : memref<1216x32xf32, #tpu.memory_space<vmem>>, vector<256x32xf32>
    tpu.vector_store %arg12[%c0_16, %c0_17], %23 {strides = array<i32>} : memref<1216x32xf32, #tpu.memory_space<vmem>>, vector<256x32xf32>,
    %c256 = arith.constant 256 : index
    %c0_18 = arith.constant 0 : index
    %48 = vector.load %arg12[%c256, %c0_18] : memref<1216x32xf32, #tpu.memory_space<vmem>>, vector<256x32xf32>
    tpu.vector_store %arg12[%c256, %c0_18], %27 {strides = array<i32>} : memref<1216x32xf32, #tpu.memory_space<vmem>>, vector<256x32xf32>,
    %c512 = arith.constant 512 : index
    %c0_19 = arith.constant 0 : index
    %49 = vector.load %arg12[%c512, %c0_19] : memref<1216x32xf32, #tpu.memory_space<vmem>>, vector<256x32xf32>
    tpu.vector_store %arg12[%c512, %c0_19], %28 {strides = array<i32>} : memref<1216x32xf32, #tpu.memory_space<vmem>>, vector<256x32xf32>,
    %c768 = arith.constant 768 : index
    %c0_20 = arith.constant 0 : index
    %50 = vector.load %arg12[%c768, %c0_20] : memref<1216x32xf32, #tpu.memory_space<vmem>>, vector<256x32xf32>
    tpu.vector_store %arg12[%c768, %c0_20], %32 {strides = array<i32>} : memref<1216x32xf32, #tpu.memory_space<vmem>>, vector<256x32xf32>,
    %c1024 = arith.constant 1024 : index
    %c0_21 = arith.constant 0 : index
    %51 = vector.load %arg12[%c1024, %c0_21] : memref<1216x32xf32, #tpu.memory_space<vmem>>, vector<192x32xf32>
    tpu.vector_store %arg12[%c1024, %c0_21], %46 {strides = array<i32>} : memref<1216x32xf32, #tpu.memory_space<vmem>>, vector<192x32xf32>,
    %c0_22 = arith.constant 0 : index
    %c0_23 = arith.constant 0 : index
    %52 = vector.load %arg12[%c0_22, %c0_23] : memref<1216x32xf32, #tpu.memory_space<vmem>>, vector<1216x32xf32>
    %cst_24 = arith.constant dense<0.000000e+00> : vector<1216x32xf32>
    %53 = tpu.matmul %52, %1, %cst_24 {dimension_numbers = #tpu.dot_dimension_numbers<[1], [0], [0], [1], [0, 0, 1, 1], [], []>} : vector<1216x32xf32>, vector<32x32xf32>, vector<1216x32xf32> -> vector<1216x32xf32>
    %54 = vector.extract_strided_slice %53 {offsets = [0, 0], sizes = [256, 32], strides = [1, 1]} : vector<1216x32xf32> to vector<256x32xf32>
    %55 = vector.broadcast %4 : vector<1x32xf32> to vector<256x32xf32>
    %56 = arith.addf %54, %55 : vector<256x32xf32>
    %57 = vector.extract_strided_slice %53 {offsets = [256, 0], sizes = [256, 32], strides = [1, 1]} : vector<1216x32xf32> to vector<256x32xf32>
    %58 = vector.extract_strided_slice %53 {offsets = [512, 0], sizes = [256, 32], strides = [1, 1]} : vector<1216x32xf32> to vector<256x32xf32>
    %59 = vector.extract_strided_slice %53 {offsets = [768, 0], sizes = [256, 32], strides = [1, 1]} : vector<1216x32xf32> to vector<256x32xf32>
    %60 = math.tanh %56 : vector<256x32xf32>
    %61 = arith.mulf %60, %60 : vector<256x32xf32>
    %cst_25 = arith.constant 1.000000e+00 : f32
    %62 = vector.broadcast %cst_25 : f32 to vector<256x32xf32>
    %63 = arith.subf %62, %61 : vector<256x32xf32>
    %64 = arith.mulf %63, %57 : vector<256x32xf32>
    %65 = arith.mulf %63, %58 : vector<256x32xf32>
    %66 = arith.mulf %63, %59 : vector<256x32xf32>
    %cst_26 = arith.constant 2.000000e+00 : f32
    %67 = vector.broadcast %cst_26 : f32 to vector<256x32xf32>
    %68 = arith.mulf %67, %60 : vector<256x32xf32>
    %69 = arith.mulf %68, %64 : vector<256x32xf32>
    %70 = arith.mulf %69, %57 : vector<256x32xf32>
    %71 = arith.subf %66, %70 : vector<256x32xf32>
    %72 = vector.extract_strided_slice %53 {offsets = [1024, 0], sizes = [192, 32], strides = [1, 1]} : vector<1216x32xf32> to vector<192x32xf32>
    %73 = vector.broadcast %4 : vector<1x32xf32> to vector<192x32xf32>
    %74 = arith.addf %72, %73 : vector<192x32xf32>
    %75 = math.tanh %74 : vector<192x32xf32>
    %cst_27 = arith.constant 0.00318309898 : f32
    %76 = vector.broadcast %cst_27 : f32 to vector<256x32xf32>
    %77 = arith.mulf %76, %71 : vector<256x32xf32>
    %78 = arith.subf %65, %77 : vector<256x32xf32>
    %79 = vector.broadcast %2 : vector<1x32xf32> to vector<256x32xf32>
    %80 = arith.mulf %60, %79 : vector<256x32xf32>
    %cst_28 = arith.constant dense<0.000000e+00> : vector<256xf32>
    %81 = vector.multi_reduction <add>, %80, %cst_28 [1] : vector<256x32xf32> to vector<256xf32>
    %82 = vector.shape_cast %81 : vector<256xf32> to vector<256x1xf32>
    %83 = vector.broadcast %5 : vector<1x1xf32> to vector<256x1xf32>
    %84 = arith.addf %82, %83 : vector<256x1xf32>
    %85 = vector.broadcast %2 : vector<1x32xf32> to vector<256x32xf32>
    %86 = arith.mulf %64, %85 : vector<256x32xf32>
    %cst_29 = arith.constant dense<0.000000e+00> : vector<256xf32>
    %87 = vector.multi_reduction <add>, %86, %cst_29 [1] : vector<256x32xf32> to vector<256xf32>
    %88 = vector.shape_cast %87 : vector<256xf32> to vector<256x1xf32>
    %89 = vector.broadcast %2 : vector<1x32xf32> to vector<256x32xf32>
    %90 = arith.mulf %78, %89 : vector<256x32xf32>
    %cst_30 = arith.constant dense<0.000000e+00> : vector<256xf32>
    %91 = vector.multi_reduction <add>, %90, %cst_30 [1] : vector<256x32xf32> to vector<256xf32>
    %92 = vector.shape_cast %91 : vector<256xf32> to vector<256x1xf32>
    %93 = arith.mulf %84, %88 : vector<256x1xf32>
    %94 = arith.addf %92, %93 : vector<256x1xf32>
    %95 = arith.mulf %94, %94 : vector<256x1xf32>
    %96 = vector.shape_cast %95 : vector<256x1xf32> to vector<1x256x1xf32>
    %cst_31 = arith.constant dense<0.000000e+00> : vector<1xf32>
    %97 = vector.multi_reduction <add>, %96, %cst_31 [1, 2] : vector<1x256x1xf32> to vector<1xf32>
    %98 = vector.shape_cast %97 : vector<1xf32> to vector<1x1x1xf32>
    %99 = vector.extract %98[0, 0, 0] : f32 from vector<1x1x1xf32>
    %100 = vector.broadcast %99 : f32 to vector<1x1xf32>
    %cst_32 = arith.constant 3.906250e-03 : f32
    %101 = vector.broadcast %cst_32 : f32 to vector<1x1xf32>
    %102 = arith.mulf %100, %101 : vector<1x1xf32>
    %103 = vector.broadcast %2 : vector<1x32xf32> to vector<192x32xf32>
    %104 = arith.mulf %75, %103 : vector<192x32xf32>
    %cst_33 = arith.constant dense<0.000000e+00> : vector<192xf32>
    %105 = vector.multi_reduction <add>, %104, %cst_33 [1] : vector<192x32xf32> to vector<192xf32>
    %106 = vector.shape_cast %105 : vector<192xf32> to vector<192x1xf32>
    %107 = vector.broadcast %5 : vector<1x1xf32> to vector<192x1xf32>
    %108 = arith.addf %106, %107 : vector<192x1xf32>
    %c0_34 = arith.constant 0 : index
    %c0_35 = arith.constant 0 : index
    %109 = vector.load %arg3[%c0_34, %c0_35] : memref<192x1xf32, #tpu.memory_space<vmem>>, vector<192x1xf32>
    %110 = arith.subf %108, %109 : vector<192x1xf32>
    %c0_36 = arith.constant 0 : index
    %c0_37 = arith.constant 0 : index
    %111 = vector.load %arg4[%c0_36, %c0_37] : memref<192x1xf32, #tpu.memory_space<vmem>>, vector<192x1xf32>
    %112 = arith.mulf %110, %110 : vector<192x1xf32>
    %113 = arith.mulf %111, %112 : vector<192x1xf32>
    %114 = vector.shape_cast %113 : vector<192x1xf32> to vector<1x192x1xf32>
    %cst_38 = arith.constant dense<0.000000e+00> : vector<1xf32>
    %115 = vector.multi_reduction <add>, %114, %cst_38 [1, 2] : vector<1x192x1xf32> to vector<1xf32>
    %116 = vector.shape_cast %115 : vector<1xf32> to vector<1x1x1xf32>
    %117 = vector.extract %116[0, 0, 0] : f32 from vector<1x1x1xf32>
    %118 = vector.broadcast %117 : f32 to vector<1x1xf32>
    %119 = arith.addf %102, %118 : vector<1x1xf32>
    %120 = vector.shape_cast %119 : vector<1x1xf32> to vector<1x1x1xf32>
    %121 = vector.shape_cast %120 : vector<1x1x1xf32> to vector<1x1x1xf32>
    %122 = vector.broadcast %121 : vector<1x1x1xf32> to vector<1x8x128xf32>
    %c0_39 = arith.constant 0 : index
    %c0_40 = arith.constant 0 : index
    %c0_41 = arith.constant 0 : index
    %123 = vector.load %arg11[%c0_39, %c0_40, %c0_41] : memref<1x8x128xf32, #tpu.memory_space<vmem>>, vector<1x8x128xf32>
    tpu.vector_store %arg11[%c0_39, %c0_40, %c0_41], %122 {strides = array<i32>} : memref<1x8x128xf32, #tpu.memory_space<vmem>>, vector<1x8x128xf32>,
    return
  }
  func.func @transform_0(%arg0: i32) -> (i32, i32) {
    %c0_i32 = arith.constant 0 : i32
    %c0_i32_0 = arith.constant 0 : i32
    return %arg0, %c0_i32 : i32, i32
  }
  func.func @transform_1(%arg0: i32) -> (i32, i32) {
    %c0_i32 = arith.constant 0 : i32
    %c0_i32_0 = arith.constant 0 : i32
    return %arg0, %c0_i32 : i32, i32
  }
  func.func @transform_2(%arg0: i32) -> (i32, i32) {
    %c0_i32 = arith.constant 0 : i32
    %c0_i32_0 = arith.constant 0 : i32
    return %arg0, %c0_i32 : i32, i32
  }
  func.func @transform_3(%arg0: i32) -> (i32, i32) {
    %c0_i32 = arith.constant 0 : i32
    %c0_i32_0 = arith.constant 0 : i32
    return %arg0, %c0_i32 : i32, i32
  }
  func.func @transform_4(%arg0: i32) -> (i32, i32) {
    %c0_i32 = arith.constant 0 : i32
    %c0_i32_0 = arith.constant 0 : i32
    %c0_i32_1 = arith.constant 0 : i32
    return %c0_i32, %c0_i32_0 : i32, i32
  }
  func.func @transform_5(%arg0: i32) -> (i32, i32) {
    %c0_i32 = arith.constant 0 : i32
    %c0_i32_0 = arith.constant 0 : i32
    %c0_i32_1 = arith.constant 0 : i32
    return %c0_i32, %c0_i32_0 : i32, i32
  }
  func.func @transform_6(%arg0: i32) -> (i32, i32) {
    %c0_i32 = arith.constant 0 : i32
    %c0_i32_0 = arith.constant 0 : i32
    %c0_i32_1 = arith.constant 0 : i32
    return %c0_i32, %c0_i32_0 : i32, i32
  }
  func.func @transform_7(%arg0: i32) -> (i32, i32) {
    %c0_i32 = arith.constant 0 : i32
    %c0_i32_0 = arith.constant 0 : i32
    %c0_i32_1 = arith.constant 0 : i32
    return %c0_i32, %c0_i32_0 : i32, i32
  }
  func.func @transform_8(%arg0: i32) -> (i32, i32) {
    %c0_i32 = arith.constant 0 : i32
    %c0_i32_0 = arith.constant 0 : i32
    %c0_i32_1 = arith.constant 0 : i32
    return %c0_i32, %c0_i32_0 : i32, i32
  }
  func.func @transform_9(%arg0: i32) -> (i32, i32) {
    %c0_i32 = arith.constant 0 : i32
    %c0_i32_0 = arith.constant 0 : i32
    %c0_i32_1 = arith.constant 0 : i32
    return %c0_i32, %c0_i32_0 : i32, i32
  }
  func.func @transform_10(%arg0: i32) -> (i32, i32, i32) {
    %c0_i32 = arith.constant 0 : i32
    %c0_i32_0 = arith.constant 0 : i32
    %c0_i32_1 = arith.constant 0 : i32
    return %arg0, %c0_i32, %c0_i32_0 : i32, i32, i32
  }
}

</mosaic_0001>

<bundles_post_ra>
// kernel: tpu_custom_call.1
= control target key start
LH: loop header
LB: loop body
LE: loop exit
PB: predicated region body
PF: predicated region fallthrough
CT: control target
= control target key end

     0   :  { %s7063_s0 = inlined_call_operand.vmem [shape: f32[256,2], index: 0, kind: input, shape index: {}]   ;;  %s7064_s1 = inlined_call_operand.vmem [shape: f32[192,2], index: 1, kind: input, shape index: {}]   ;;  %s7065_s2 = inlined_call_operand.vmem [shape: f32[192,1], index: 2, kind: input, shape index: {}]   ;;  %s7066_s3 = inlined_call_operand.vmem [shape: f32[192,1], index: 3, kind: input, shape index: {}]   ;;  %s7067_s4 = inlined_call_operand.vmem [shape: f32[2,32], index: 4, kind: input, shape index: {}]   ;;  %s7068_s5 = inlined_call_operand.vmem [shape: f32[1,32], index: 5, kind: input, shape index: {}]   ;;  %s7069_s6 = inlined_call_operand.vmem [shape: f32[32,32], index: 6, kind: input, shape index: {}]   ;;  %s7070_s7 = inlined_call_operand.vmem [shape: f32[1,32], index: 7, kind: input, shape index: {}]   ;;  %s7071_s8 = inlined_call_operand.vmem [shape: f32[1,32], index: 8, kind: input, shape index: {}]   ;;  %s7072_s9 = inlined_call_operand.<no memory space> [shape: f32[1,1], index: 9, kind: input, shape index: {}]   ;;  %s7073_s10 = inlined_call_operand.hbm [shape: f32[1,8,128], index: 10, kind: output, shape index: {}]  }
   0x1   :  { %v15_v0 = vstv %s7072_s9 }
   0x2   :  { %16 = vst [vmem:[#allocation3] sm:$0x1] %v15_v0 }
   0x3   :  { %v4242_v1 = vld [vmem:[%s7063_s0 + $0x20] sm:$0xff]  ;;  %v4247_v2 = vld [vmem:[%s7063_s0 + $0x10] sm:$0xff]  ;;  %v4178_v4 = vmov 0  }
   0x4   :  { %v4252_v3 = vld [vmem:[%s7063_s0] sm:$0xff]  ;;  %3898 = vset.pattern.permute.xlu2 %v4178_v4  ;;  %3897 = vset.pattern.permute.xlu1 %v4178_v4 }
   0x5   :  { %3896 = vset.pattern.permute.xlu0 %v4178_v4  ;;  %127 = vperm.xlu2 %3898, %v4242_v1  }
   0x6   :  { %117 = vperm.xlu1 %3897, %v4247_v2   ;;  %107 = vperm.xlu0 %3896, %v4252_v3  }
   0x7   :  { %17 = vsyncpa [#allocation5], 0  ;;  %v52_v5 = vld [vmem:[%s7063_s0 + $0x28] sm:$0xff]  ;;  %v50_v6 = vld [vmem:[%s7063_s0 + $0x18] sm:$0xff]  ;;  %v4179_v25 = vmov 1   ;;  %vm1116_vm0 = vcmask 261120  }
   0x8   :  { %v48_v7 = vld [vmem:[%s7063_s0 + $0x8] sm:$0xff]  ;;  %v55_v8 = vld [vmem:[%s7063_s0 + $0x40] sm:$0xff]  ;;  %v54_v9 = vld [vmem:[%s7063_s0 + $0x38] sm:$0xff]  ;;  %vm3335_vm1 = vcmask 7168   ;;  %s3716_s16 = sshll.u32 %s7073_s10, 4  ;;  %s3717_s16 = int_to_ptr.hbm [resolvable:$true] %s3716_s16 }
   0x9   :  { %v53_v10 = vld [vmem:[%s7063_s0 + $0x30] sm:$0xff]  ;;  %v58_v11 = vld [vmem:[%s7063_s0 + $0x58] sm:$0xff]  ;;  %v56_v13 = vld [vmem:[%s7063_s0 + $0x48] sm:$0xff] }
   0xa   :  { %v57_v12 = vld [vmem:[%s7063_s0 + $0x50] sm:$0xff]  ;;  %v60_v15 = vld [vmem:[%s7063_s0 + $0x68] sm:$0xff]  ;;  %v59_v16 = vld [vmem:[%s7063_s0 + $0x60] sm:$0xff] }
   0xb   :  { %v61_v14 = vld [vmem:[%s7063_s0 + $0x70] sm:$0xff]  ;;  %v64_v17 = vld [vmem:[%s7063_s0 + $0x88] sm:$0xff]  ;;  %v63_v18 = vld [vmem:[%s7063_s0 + $0x80] sm:$0xff] }
   0xc   :  { %v62_v19 = vld [vmem:[%s7063_s0 + $0x78] sm:$0xff]  ;;  %v67_v20 = vld [vmem:[%s7063_s0 + $0xa0] sm:$0xff]  ;;  %v65_v22 = vld [vmem:[%s7063_s0 + $0x90] sm:$0xff] }
   0xd   :  { %132 = vperm.xlu2 %3898, %v52_v5   ;;  %v66_v21 = vld [vmem:[%s7063_s0 + $0x98] sm:$0xff]  ;;  %v4322_v24 = vld [vmem:[%s7063_s0 + $0xb0] sm:$0xff]  ;;  %v72_v27 = vld [vmem:[%s7063_s0 + $0xc8] sm:$0xff] }
   0xe   :  { %122 = vperm.xlu1 %3897, %v50_v6   ;;  %112 = vperm.xlu0 %3896, %v48_v7   ;;  %v4317_v23 = vld [vmem:[%s7063_s0 + $0xb8] sm:$0xff]  ;;  %v73_v26 = vld [vmem:[%s7063_s0 + $0xd0] sm:$0xff]  ;;  %v4336_v28 = vld [vmem:[%s7063_s0 + $0xe8] sm:$0xff] }
   0xf   :  { %v4341_v29 = vld [vmem:[%s7063_s0 + $0xe0] sm:$0xff]  ;;  %v4348_v30 = vld [vmem:[%s7063_s0 + $0xf8] sm:$0xff]  ;;  %v68_v33 = vld [vmem:[%s7063_s0 + $0xa8] sm:$0xff] }
  0x10   :  { %v71_v35 = vld [vmem:[%s7063_s0 + $0xc0] sm:$0xff]  ;;  %v74_v39 = vld [vmem:[%s7063_s0 + $0xd8] sm:$0xff]  ;;  %v77_v43 = vld [vmem:[%s7063_s0 + $0xf0] sm:$0xff] }
  0x11   :  { %v42_v56 = vld [vmem:[%s7069_s6 + $0x18] sm:$0xff]  ;;  %v41_v57 = vld [vmem:[%s7069_s6 + $0x10] sm:$0xff]  ;;  %v40_v59 = vld [vmem:[%s7069_s6 + $0x8] sm:$0xff] }
  0x12   :  { %1889 = vmatpush.msra.mxu0 %v42_v56  ;;  %3877 = vmatpush.msra.mxu1 %v42_v56  ;;  %v39_v62 = vld [vmem:[%s7069_s6] sm:$0xff] }
  0x13   :  { %3878 = vmatpush.msra.mxu2 %v42_v56  ;;  %3879 = vmatpush.msra.mxu3 %v42_v56  ;;  %v38_v63 = vld [vmem:[%s7067_s4] sm:$0x3] }
  0x14   :  { %1890 = vmatpush.msra.mxu0 %v41_v57  ;;  %3880 = vmatpush.msra.mxu1 %v41_v57  ;;  %v4439_v0 = vld [vmem:[%s7064_s1] sm:$0xff] }
  0x15   :  { %147 = vperm.xlu2 %3898, %v55_v8   ;;  %3881 = vmatpush.msra.mxu2 %v41_v57 }
  0x16   :  { %142 = vperm.xlu1 %3897, %v54_v9   ;;  %137 = vperm.xlu0 %3896, %v53_v10  }
  0x17   :  { %1891 = vmatpush.msra.mxu0 %v40_v59  ;;  %3883 = vmatpush.msra.mxu1 %v40_v59 }
  0x18   :  { %3884 = vmatpush.msra.mxu2 %v40_v59  ;;  %3882 = vmatpush.msra.mxu3 %v41_v57 }
  0x19   :  { %1892 = vmatpush.msra.mxu0 %v39_v62  ;;  %3886 = vmatpush.msra.mxu1 %v39_v62 }
  0x1a   :  { %3887 = vmatpush.msra.mxu2 %v39_v62  ;;  %3885 = vmatpush.msra.mxu3 %v40_v59 }
  0x1c   :  { %3888 = vmatpush.msra.mxu3 %v39_v62 }
  0x1d   :  { %162 = vperm.xlu2 %3898, %v58_v11  }
  0x1e   :  { %157 = vperm.xlu1 %3897, %v57_v12   ;;  %152 = vperm.xlu0 %3896, %v56_v13  }
  0x25   :  { %177 = vperm.xlu2 %3898, %v61_v14  }
  0x26   :  { %172 = vperm.xlu1 %3897, %v60_v15   ;;  %167 = vperm.xlu0 %3896, %v59_v16  }
  0x2d   :  { %192 = vperm.xlu2 %3898, %v64_v17  }
  0x2e   :  { %187 = vperm.xlu1 %3897, %v63_v18   ;;  %182 = vperm.xlu0 %3896, %v62_v19  }
  0x35   :  { %207 = vperm.xlu2 %3898, %v67_v20  }
  0x36   :  { %202 = vperm.xlu1 %3897, %v66_v21   ;;  %197 = vperm.xlu0 %3896, %v65_v22  }
  0x3d   :  { %222 = vperm.xlu2 %3898, %v4317_v23  }
  0x3e   :  { %217 = vperm.xlu1 %3897, %v4322_v24   ;;  %3900 = vset.pattern.permute.xlu0 %v4179_v25 }
  0x3f   :  { %302 = vperm.xlu0 %3900, %v48_v7  }
  0x45   :  { %237 = vperm.xlu2 %3898, %v73_v26  }
  0x46   :  { %232 = vperm.xlu1 %3897, %v72_v27  }
  0x47   :  { %322 = vperm.xlu0 %3900, %v53_v10  }
  0x4d   :  { %252 = vperm.xlu2 %3898, %v4336_v28  }
  0x4e   :  { %247 = vperm.xlu1 %3897, %v4341_v29  }
  0x4f   :  { %334 = vperm.xlu0 %3900, %v56_v13  }
  0x55   :  { %3899 = vset.pattern.permute.xlu2 %v4179_v25 }
  0x56   :  { %262 = vperm.xlu1 %3897, %v4348_v30   ;;  %298 = vperm.xlu2 %3899, %v4252_v3   ;;  %v4449_v3 = vperm.slane %v38_v63, 0 }
  0x57   :  { %346 = vperm.xlu0 %3900, %v59_v16  }
  0x5e   :  { %3901 = vset.pattern.permute.xlu1 %v4179_v25  ;;  %310 = vperm.xlu2 %3899, %v50_v6  }
  0x5f   :  { %306 = vperm.xlu1 %3901, %v4247_v2   ;;  %358 = vperm.xlu0 %3900, %v62_v19   ;;  %v4355_v31 = vpop.permute.xlu2 %127  ;;  %v4446_v2 = vperm.slane %v38_v63, 1 }
  0x66   :  { %318 = vperm.xlu2 %3899, %v52_v5  }
  0x67   :  { %314 = vperm.xlu1 %3901, %v4242_v1   ;;  %370 = vperm.xlu0 %3900, %v65_v22   ;;  %v4358_v32 = vpop.permute.xlu2 %132  ;;  %v4444_v1 = vld [vmem:[%s7064_s1 + $0x8] sm:$0xff] }
  0x68   :  { %v270_v62 = vmul.f32 %v4358_v32, %v4449_v3 }
  0x6e   :  { %330 = vperm.xlu2 %3899, %v55_v8  }
  0x6f   :  { %326 = vperm.xlu1 %3901, %v54_v9   ;;  %382 = vperm.xlu0 %3900, %v68_v33   ;;  %v4363_v34 = vpop.permute.xlu2 %147  ;;  %v4462_v9 = vld [vmem:[%s7068_s5] ss:$0 sm:$0xff] }
  0x76   :  { %342 = vperm.xlu2 %3899, %v58_v11  }
  0x77   :  { %338 = vperm.xlu1 %3901, %v57_v12   ;;  %394 = vperm.xlu0 %3900, %v71_v35   ;;  %v4368_v36 = vpop.permute.xlu2 %162 }
  0x78   :  { %v4370_v37 = vpop.permute.xlu1 %117  ;;  %v4372_v38 = vpop.permute.xlu0 %107 }
  0x79   :  { %v265_v7 = vmul.f32 %v4372_v38, %v4449_v3  ;;  %v4505_v38 = vld [vmem:[%s7064_s1 + $0x20] sm:$0xff] }
  0x7e   :  { %354 = vperm.xlu2 %3899, %v61_v14  }
  0x7f   :  { %350 = vperm.xlu1 %3901, %v60_v15   ;;  %406 = vperm.xlu0 %3900, %v74_v39   ;;  %v4377_v40 = vpop.permute.xlu2 %177  ;;  %v4470_v15 = vld [vmem:[%s7064_s1 + $0x18] sm:$0xff] }
  0x80   :  { %v4379_v41 = vpop.permute.xlu1 %122  ;;  %v4381_v42 = vpop.permute.xlu0 %112 }
  0x81   :  { %v266_v11 = vmul.f32 %v4381_v42, %v4449_v3  ;;  %v268_v22 = vmul.f32 %v4379_v41, %v4449_v3 }
  0x86   :  { %366 = vperm.xlu2 %3899, %v64_v17   ;;  %v4476_v17 = vld [vmem:[%s7064_s1 + $0x10] sm:$0xff] }
  0x87   :  { %362 = vperm.xlu1 %3901, %v63_v18   ;;  %418 = vperm.xlu0 %3900, %v77_v43   ;;  %v4386_v44 = vpop.permute.xlu2 %192  ;;  %v4481_v18 = vld [vmem:[%s7064_s1 + $0x30] sm:$0xff] }
  0x88   :  { %v4388_v45 = vpop.permute.xlu1 %142  ;;  %v4390_v46 = vpop.permute.xlu0 %137 }
  0x8e   :  { %378 = vperm.xlu2 %3899, %v67_v20  }
  0x8f   :  { %374 = vperm.xlu1 %3901, %v66_v21   ;;  %3902 = vset.pattern.permute.xlu0 %v4178_v4  ;;  %v4393_v47 = vpop.permute.xlu2 %207 }
  0x90   :  { %v4395_v48 = vpop.permute.xlu1 %157  ;;  %212 = vperm.xlu0 %3902, %v68_v33   ;;  %v4397_v49 = vpop.permute.xlu0 %152 }
  0x91   :  { %v274_v63 = vmul.f32 %v4397_v49, %v4449_v3 }
  0x96   :  { %390 = vperm.xlu2 %3899, %v4317_v23  }
  0x97   :  { %386 = vperm.xlu1 %3901, %v4322_v24   ;;  %v4401_v50 = vpop.permute.xlu2 %222 }
  0x98   :  { %v4403_v51 = vpop.permute.xlu1 %172  ;;  %227 = vperm.xlu0 %3902, %v71_v35   ;;  %v4405_v52 = vpop.permute.xlu0 %167 }
  0x9e   :  { %402 = vperm.xlu2 %3899, %v73_v26   ;;  %v271_v26 = vmul.f32 %v4390_v46, %v4449_v3 }
  0x9f   :  { %398 = vperm.xlu1 %3901, %v72_v27   ;;  %v4407_v53 = vpop.permute.xlu2 %237 }
  0xa0   :  { %v4409_v54 = vpop.permute.xlu1 %187  ;;  %242 = vperm.xlu0 %3902, %v74_v39   ;;  %v4411_v55 = vpop.permute.xlu0 %182  ;;  %v88_v39 = vld [vmem:[%s7064_s1 + $0x48] sm:$0xff] }
  0xa6   :  { %414 = vperm.xlu2 %3899, %v4336_v28  }
  0xa7   :  { %410 = vperm.xlu1 %3901, %v4341_v29   ;;  %v4421_v58 = vpop.permute.xlu2 %252 }
  0xa8   :  { %v4426_v60 = vpop.permute.xlu1 %202  ;;  %257 = vperm.xlu0 %3902, %v77_v43   ;;  %v4428_v61 = vpop.permute.xlu0 %197 }
  0xae   :  { %3903 = vset.pattern.permute.xlu2 %v4178_v4 }
  0xaf   :  { %422 = vperm.xlu1 %3901, %v4348_v30   ;;  %782 = vperm.xlu2 %3903, %v4439_v0   ;;  %v4499_v30 = vld [vmem:[%s7064_s1 + $0x28] sm:$0xff] }
  0xb0   :  { %v4453_v5 = vpop.permute.xlu1 %217  ;;  %787 = vperm.xlu0 %3902, %v4444_v1   ;;  %v299_v6 = vpop.permute.xlu2 %298 }
  0xb1   :  { %v425_v8 = vmul.f32 %v299_v6, %v4446_v2  ;;  %v303_v10 = vpop.permute.xlu0 %302 }
  0xb2   :  { %v426_v12 = vmul.f32 %v303_v10, %v4446_v2 }
  0xb3   :  { %v457_v13 = vadd.f32 %v425_v8, %v265_v7 }
  0xb4   :  { %v458_v14 = vadd.f32 %v426_v12, %v266_v11 }
  0xb5   :  { %v492_v16 = vadd.f32 %v4462_v9, %v457_v13 }
  0xb6   :  { %v493_v19 = vadd.f32 %v4462_v9, %v458_v14 }
  0xb7   :  { %3916 = vtanh.f32 %v492_v16  ;;  %3904 = vset.pattern.permute.xlu1 %v4178_v4  ;;  %797 = vperm.xlu2 %3903, %v4470_v15  }
  0xb8   :  { %3918 = vtanh.f32 %v493_v19  ;;  %792 = vperm.xlu1 %3904, %v4476_v17   ;;  %v4487_v20 = vpop.permute.xlu1 %232  ;;  %812 = vperm.xlu0 %3902, %v4481_v18   ;;  %v311_v21 = vpop.permute.xlu2 %310 }
  0xb9   :  { %v428_v23 = vmul.f32 %v311_v21, %v4446_v2  ;;  %v323_v24 = vpop.permute.xlu0 %322 }
  0xba   :  { %v431_v27 = vmul.f32 %v323_v24, %v4446_v2 }
  0xbb   :  { %v460_v28 = vadd.f32 %v428_v23, %v268_v22  ;;  %v4531_v22 = vld [vmem:[%s7064_s1 + $0x40] sm:$0xff] }
  0xbc   :  { %v463_v29 = vadd.f32 %v431_v27, %v271_v26 }
  0xbd   :  { %v3917_v33 = vpop.eup %3916  ;;  %v495_v35 = vadd.f32 %v4462_v9, %v460_v28  ;;  %v4538_v28 = vld [vmem:[%s7064_s1 + $0x38] sm:$0xff] }
  0xbe   :  { %v3919_v41 = vpop.eup %3918  ;;  %v556_v42 = vmul.f32 %v3917_v33, %v3917_v33  ;;  %1117 = vst.msk [vmem:[#allocation2] sm:$0xff] %vm1116_vm0, %v3917_v33  ;;  %v498_v43 = vadd.f32 %v4462_v9, %v463_v29  ;;  %v684_v12 = vmul.f32 -2.0, %v3917_v33  ;;  %v91_v29 = vld [vmem:[%s7064_s1 + $0x60] sm:$0xff] }
  0xbf   :  { %v557_v46 = vmul.f32 %v3919_v41, %v3919_v41  ;;  %1118 = vst.msk [vmem:[#allocation2 + $0x8] sm:$0xff] %vm1116_vm0, %v3919_v41  ;;  %3920 = vtanh.f32 %v495_v35  ;;  %807 = vperm.xlu2 %3903, %v4499_v30   ;;  %v685_v19 = vmul.f32 -2.0, %v3919_v41 }
  0xc0   :  { %v588_v56 = vsub.f32 1.0, %v556_v42  ;;  %3922 = vtanh.f32 %v498_v43  ;;  %802 = vperm.xlu1 %3904, %v4505_v38   ;;  %v4515_v57 = vpop.permute.xlu1 %247  ;;  %827 = vperm.xlu0 %3902, %v88_v39   ;;  %v319_v59 = vpop.permute.xlu2 %318 }
  0xc1   :  { %v589_v6 = vsub.f32 1.0, %v557_v46  ;;  %v430_v7 = vmul.f32 %v319_v59, %v4446_v2  ;;  %v335_v8 = vpop.permute.xlu0 %334 }
  0xc2   :  { %v620_v10 = vmul.f32 %v588_v56, %v4449_v3  ;;  %v652_v11 = vmul.f32 %v588_v56, %v4446_v2  ;;  %v434_v13 = vmul.f32 %v335_v8, %v4446_v2 }
  0xc3   :  { %v621_v14 = vmul.f32 %v589_v6, %v4449_v3  ;;  %v653_v16 = vmul.f32 %v589_v6, %v4446_v2  ;;  %v462_v32 = vadd.f32 %v430_v7, %v270_v62  ;;  %v273_v62 = vmul.f32 %v4363_v34, %v4449_v3 }
  0xc4   :  { %v716_v21 = vmul.f32 %v684_v12, %v620_v10  ;;  %1149 = vst.msk [vmem:[#allocation2 + $0x100] sm:$0xff] %vm1116_vm0, %v620_v10  ;;  %v466_v49 = vadd.f32 %v434_v13, %v274_v63  ;;  %v277_v63 = vmul.f32 %v4405_v52, %v4449_v3 }
  0xc5   :  { %v3921_v23 = vpop.eup %3920  ;;  %1181 = vst.msk [vmem:[#allocation2 + $0x200] sm:$0xff] %vm1116_vm0, %v652_v11  ;;  %v717_v24 = vmul.f32 %v685_v19, %v621_v14  ;;  %v497_v26 = vadd.f32 %v4462_v9, %v462_v32  ;;  %v1269_v27 = vld [vmem:[#allocation2] sm:$0xff] }
  0xc6   :  { %v3923_v33 = vpop.eup %3922  ;;  %v748_v35 = vmul.f32 %v716_v21, %v4449_v3  ;;  %1150 = vst.msk [vmem:[#allocation2 + $0x108] sm:$0xff] %vm1116_vm0, %v621_v14  ;;  %v559_v39 = vmul.f32 %v3921_v23, %v3921_v23  ;;  %v501_v41 = vadd.f32 %v4462_v9, %v466_v49  ;;  %3725 = vmatmul.msk.f32.vlgmr.msra.gmra.mxu0 %vm1116_vm0, %v1269_v27  ;;  %v687_v12 = vmul.f32 -2.0, %v3921_v23  ;;  %v4571_v21 = vld [vmem:[%s7064_s1 + $0x58] sm:$0xff]  ;;  %v4578_v27 = vld [vmem:[%s7064_s1 + $0x50] sm:$0xff] }
  0xc7   :  { %v749_v42 = vmul.f32 %v717_v24, %v4449_v3  ;;  %1182 = vst.msk [vmem:[#allocation2 + $0x208] sm:$0xff] %vm1116_vm0, %v653_v16  ;;  %v562_v43 = vmul.f32 %v3923_v33, %v3923_v33  ;;  %3924 = vtanh.f32 %v497_v26  ;;  %822 = vperm.xlu2 %3903, %v4531_v22   ;;  %v690_v52 = vmul.f32 -2.0, %v3923_v33  ;;  %v1270_v26 = vld [vmem:[#allocation2 + $0x8] sm:$0xff] }
  0xc8   :  { %1213 = vst.msk [vmem:[#allocation2 + $0x300] sm:$0xff] %vm1116_vm0, %v748_v35  ;;  %v591_v46 = vsub.f32 1.0, %v559_v39  ;;  %3926 = vtanh.f32 %v501_v41  ;;  %817 = vperm.xlu1 %3904, %v4538_v28   ;;  %v4552_v56 = vpop.permute.xlu1 %262  ;;  %842 = vperm.xlu0 %3902, %v91_v29   ;;  %v331_v59 = vpop.permute.xlu2 %330  ;;  %v4583_v29 = vld [vmem:[%s7064_s1 + $0x78] sm:$0xff] }
  0xc9   :  { %1214 = vst.msk [vmem:[#allocation2 + $0x308] sm:$0xff] %vm1116_vm0, %v749_v42  ;;  %v594_v6 = vsub.f32 1.0, %v562_v43  ;;  %v433_v7 = vmul.f32 %v331_v59, %v4446_v2  ;;  %v347_v8 = vpop.permute.xlu0 %346  ;;  %v267_v59 = vmul.f32 %v4370_v37, %v4449_v3 }
  0xca   :  { %v623_v10 = vmul.f32 %v591_v46, %v4449_v3  ;;  %v655_v11 = vmul.f32 %v591_v46, %v4446_v2  ;;  %1120 = vst.msk [vmem:[#allocation2 + $0x18] sm:$0xff] %vm1116_vm0, %v3921_v23  ;;  %v437_v13 = vmul.f32 %v347_v8, %v4446_v2  ;;  %v276_v46 = vmul.f32 %v4368_v36, %v4449_v3 }
  0xcb   :  { %v626_v34 = vmul.f32 %v594_v6, %v4449_v3  ;;  %v658_v14 = vmul.f32 %v594_v6, %v4446_v2  ;;  %1123 = vst.msk [vmem:[#allocation2 + $0x30] sm:$0xff] %vm1116_vm0, %v3923_v33  ;;  %v465_v16 = vadd.f32 %v433_v7, %v273_v62  ;;  %v280_v6 = vmul.f32 %v4411_v55, %v4449_v3 }
  0xcc   :  { %v719_v19 = vmul.f32 %v687_v12, %v623_v10  ;;  %1152 = vst.msk [vmem:[#allocation2 + $0x118] sm:$0xff] %vm1116_vm0, %v623_v10  ;;  %v469_v32 = vadd.f32 %v437_v13, %v277_v63 }
  0xcd   :  { %v3925_v49 = vpop.eup %3924  ;;  %1184 = vst.msk [vmem:[#allocation2 + $0x218] sm:$0xff] %vm1116_vm0, %v655_v11  ;;  %v722_v23 = vmul.f32 %v690_v52, %v626_v34  ;;  %v500_v24 = vadd.f32 %v4462_v9, %v465_v16 }
  0xce   :  { %v3927_v33 = vpop.eup %3926  ;;  %v751_v35 = vmul.f32 %v719_v19, %v4449_v3  ;;  %1155 = vst.msk [vmem:[#allocation2 + $0x130] sm:$0xff] %vm1116_vm0, %v626_v34  ;;  %v561_v39 = vmul.f32 %v3925_v49, %v3925_v49  ;;  %v504_v41 = vadd.f32 %v4462_v9, %v469_v32  ;;  %3726 = vmatmul.msk.f32.gmra.mxu0 %vm1116_vm0, %v1270_v26  ;;  %v689_v7 = vmul.f32 -2.0, %v3925_v49 }
  0xcf   :  { %v754_v42 = vmul.f32 %v722_v23, %v4449_v3  ;;  %1187 = vst.msk [vmem:[#allocation2 + $0x230] sm:$0xff] %vm1116_vm0, %v658_v14  ;;  %v565_v43 = vmul.f32 %v3927_v33, %v3927_v33  ;;  %3928 = vtanh.f32 %v500_v24  ;;  %837 = vperm.xlu2 %3903, %v4571_v21   ;;  %v693_v52 = vmul.f32 -2.0, %v3927_v33 }
  0xd0   :  { %1216 = vst.msk [vmem:[#allocation2 + $0x318] sm:$0xff] %vm1116_vm0, %v751_v35  ;;  %v593_v62 = vsub.f32 1.0, %v561_v39  ;;  %3930 = vtanh.f32 %v504_v41  ;;  %832 = vperm.xlu1 %3904, %v4578_v27   ;;  %857 = vperm.xlu0 %3902, %v4583_v29   ;;  %v343_v63 = vpop.permute.xlu2 %342  ;;  %v269_v26 = vmul.f32 %v4355_v31, %v4449_v3  ;;  %v4624_v41 = vld [vmem:[%s7064_s1 + $0x68] sm:$0xff] }
  0xd1   :  { %1219 = vst.msk [vmem:[#allocation2 + $0x330] sm:$0xff] %vm1116_vm0, %v754_v42  ;;  %v597_v8 = vsub.f32 1.0, %v565_v43  ;;  %v307_v36 = vpop.permute.xlu1 %306  ;;  %v436_v10 = vmul.f32 %v343_v63, %v4446_v2  ;;  %v359_v37 = vpop.permute.xlu0 %358  ;;  %v4629_v42 = vld [vmem:[%s7064_s1 + $0x90] sm:$0xff] }
  0xd2   :  { %v625_v11 = vmul.f32 %v593_v62, %v4449_v3  ;;  %v657_v12 = vmul.f32 %v593_v62, %v4446_v2  ;;  %1122 = vst.msk [vmem:[#allocation2 + $0x28] sm:$0xff] %vm1116_vm0, %v3925_v49  ;;  %v427_v13 = vmul.f32 %v307_v36, %v4446_v2  ;;  %v440_v34 = vmul.f32 %v359_v37, %v4446_v2  ;;  %v4615_v49 = vld [vmem:[%s7064_s1 + $0x70] sm:$0xff] }
  0xd3   :  { %v629_v55 = vmul.f32 %v597_v8, %v4449_v3  ;;  %v661_v14 = vmul.f32 %v597_v8, %v4446_v2  ;;  %1126 = vst.msk [vmem:[#allocation2 + $0x48] sm:$0xff] %vm1116_vm0, %v3927_v33  ;;  %v468_v16 = vadd.f32 %v436_v10, %v276_v46  ;;  %v279_v62 = vmul.f32 %v4377_v40, %v4449_v3 }
  0xd4   :  { %v721_v19 = vmul.f32 %v689_v7, %v625_v11  ;;  %1154 = vst.msk [vmem:[#allocation2 + $0x128] sm:$0xff] %vm1116_vm0, %v625_v11  ;;  %v459_v32 = vadd.f32 %v427_v13, %v267_v59  ;;  %v472_v23 = vadd.f32 %v440_v34, %v280_v6  ;;  %v283_v7 = vmul.f32 %v4428_v61, %v4449_v3 }
  0xd5   :  { %v3929_v24 = vpop.eup %3928  ;;  %1186 = vst.msk [vmem:[#allocation2 + $0x228] sm:$0xff] %vm1116_vm0, %v657_v12  ;;  %v725_v35 = vmul.f32 %v693_v52, %v629_v55  ;;  %v503_v33 = vadd.f32 %v4462_v9, %v468_v16  ;;  %v1307_v39 = vld [vmem:[#allocation2 + $0x130] sm:$0xff] }
  0xd6   :  { %v3931_v43 = vpop.eup %3930  ;;  %v753_v46 = vmul.f32 %v721_v19, %v4449_v3  ;;  %1158 = vst.msk [vmem:[#allocation2 + $0x148] sm:$0xff] %vm1116_vm0, %v629_v55  ;;  %v564_v31 = vmul.f32 %v3929_v24, %v3929_v24  ;;  %v494_v59 = vadd.f32 %v4462_v9, %v459_v32  ;;  %3763 = vmatmul.msk.f32.vlgmr.msra.gmra.mxu1 %vm1116_vm0, %v1307_v39  ;;  %v692_v10 = vmul.f32 -2.0, %v3929_v24 }
  0xd7   :  { %v757_v63 = vmul.f32 %v725_v35, %v4449_v3  ;;  %1190 = vst.msk [vmem:[#allocation2 + $0x248] sm:$0xff] %vm1116_vm0, %v661_v14  ;;  %v568_v6 = vmul.f32 %v3931_v43, %v3931_v43  ;;  %3932 = vtanh.f32 %v503_v33  ;;  %852 = vperm.xlu2 %3903, %v4615_v49   ;;  %v507_v36 = vadd.f32 %v4462_v9, %v472_v23 }
  0xd8   :  { %1218 = vst.msk [vmem:[#allocation2 + $0x328] sm:$0xff] %vm1116_vm0, %v753_v46  ;;  %v596_v8 = vsub.f32 1.0, %v564_v31  ;;  %3934 = vtanh.f32 %v494_v59  ;;  %847 = vperm.xlu1 %3904, %v4624_v41   ;;  %872 = vperm.xlu0 %3902, %v4629_v42   ;;  %v355_v40 = vpop.permute.xlu2 %354  ;;  %v696_v11 = vmul.f32 -2.0, %v3931_v43 }
  0xd9   :  { %1222 = vst.msk [vmem:[#allocation2 + $0x348] sm:$0xff] %vm1116_vm0, %v757_v63  ;;  %v600_v37 = vsub.f32 1.0, %v568_v6  ;;  %v315_v12 = vpop.permute.xlu1 %314  ;;  %v439_v13 = vmul.f32 %v355_v40, %v4446_v2  ;;  %v371_v61 = vpop.permute.xlu0 %370  ;;  %3936 = vtanh.f32 %v507_v36 }
  0xda   :  { %v628_v34 = vmul.f32 %v596_v8, %v4449_v3  ;;  %v660_v55 = vmul.f32 %v596_v8, %v4446_v2  ;;  %1125 = vst.msk [vmem:[#allocation2 + $0x40] sm:$0xff] %vm1116_vm0, %v3929_v24  ;;  %v429_v14 = vmul.f32 %v315_v12, %v4446_v2  ;;  %v443_v32 = vmul.f32 %v371_v61, %v4446_v2  ;;  %v4660_v24 = vld [vmem:[%s7064_s1 + $0x88] sm:$0xff] }
  0xdb   :  { %v632_v52 = vmul.f32 %v600_v37, %v4449_v3  ;;  %v664_v16 = vmul.f32 %v600_v37, %v4446_v2  ;;  %1129 = vst.msk [vmem:[#allocation2 + $0x60] sm:$0xff] %vm1116_vm0, %v3931_v43  ;;  %v471_v19 = vadd.f32 %v439_v13, %v279_v62  ;;  %v4667_v43 = vld [vmem:[%s7064_s1 + $0x80] sm:$0xff]  ;;  %v282_v62 = vmul.f32 %v4386_v44, %v4449_v3 }
  0xdc   :  { %v724_v23 = vmul.f32 %v692_v10, %v628_v34  ;;  %1157 = vst.msk [vmem:[#allocation2 + $0x140] sm:$0xff] %vm1116_vm0, %v628_v34  ;;  %v461_v35 = vadd.f32 %v429_v14, %v269_v26  ;;  %v475_v31 = vadd.f32 %v443_v32, %v283_v7  ;;  %v4672_v26 = vld [vmem:[%s7064_s1 + $0xa0] sm:$0xff]  ;;  %v272_v8 = vmul.f32 %v4388_v45, %v4449_v3 }
  0xdd   :  { %v3933_v33 = vpop.eup %3932  ;;  %1189 = vst.msk [vmem:[#allocation2 + $0x240] sm:$0xff] %vm1116_vm0, %v660_v55  ;;  %v728_v39 = vmul.f32 %v696_v11, %v632_v52  ;;  %v506_v46 = vadd.f32 %v4462_v9, %v471_v19 }
  0xde   :  { %v3935_v59 = vpop.eup %3934  ;;  %v756_v63 = vmul.f32 %v724_v23, %v4449_v3  ;;  %1161 = vst.msk [vmem:[#allocation2 + $0x160] sm:$0xff] %vm1116_vm0, %v632_v52  ;;  %v567_v6 = vmul.f32 %v3933_v33, %v3933_v33  ;;  %v496_v7 = vadd.f32 %v4462_v9, %v461_v35  ;;  %v695_v37 = vmul.f32 -2.0, %v3933_v33 }
  0xdf   :  { %v760_v36 = vmul.f32 %v728_v39, %v4449_v3  ;;  %1193 = vst.msk [vmem:[#allocation2 + $0x260] sm:$0xff] %vm1116_vm0, %v664_v16  ;;  %v558_v40 = vmul.f32 %v3935_v59, %v3935_v59  ;;  %3938 = vtanh.f32 %v506_v46  ;;  %867 = vperm.xlu2 %3903, %v4660_v24   ;;  %v4684_v10 = vpop.eup %3936  ;;  %v510_v11 = vadd.f32 %v4462_v9, %v475_v31 }
  0xe0   :  { %1221 = vst.msk [vmem:[#allocation2 + $0x340] sm:$0xff] %vm1116_vm0, %v756_v63  ;;  %v599_v44 = vsub.f32 1.0, %v567_v6  ;;  %3940 = vtanh.f32 %v496_v7  ;;  %862 = vperm.xlu1 %3904, %v4667_v43   ;;  %882 = vperm.xlu0 %3902, %v4672_v26   ;;  %v367_v45 = vpop.permute.xlu2 %366  ;;  %v686_v13 = vmul.f32 -2.0, %v3935_v59  ;;  %v571_v61 = vmul.f32 %v4684_v10, %v4684_v10 }
  0xe1   :  { %1225 = vst.msk [vmem:[#allocation2 + $0x360] sm:$0xff] %vm1116_vm0, %v760_v36  ;;  %v590_v12 = vsub.f32 1.0, %v558_v40  ;;  %v327_v34 = vpop.permute.xlu1 %326  ;;  %v442_v55 = vmul.f32 %v367_v45, %v4446_v2  ;;  %v4694_v14 = vpop.permute.xlu0 %382  ;;  %3942 = vtanh.f32 %v510_v11  ;;  %v285_v63 = vmul.f32 %v4393_v47, %v4449_v3  ;;  %v4725_v11 = vld [vmem:[%s7064_s1 + $0xb0] sm:$0xff] }
  0xe2   :  { %1119 = vst.msk [vmem:[#allocation2 + $0x10] sm:$0xff] %vm1116_vm0, %v3935_v59  ;;  %v631_v52 = vmul.f32 %v599_v44, %v4449_v3  ;;  %v663_v16 = vmul.f32 %v599_v44, %v4446_v2  ;;  %v432_v19 = vmul.f32 %v327_v34, %v4446_v2  ;;  %v603_v35 = vsub.f32 1.0, %v571_v61 }
  0xe3   :  { %v622_v32 = vmul.f32 %v590_v12, %v4449_v3  ;;  %v654_v23 = vmul.f32 %v590_v12, %v4446_v2  ;;  %1128 = vst.msk [vmem:[#allocation2 + $0x58] sm:$0xff] %vm1116_vm0, %v3933_v33  ;;  %v474_v39 = vadd.f32 %v442_v55, %v282_v62  ;;  %v699_v36 = vmul.f32 -2.0, %v4684_v10  ;;  %v4714_v33 = vld [vmem:[%s7064_s1 + $0x98] sm:$0xff] }
  0xe4   :  { %v727_v46 = vmul.f32 %v695_v37, %v631_v52  ;;  %1160 = vst.msk [vmem:[#allocation2 + $0x158] sm:$0xff] %vm1116_vm0, %v631_v52  ;;  %v464_v31 = vadd.f32 %v432_v19, %v272_v8  ;;  %v635_v7 = vmul.f32 %v603_v35, %v4449_v3  ;;  %v275_v34 = vmul.f32 %v4395_v48, %v4449_v3 }
  0xe5   :  { %v4704_v59 = vpop.eup %3938  ;;  %v718_v6 = vmul.f32 %v686_v13, %v622_v32  ;;  %1151 = vst.msk [vmem:[#allocation2 + $0x110] sm:$0xff] %vm1116_vm0, %v622_v32  ;;  %v509_v44 = vadd.f32 %v4462_v9, %v474_v39  ;;  %v667_v55 = vmul.f32 %v603_v35, %v4446_v2 }
  0xe6   :  { %v3941_v62 = vpop.eup %3940  ;;  %1183 = vst.msk [vmem:[#allocation2 + $0x210] sm:$0xff] %vm1116_vm0, %v654_v23  ;;  %v759_v8 = vmul.f32 %v727_v46, %v4449_v3  ;;  %v570_v47 = vmul.f32 %v4704_v59, %v4704_v59  ;;  %v499_v40 = vadd.f32 %v4462_v9, %v464_v31  ;;  %v1345_v37 = vld [vmem:[#allocation2 + $0x260] sm:$0xff]  ;;  %v731_v12 = vmul.f32 %v699_v36, %v635_v7 }
  0xe7   :  { %v750_v45 = vmul.f32 %v718_v6, %v4449_v3  ;;  %1192 = vst.msk [vmem:[#allocation2 + $0x258] sm:$0xff] %vm1116_vm0, %v663_v16  ;;  %v560_v13 = vmul.f32 %v3941_v62, %v3941_v62  ;;  %3801 = vmatmul.msk.f32.vlgmr.msra.gmra.mxu2 %vm1116_vm0, %v1345_v37  ;;  %v4730_v61 = vpop.eup %3942  ;;  %3905 = vset.pattern.permute.xlu2 %v4179_v25  ;;  %v698_v31 = vmul.f32 -2.0, %v4704_v59 }
  0xe8   :  { %1224 = vst.msk [vmem:[#allocation2 + $0x358] sm:$0xff] %vm1116_vm0, %v759_v8  ;;  %v602_v52 = vsub.f32 1.0, %v570_v47  ;;  %3944 = vtanh.f32 %v499_v40  ;;  %877 = vperm.xlu1 %3904, %v4714_v33   ;;  %v379_v16 = vpop.permute.xlu2 %378  ;;  %v763_v19 = vmul.f32 %v731_v12, %v4449_v3  ;;  %v4742_v23 = vmul.f32 %v4730_v61, %v4730_v61  ;;  %892 = vperm.xlu0 %3902, %v4725_v11  }
  0xe9   :  { %1215 = vst.msk [vmem:[#allocation2 + $0x310] sm:$0xff] %vm1116_vm0, %v750_v45  ;;  %v592_v32 = vsub.f32 1.0, %v560_v13  ;;  %v1271_v48 = vld [vmem:[#allocation2 + $0x10] sm:$0xff]  ;;  %v339_v35 = vpop.permute.xlu1 %338  ;;  %925 = vperm.xlu2 %3905, %v4439_v0   ;;  %v4746_v39 = vpop.permute.xlu0 %394  ;;  %3946 = vtanh.f32 %v509_v44  ;;  %v688_v8 = vmul.f32 -2.0, %v3941_v62  ;;  %v445_v47 = vmul.f32 %v379_v16, %v4446_v2 }
  0xea   :  { %1132 = vst.msk [vmem:[#allocation2 + $0x78] sm:$0xff] %vm1116_vm0, %v4684_v10  ;;  %v634_v46 = vmul.f32 %v602_v52, %v4449_v3  ;;  %3727 = vmatmul.msk.f32.gmra.mxu0 %vm1116_vm0, %v1271_v48  ;;  %v435_v6 = vmul.f32 %v339_v35, %v4446_v2  ;;  %v606_v0 = vsub.f32 1.0, %v4742_v23  ;;  %v288_v13 = vmul.f32 %v4401_v50, %v4449_v3 }
  0xeb   :  { %1164 = vst.msk [vmem:[#allocation2 + $0x178] sm:$0xff] %vm1116_vm0, %v635_v7  ;;  %v624_v36 = vmul.f32 %v592_v32, %v4449_v3  ;;  %v656_v10 = vmul.f32 %v592_v32, %v4446_v2  ;;  %v477_v12 = vadd.f32 %v445_v47, %v285_v63  ;;  %v666_v50 = vmul.f32 %v602_v52, %v4446_v2 }
  0xec   :  { %1196 = vst.msk [vmem:[#allocation2 + $0x278] sm:$0xff] %vm1116_vm0, %v667_v55  ;;  %v730_v40 = vmul.f32 %v698_v31, %v634_v46  ;;  %v467_v37 = vadd.f32 %v435_v6, %v275_v34  ;;  %v638_v45 = vmul.f32 %v606_v0, %v4449_v3  ;;  %v278_v55 = vmul.f32 %v4403_v51, %v4449_v3  ;;  %v1272_v6 = vld [vmem:[#allocation2 + $0x18] sm:$0xff] }
  0xed   :  { %1228 = vst.msk [vmem:[#allocation2 + $0x378] sm:$0xff] %vm1116_vm0, %v763_v19  ;;  %v720_v44 = vmul.f32 %v688_v8, %v624_v36  ;;  %v702_v19 = vmul.f32 -2.0, %v4730_v61  ;;  %v512_v51 = vadd.f32 %v4462_v9, %v477_v12 }
  0xee   :  { %v4762_v7 = vpop.eup %3944  ;;  %1121 = vst.msk [vmem:[#allocation2 + $0x20] sm:$0xff] %vm1116_vm0, %v3941_v62  ;;  %v502_v16 = vadd.f32 %v4462_v9, %v467_v37  ;;  %v762_v62 = vmul.f32 %v730_v40, %v4449_v3 }
  0xef   :  { %v752_v34 = vmul.f32 %v720_v44, %v4449_v3  ;;  %1153 = vst.msk [vmem:[#allocation2 + $0x120] sm:$0xff] %vm1116_vm0, %v624_v36  ;;  %v563_v63 = vmul.f32 %v4762_v7, %v4762_v7  ;;  %v4775_v32 = vpop.eup %3946  ;;  %v734_v48 = vmul.f32 %v702_v19, %v638_v45  ;;  %v291_v19 = vmul.f32 %v4407_v53, %v4449_v3 }
  0xf0   :  { %1185 = vst.msk [vmem:[#allocation2 + $0x220] sm:$0xff] %vm1116_vm0, %v656_v10  ;;  %3948 = vtanh.f32 %v502_v16  ;;  %3906 = vset.pattern.permute.xlu1 %v4179_v25  ;;  %v391_v23 = vpop.permute.xlu2 %390  ;;  %v573_v31 = vmul.f32 %v4775_v32, %v4775_v32  ;;  %3909 = vset.pattern.permute.xlu0 %v4179_v25 }
  0xf1   :  { %1217 = vst.msk [vmem:[#allocation2 + $0x320] sm:$0xff] %vm1116_vm0, %v752_v34  ;;  %v595_v35 = vsub.f32 1.0, %v563_v63  ;;  %929 = vperm.xlu1 %3906, %v4444_v1   ;;  %v351_v52 = vpop.permute.xlu1 %350  ;;  %v4787_v36 = vpop.permute.xlu0 %406  ;;  %3950 = vtanh.f32 %v512_v51  ;;  %933 = vperm.xlu2 %3905, %v4476_v17   ;;  %v448_v47 = vmul.f32 %v391_v23, %v4446_v2  ;;  %v691_v1 = vmul.f32 -2.0, %v4762_v7 }
  0xf2   :  { %1131 = vst.msk [vmem:[#allocation2 + $0x70] sm:$0xff] %vm1116_vm0, %v4704_v59  ;;  %3728 = vmatmul.msk.f32.gmra.mxu0 %vm1116_vm0, %v1272_v6  ;;  %v438_v8 = vmul.f32 %v351_v52, %v4446_v2  ;;  %v605_v40 = vsub.f32 1.0, %v573_v31  ;;  %937 = vperm.xlu0 %3909, %v4470_v15   ;;  %v670_v59 = vmul.f32 %v606_v0, %v4446_v2  ;;  %v701_v0 = vmul.f32 -2.0, %v4775_v32 }
  0xf3   :  { %1163 = vst.msk [vmem:[#allocation2 + $0x170] sm:$0xff] %vm1116_vm0, %v634_v46  ;;  %v627_v10 = vmul.f32 %v595_v35, %v4449_v3  ;;  %v480_v44 = vadd.f32 %v448_v47, %v288_v13  ;;  %v766_v17 = vmul.f32 %v734_v48, %v4449_v3  ;;  %v281_v63 = vmul.f32 %v4409_v54, %v4449_v3 }
  0xf4   :  { %1195 = vst.msk [vmem:[#allocation2 + $0x270] sm:$0xff] %vm1116_vm0, %v666_v50  ;;  %v470_v37 = vadd.f32 %v438_v8, %v278_v55  ;;  %v637_v46 = vmul.f32 %v605_v40, %v4449_v3 }
  0xf5   :  { %1227 = vst.msk [vmem:[#allocation2 + $0x370] sm:$0xff] %vm1116_vm0, %v762_v62  ;;  %v723_v12 = vmul.f32 %v691_v1, %v627_v10  ;;  %v515_v34 = vadd.f32 %v4462_v9, %v480_v44  ;;  %v1273_v48 = vld [vmem:[#allocation2 + $0x20] sm:$0xff] }
  0xf6   :  { %v4804_v16 = vpop.eup %3948  ;;  %1135 = vst.msk [vmem:[#allocation2 + $0x90] sm:$0xff] %vm1116_vm0, %v4730_v61  ;;  %v505_v15 = vadd.f32 %v4462_v9, %v470_v37  ;;  %v659_v61 = vmul.f32 %v595_v35, %v4446_v2  ;;  %v733_v62 = vmul.f32 %v701_v0, %v637_v46  ;;  %v4832_v35 = vld [vmem:[%s7064_s1 + $0xa8] sm:$0xff]  ;;  %v284_v0 = vmul.f32 %v4426_v60, %v4449_v3 }
  0xf7   :  { %1167 = vst.msk [vmem:[#allocation2 + $0x190] sm:$0xff] %vm1116_vm0, %v638_v45  ;;  %v566_v13 = vmul.f32 %v4804_v16, %v4804_v16  ;;  %v4814_v55 = vpop.eup %3950  ;;  %v755_v45 = vmul.f32 %v723_v12, %v4449_v3  ;;  %v694_v8 = vmul.f32 -2.0, %v4804_v16  ;;  %v1274_v60 = vld [vmem:[#allocation2 + $0x28] sm:$0xff] }
  0xf8   :  { %1199 = vst.msk [vmem:[#allocation2 + $0x290] sm:$0xff] %vm1116_vm0, %v670_v59  ;;  %3952 = vtanh.f32 %v505_v15  ;;  %v403_v50 = vpop.permute.xlu2 %402  ;;  %v576_v23 = vmul.f32 %v4814_v55, %v4814_v55  ;;  %v704_v12 = vmul.f32 -2.0, %v4814_v55 }
  0xf9   :  { %1231 = vst.msk [vmem:[#allocation2 + $0x390] sm:$0xff] %vm1116_vm0, %v766_v17  ;;  %v598_v51 = vsub.f32 1.0, %v566_v13  ;;  %3907 = vset.pattern.permute.xlu1 %v4178_v4  ;;  %v363_v53 = vpop.permute.xlu1 %362  ;;  %v4827_v54 = vpop.permute.xlu0 %418  ;;  %3954 = vtanh.f32 %v515_v34  ;;  %941 = vperm.xlu2 %3905, %v4505_v38   ;;  %v451_v6 = vmul.f32 %v403_v50, %v4446_v2  ;;  %v765_v38 = vmul.f32 %v733_v62, %v4449_v3 }
  0xfa   :  { %1124 = vst.msk [vmem:[#allocation2 + $0x38] sm:$0xff] %vm1116_vm0, %v4762_v7  ;;  %3729 = vmatmul.msk.f32.gmra.mxu0 %vm1116_vm0, %v1273_v48  ;;  %v441_v31 = vmul.f32 %v363_v53, %v4446_v2  ;;  %v608_v47 = vsub.f32 1.0, %v576_v23  ;;  %965 = vperm.xlu0 %3909, %v4578_v27   ;;  %v669_v7 = vmul.f32 %v605_v40, %v4446_v2 }
  0xfb   :  { %1156 = vst.msk [vmem:[#allocation2 + $0x138] sm:$0xff] %vm1116_vm0, %v627_v10  ;;  %v630_v52 = vmul.f32 %v598_v51, %v4449_v3  ;;  %v483_v59 = vadd.f32 %v451_v6, %v291_v19  ;;  %887 = vperm.xlu1 %3907, %v4832_v35   ;;  %v294_v17 = vmul.f32 %v4421_v58, %v4449_v3 }
  0xfc   :  { %1188 = vst.msk [vmem:[#allocation2 + $0x238] sm:$0xff] %vm1116_vm0, %v659_v61  ;;  %v473_v1 = vadd.f32 %v441_v31, %v281_v63  ;;  %v640_v37 = vmul.f32 %v608_v47, %v4449_v3  ;;  %v662_v13 = vmul.f32 %v598_v51, %v4446_v2  ;;  %v672_v48 = vmul.f32 %v608_v47, %v4446_v2 }
  0xfd   :  { %1220 = vst.msk [vmem:[#allocation2 + $0x338] sm:$0xff] %vm1116_vm0, %v755_v45  ;;  %v726_v10 = vmul.f32 %v694_v8, %v630_v52  ;;  %v518_v40 = vadd.f32 %v4462_v9, %v483_v59 }
  0xfe   :  { %v4850_v44 = vpop.eup %3952  ;;  %1134 = vst.msk [vmem:[#allocation2 + $0x88] sm:$0xff] %vm1116_vm0, %v4775_v32  ;;  %v508_v27 = vadd.f32 %v4462_v9, %v473_v1  ;;  %v446_v32 = vmul.f32 %v4694_v14, %v4446_v2  ;;  %v736_v63 = vmul.f32 %v704_v12, %v640_v37 }
  0xff   :  { %1166 = vst.msk [vmem:[#allocation2 + $0x188] sm:$0xff] %vm1116_vm0, %v637_v46  ;;  %v569_v15 = vmul.f32 %v4850_v44, %v4850_v44  ;;  %v4862_v34 = vpop.eup %3954  ;;  %v758_v19 = vmul.f32 %v726_v10, %v4449_v3  ;;  %v697_v31 = vmul.f32 -2.0, %v4850_v44 }
 0x100   :  { %1198 = vst.msk [vmem:[#allocation2 + $0x288] sm:$0xff] %vm1116_vm0, %v669_v7  ;;  %3956 = vtanh.f32 %v508_v27  ;;  %v1383_v58 = vld [vmem:[#allocation2 + $0x390] sm:$0xff]  ;;  %v415_v46 = vpop.permute.xlu2 %414  ;;  %v4874_v50 = vmul.f32 %v4862_v34, %v4862_v34  ;;  %v768_v8 = vmul.f32 %v736_v63, %v4449_v3  ;;  %v707_v10 = vmul.f32 -2.0, %v4862_v34 }
 0x101   :  { %1230 = vst.msk [vmem:[#allocation2 + $0x388] sm:$0xff] %vm1116_vm0, %v765_v38  ;;  %v601_v61 = vsub.f32 1.0, %v569_v15  ;;  %3839 = vmatmul.msk.f32.vlgmr.msra.gmra.mxu3 %vm1116_vm0, %v1383_v58  ;;  %v375_v45 = vpop.permute.xlu1 %374  ;;  %3958 = vtanh.f32 %v518_v40  ;;  %949 = vperm.xlu2 %3905, %v4481_v18   ;;  %v454_v51 = vmul.f32 %v415_v46, %v4446_v2  ;;  %v287_v58 = vmul.f32 %v4453_v5, %v4449_v3  ;;  %v1309_v46 = vld [vmem:[#allocation2 + $0x140] sm:$0xff] }
 0x102   :  { %1127 = vst.msk [vmem:[#allocation2 + $0x50] sm:$0xff] %vm1116_vm0, %v4804_v16  ;;  %v1308_v14 = vld [vmem:[#allocation2 + $0x138] sm:$0xff]  ;;  %3730 = vmatmul.msk.f32.gmra.mxu0 %vm1116_vm0, %v1274_v60  ;;  %v444_v62 = vmul.f32 %v375_v45, %v4446_v2  ;;  %v213_v23 = vpop.permute.xlu0 %212  ;;  %v611_v16 = vsub.f32 1.0, %v4874_v50  ;;  %985 = vperm.xlu0 %3909, %v4583_v29  }
 0x103   :  { %1159 = vst.msk [vmem:[#allocation2 + $0x150] sm:$0xff] %vm1116_vm0, %v630_v52  ;;  %v633_v53 = vmul.f32 %v601_v61, %v4449_v3  ;;  %3764 = vmatmul.msk.f32.gmra.mxu1 %vm1116_vm0, %v1308_v14  ;;  %v486_v6 = vadd.f32 %v454_v51, %v294_v17  ;;  %3908 = vset.pattern.permute.xlu1 %v4179_v25 }
 0x104   :  { %1191 = vst.msk [vmem:[#allocation2 + $0x250] sm:$0xff] %vm1116_vm0, %v662_v13  ;;  %v476_v18 = vadd.f32 %v444_v62, %v284_v0  ;;  %v286_v52 = vmul.f32 %v213_v23, %v4449_v3  ;;  %v643_v7 = vmul.f32 %v611_v16, %v4449_v3  ;;  %945 = vperm.xlu1 %3908, %v4499_v30   ;;  %v1275_v0 = vld [vmem:[#allocation2 + $0x30] sm:$0xff] }
 0x105   :  { %1223 = vst.msk [vmem:[#allocation2 + $0x350] sm:$0xff] %vm1116_vm0, %v758_v19  ;;  %v729_v47 = vmul.f32 %v697_v31, %v633_v53  ;;  %v521_v59 = vadd.f32 %v4462_v9, %v486_v6  ;;  %v665_v30 = vmul.f32 %v601_v61, %v4446_v2 }
 0x106   :  { %v4897_v1 = vpop.eup %3956  ;;  %1137 = vst.msk [vmem:[#allocation2 + $0xa0] sm:$0xff] %vm1116_vm0, %v4814_v55  ;;  %v511_v29 = vadd.f32 %v4462_v9, %v476_v18  ;;  %v478_v38 = vadd.f32 %v446_v32, %v286_v52  ;;  %v739_v12 = vmul.f32 %v707_v10, %v643_v7  ;;  %v4961_v18 = vld [vmem:[%s7064_s1 + $0xb8] sm:$0xff] }
 0x107   :  { %1169 = vst.msk [vmem:[#allocation2 + $0x1a0] sm:$0xff] %vm1116_vm0, %v640_v37  ;;  %v572_v27 = vmul.f32 %v4897_v1, %v4897_v1  ;;  %v4907_v40 = vpop.eup %3958  ;;  %v761_v17 = vmul.f32 %v729_v47, %v4449_v3  ;;  %v700_v50 = vmul.f32 -2.0, %v4897_v1 }
 0x108   :  { %1201 = vst.msk [vmem:[#allocation2 + $0x2a0] sm:$0xff] %vm1116_vm0, %v672_v48  ;;  %3960 = vtanh.f32 %v511_v29  ;;  %v513_v55 = vadd.f32 %v4462_v9, %v478_v38  ;;  %v4916_v15 = vmul.f32 %v4907_v40, %v4907_v40  ;;  %v771_v14 = vmul.f32 %v739_v12, %v4449_v3  ;;  %v1310_v38 = vld [vmem:[#allocation2 + $0x148] sm:$0xff] }
 0x109   :  { %1233 = vst.msk [vmem:[#allocation2 + $0x3a0] sm:$0xff] %vm1116_vm0, %v768_v8  ;;  %v604_v37 = vsub.f32 1.0, %v572_v27  ;;  %v387_v32 = vpop.permute.xlu1 %386  ;;  %v4918_v13 = vpop.permute.xlu2 %782  ;;  %3962 = vtanh.f32 %v521_v59  ;;  %957 = vperm.xlu2 %3905, %v4531_v22   ;;  %v675_v22 = vmul.f32 %v611_v16, %v4446_v2  ;;  %v710_v48 = vmul.f32 -2.0, %v4907_v40 }
 0x10a   :  { %1130 = vst.msk [vmem:[#allocation2 + $0x68] sm:$0xff] %vm1116_vm0, %v4850_v44  ;;  %3731 = vmatmul.msk.f32.gmra.mxu0 %vm1116_vm0, %v1275_v0  ;;  %v447_v19 = vmul.f32 %v387_v32, %v4446_v2  ;;  %v228_v63 = vpop.permute.xlu0 %227  ;;  %v614_v5 = vsub.f32 1.0, %v4916_v15  ;;  %3964 = vtanh.f32 %v513_v55  ;;  %997 = vperm.xlu0 %3909, %v4629_v42   ;;  %v449_v44 = vmul.f32 %v4746_v39, %v4446_v2 }
 0x10b   :  { %1162 = vst.msk [vmem:[#allocation2 + $0x168] sm:$0xff] %vm1116_vm0, %v633_v53  ;;  %v636_v61 = vmul.f32 %v604_v37, %v4449_v3  ;;  %3765 = vmatmul.msk.f32.gmra.mxu1 %vm1116_vm0, %v1309_v46  ;;  %v289_v45 = vmul.f32 %v228_v63, %v4449_v3  ;;  %v668_v16 = vmul.f32 %v604_v37, %v4446_v2  ;;  %v4140_v46 = vld [vmem:[%s7064_s1 + $0x48] sm:$0xff]  ;;  %v5009_v63 = vld [vmem:[%s7068_s5] ss:$0 sm:$0xff] }
 0x10c   :  { %1194 = vst.msk [vmem:[#allocation2 + $0x268] sm:$0xff] %vm1116_vm0, %v665_v30  ;;  %v479_v60 = vadd.f32 %v447_v19, %v287_v58  ;;  %v646_v51 = vmul.f32 %v614_v5, %v4449_v3  ;;  %953 = vperm.xlu1 %3908, %v4538_v28   ;;  %v290_v28 = vmul.f32 %v4487_v20, %v4449_v3 }
 0x10d   :  { %1226 = vst.msk [vmem:[#allocation2 + $0x368] sm:$0xff] %vm1116_vm0, %v761_v17  ;;  %v732_v62 = vmul.f32 %v700_v50, %v636_v61  ;;  %v481_v23 = vadd.f32 %v449_v44, %v289_v45  ;;  %v452_v30 = vmul.f32 %v4787_v36, %v4446_v2 }
 0x10e   :  { %v4942_v42 = vpop.eup %3960  ;;  %1140 = vst.msk [vmem:[#allocation2 + $0xb8] sm:$0xff] %vm1116_vm0, %v4862_v34  ;;  %v514_v39 = vadd.f32 %v4462_v9, %v479_v60  ;;  %v742_v8 = vmul.f32 %v710_v48, %v646_v51 }
 0x10f   :  { %1172 = vst.msk [vmem:[#allocation2 + $0x1b8] sm:$0xff] %vm1116_vm0, %v643_v7  ;;  %v575_v53 = vmul.f32 %v4942_v42, %v4942_v42  ;;  %v4951_v31 = vpop.eup %3962  ;;  %v516_v34 = vadd.f32 %v4462_v9, %v481_v23  ;;  %v764_v52 = vmul.f32 %v732_v62, %v4449_v3  ;;  %v1276_v7 = vld [vmem:[#allocation2 + $0x38] sm:$0xff]  ;;  %v703_v55 = vmul.f32 -2.0, %v4942_v42 }
 0x110   :  { %1204 = vst.msk [vmem:[#allocation2 + $0x2b8] sm:$0xff] %vm1116_vm0, %v675_v22  ;;  %3966 = vtanh.f32 %v514_v39  ;;  %v4963_v6 = vpop.eup %3964  ;;  %v4969_v47 = vmul.f32 %v4951_v31, %v4951_v31  ;;  %v774_v0 = vmul.f32 %v742_v8, %v4449_v3  ;;  %v1277_v39 = vld [vmem:[#allocation2 + $0x40] sm:$0xff]  ;;  %v455_v8 = vmul.f32 %v4827_v54, %v4446_v2 }
 0x111   :  { %1236 = vst.msk [vmem:[#allocation2 + $0x3b8] sm:$0xff] %vm1116_vm0, %v771_v14  ;;  %v607_v20 = vsub.f32 1.0, %v575_v53  ;;  %v399_v29 = vpop.permute.xlu1 %398  ;;  %v4971_v9 = vpop.permute.xlu2 %797  ;;  %v4977_v59 = vmul.f32 %v4963_v6, %v4963_v6  ;;  %3968 = vtanh.f32 %v516_v34  ;;  %3910 = vset.pattern.permute.xlu2 %v4178_v4  ;;  %v678_v4 = vmul.f32 %v614_v5, %v4446_v2  ;;  %v4142_v54 = vld [vmem:[%s7064_s1 + $0x60] sm:$0xff] }
 0x112   :  { %1133 = vst.msk [vmem:[#allocation2 + $0x80] sm:$0xff] %vm1116_vm0, %v4897_v1  ;;  %3732 = vmatmul.msk.f32.gmra.mxu0 %vm1116_vm0, %v1276_v7  ;;  %v450_v10 = vmul.f32 %v399_v29, %v4446_v2  ;;  %v243_v27 = vpop.permute.xlu0 %242  ;;  %v617_v17 = vsub.f32 1.0, %v4969_v47  ;;  %897 = vperm.xlu2 %3910, %v4961_v18   ;;  %v713_v5 = vmul.f32 -2.0, %v4951_v31  ;;  %v293_v53 = vmul.f32 %v4515_v57, %v4449_v3  ;;  %v1347_v57 = vld [vmem:[#allocation2 + $0x270] sm:$0xff] }
 0x113   :  { %1165 = vst.msk [vmem:[#allocation2 + $0x180] sm:$0xff] %vm1116_vm0, %v636_v61  ;;  %v639_v1 = vmul.f32 %v607_v20, %v4449_v3  ;;  %3766 = vmatmul.msk.f32.gmra.mxu1 %vm1116_vm0, %v1310_v38  ;;  %v1346_v12 = vld [vmem:[#allocation2 + $0x268] sm:$0xff]  ;;  %v609_v37 = vsub.f32 1.0, %v4977_v59  ;;  %v292_v15 = vmul.f32 %v243_v27, %v4449_v3  ;;  %1009 = vperm.xlu0 %3909, %v4832_v35  }
 0x114   :  { %1197 = vst.msk [vmem:[#allocation2 + $0x280] sm:$0xff] %vm1116_vm0, %v668_v16  ;;  %3802 = vmatmul.msk.f32.gmra.mxu2 %vm1116_vm0, %v1346_v12  ;;  %v482_v36 = vadd.f32 %v450_v10, %v290_v28  ;;  %v649_v58 = vmul.f32 %v617_v17, %v4449_v3  ;;  %961 = vperm.xlu1 %3908, %v4140_v46   ;;  %v705_v28 = vmul.f32 -2.0, %v4963_v6  ;;  %v1311_v16 = vld [vmem:[#allocation2 + $0x150] sm:$0xff]  ;;  %v1312_v46 = vld [vmem:[#allocation2 + $0x158] sm:$0xff] }
 0x115   :  { %1229 = vst.msk [vmem:[#allocation2 + $0x380] sm:$0xff] %vm1116_vm0, %v764_v52  ;;  %v735_v32 = vmul.f32 %v703_v55, %v639_v1  ;;  %v484_v50 = vadd.f32 %v452_v30, %v292_v15  ;;  %v5025_v22 = vmul.f32 %v609_v37, %v4449_v3 }
 0x116   :  { %v5002_v19 = vpop.eup %3966  ;;  %1143 = vst.msk [vmem:[#allocation2 + $0xd0] sm:$0xff] %vm1116_vm0, %v4907_v40  ;;  %v517_v61 = vadd.f32 %v5009_v63, %v482_v36  ;;  %v671_v40 = vmul.f32 %v607_v20, %v4446_v2  ;;  %v745_v14 = vmul.f32 %v713_v5, %v649_v58  ;;  %v681_v20 = vmul.f32 %v617_v17, %v4446_v2 }
 0x117   :  { %1175 = vst.msk [vmem:[#allocation2 + $0x1d0] sm:$0xff] %vm1116_vm0, %v646_v51  ;;  %v5016_v35 = vmul.f32 %v5002_v19, %v5002_v19  ;;  %v5018_v44 = vpop.eup %3968  ;;  %v519_v60 = vadd.f32 %v5009_v63, %v484_v50  ;;  %v767_v45 = vmul.f32 %v735_v32, %v4449_v3  ;;  %v1278_v32 = vld [vmem:[#allocation2 + $0x48] sm:$0xff] }
 0x118   :  { %1207 = vst.msk [vmem:[#allocation2 + $0x2d0] sm:$0xff] %vm1116_vm0, %v678_v4  ;;  %3970 = vtanh.f32 %v517_v61  ;;  %v5033_v51 = vmul.f32 %v5018_v44, %v5018_v44  ;;  %v777_v29 = vmul.f32 %v745_v14, %v4449_v3  ;;  %v708_v5 = vmul.f32 -2.0, %v5018_v44 }
 0x119   :  { %1239 = vst.msk [vmem:[#allocation2 + $0x3d0] sm:$0xff] %vm1116_vm0, %v774_v0  ;;  %v610_v62 = vsub.f32 1.0, %v5016_v35  ;;  %v411_v23 = vpop.permute.xlu1 %410  ;;  %v5035_v48 = vpop.permute.xlu2 %807  ;;  %3972 = vtanh.f32 %v519_v60 }
 0x11a   :  { %1136 = vst.msk [vmem:[#allocation2 + $0x98] sm:$0xff] %vm1116_vm0, %v4942_v42  ;;  %3733 = vmatmul.msk.f32.gmra.mxu0 %vm1116_vm0, %v1277_v39  ;;  %v453_v34 = vmul.f32 %v411_v23, %v4446_v2  ;;  %v258_v52 = vpop.permute.xlu0 %257  ;;  %3911 = vset.pattern.permute.xlu2 %v4179_v25  ;;  %v737_v42 = vmul.f32 %v705_v28, %v5025_v22  ;;  %v612_v38 = vsub.f32 1.0, %v5033_v51 }
 0x11b   :  { %1168 = vst.msk [vmem:[#allocation2 + $0x198] sm:$0xff] %vm1116_vm0, %v639_v1  ;;  %3767 = vmatmul.msk.f32.gmra.mxu1 %vm1116_vm0, %v1311_v16  ;;  %v295_v7 = vmul.f32 %v258_v52, %v4449_v3  ;;  %973 = vperm.xlu2 %3911, %v4142_v54   ;;  %v642_v25 = vmul.f32 %v610_v62, %v4449_v3  ;;  %v706_v1 = vmul.f32 -2.0, %v5002_v19  ;;  %v1279_v52 = vld [vmem:[#allocation2 + $0x50] sm:$0xff] }
 0x11c   :  { %1200 = vst.msk [vmem:[#allocation2 + $0x298] sm:$0xff] %vm1116_vm0, %v671_v40  ;;  %3803 = vmatmul.msk.f32.gmra.mxu2 %vm1116_vm0, %v1347_v57  ;;  %v485_v47 = vadd.f32 %v453_v34, %v293_v53  ;;  %969 = vperm.xlu1 %3908, %v4571_v21   ;;  %v673_v21 = vmul.f32 %v609_v37, %v4446_v2  ;;  %v1348_v40 = vld [vmem:[#allocation2 + $0x278] sm:$0xff] }
 0x11d   :  { %1232 = vst.msk [vmem:[#allocation2 + $0x398] sm:$0xff] %vm1116_vm0, %v767_v45  ;;  %v487_v30 = vadd.f32 %v455_v8, %v295_v7  ;;  %v738_v4 = vmul.f32 %v706_v1, %v642_v25  ;;  %v644_v36 = vmul.f32 %v612_v38, %v4449_v3  ;;  %v296_v37 = vmul.f32 %v4552_v56, %v4449_v3  ;;  %v1349_v7 = vld [vmem:[#allocation2 + $0x280] sm:$0xff] }
 0x11e   :  { %v5064_v10 = vpop.eup %3970  ;;  %1146 = vst.msk [vmem:[#allocation2 + $0xe8] sm:$0xff] %vm1116_vm0, %v4951_v31  ;;  %v520_v27 = vadd.f32 %v5009_v63, %v485_v47  ;;  %v769_v31 = vmul.f32 %v737_v42, %v4449_v3  ;;  %v674_v56 = vmul.f32 %v610_v62, %v4446_v2 }
 0x11f   :  { %1178 = vst.msk [vmem:[#allocation2 + $0x1e8] sm:$0xff] %vm1116_vm0, %v649_v58  ;;  %v5073_v55 = vmul.f32 %v5064_v10, %v5064_v10  ;;  %v5075_v17 = vpop.eup %3972  ;;  %v522_v12 = vadd.f32 %v5009_v63, %v487_v30  ;;  %v740_v14 = vmul.f32 %v708_v5, %v644_v36  ;;  %v709_v62 = vmul.f32 -2.0, %v5064_v10 }
 0x120   :  { %1210 = vst.msk [vmem:[#allocation2 + $0x2e8] sm:$0xff] %vm1116_vm0, %v681_v20  ;;  %3974 = vtanh.f32 %v520_v27  ;;  %v5088_v0 = vmul.f32 %v5075_v17, %v5075_v17  ;;  %v1313_v20 = vld [vmem:[#allocation2 + $0x160] sm:$0xff]  ;;  %v711_v47 = vmul.f32 -2.0, %v5075_v17 }
 0x121   :  { %1242 = vst.msk [vmem:[#allocation2 + $0x3e8] sm:$0xff] %vm1116_vm0, %v777_v29  ;;  %v613_v15 = vsub.f32 1.0, %v5073_v55  ;;  %v423_v58 = vpop.permute.xlu1 %422  ;;  %v5090_v59 = vpop.permute.xlu2 %822  ;;  %3976 = vtanh.f32 %v522_v12  ;;  %v1385_v29 = vld [vmem:[#allocation2 + $0x3a0] sm:$0xff] }
 0x122   :  { %1138 = vst.msk [vmem:[#allocation2 + $0xa8] sm:$0xff] %vm1116_vm0, %v4963_v6  ;;  %3734 = vmatmul.msk.f32.gmra.mxu0 %vm1116_vm0, %v1278_v32  ;;  %v456_v61 = vmul.f32 %v423_v58, %v4446_v2  ;;  %v5098_v50 = vpop.permute.xlu0 %787  ;;  %v615_v51 = vsub.f32 1.0, %v5088_v0  ;;  %v1350_v58 = vld [vmem:[#allocation2 + $0x288] sm:$0xff] }
 0x123   :  { %1170 = vst.msk [vmem:[#allocation2 + $0x1a8] sm:$0xff] %vm1116_vm0, %v5025_v22  ;;  %3768 = vmatmul.msk.f32.gmra.mxu1 %vm1116_vm0, %v1312_v46  ;;  %v645_v6 = vmul.f32 %v613_v15, %v4449_v3  ;;  %981 = vperm.xlu2 %3911, %v4615_v49   ;;  %v770_v22 = vmul.f32 %v738_v4, %v4449_v3  ;;  %v1280_v4 = vld [vmem:[#allocation2 + $0x58] sm:$0xff] }
 0x124   :  { %1202 = vst.msk [vmem:[#allocation2 + $0x2a8] sm:$0xff] %vm1116_vm0, %v673_v21  ;;  %3804 = vmatmul.msk.f32.gmra.mxu2 %vm1116_vm0, %v1348_v40  ;;  %v488_v60 = vadd.f32 %v456_v61, %v296_v37  ;;  %v1384_v45 = vld [vmem:[#allocation2 + $0x398] sm:$0xff]  ;;  %977 = vperm.xlu1 %3908, %v4624_v41   ;;  %v676_v41 = vmul.f32 %v612_v38, %v4446_v2 }
 0x125   :  { %1234 = vst.msk [vmem:[#allocation2 + $0x3a8] sm:$0xff] %vm1116_vm0, %v769_v31  ;;  %3840 = vmatmul.msk.f32.gmra.mxu3 %vm1116_vm0, %v1384_v45  ;;  %v741_v53 = vmul.f32 %v709_v62, %v645_v6  ;;  %v647_v28 = vmul.f32 %v615_v51, %v4449_v3  ;;  %v677_v54 = vmul.f32 %v613_v15, %v4446_v2 }
 0x126   :  { %v5116_v35 = vpop.eup %3974  ;;  %1139 = vst.msk [vmem:[#allocation2 + $0xb0] sm:$0xff] %vm1116_vm0, %v5002_v19  ;;  %v523_v49 = vadd.f32 %v5009_v63, %v488_v60  ;;  %v772_v19 = vmul.f32 %v740_v14, %v4449_v3  ;;  %v679_v55 = vmul.f32 %v615_v51, %v4446_v2  ;;  %v1281_v60 = vld [vmem:[#allocation2 + $0x60] sm:$0xff]  ;;  %v1351_v51 = vld [vmem:[#allocation2 + $0x290] sm:$0xff] }
 0x127   :  { %1171 = vst.msk [vmem:[#allocation2 + $0x1b0] sm:$0xff] %vm1116_vm0, %v642_v25  ;;  %v584_v39 = vmul.f32 %v5116_v35, %v5116_v35  ;;  %v5125_v23 = vpop.eup %3976  ;;  %v743_v25 = vmul.f32 %v711_v47, %v647_v28  ;;  %v712_v1 = vmul.f32 -2.0, %v5116_v35 }
 0x128   :  { %1203 = vst.msk [vmem:[#allocation2 + $0x2b0] sm:$0xff] %vm1116_vm0, %v674_v56  ;;  %3978 = vtanh.f32 %v523_v49  ;;  %v5134_v34 = vmul.f32 %v5125_v23, %v5125_v23  ;;  %v714_v32 = vmul.f32 -2.0, %v5125_v23 }
 0x129   :  { %1235 = vst.msk [vmem:[#allocation2 + $0x3b0] sm:$0xff] %vm1116_vm0, %v770_v22  ;;  %v616_v16 = vsub.f32 1.0, %v584_v39  ;;  %v5136_v8 = vpop.permute.xlu2 %837  ;;  %v775_v21 = vmul.f32 %v743_v25, %v4449_v3  ;;  %v5220_v39 = vld [vmem:[%s7070_s7] ss:$0 sm:$0xff] }
 0x12a   :  { %1141 = vst.msk [vmem:[#allocation2 + $0xc0] sm:$0xff] %vm1116_vm0, %v5018_v44  ;;  %3735 = vmatmul.msk.f32.gmra.mxu0 %vm1116_vm0, %v1279_v52  ;;  %v5141_v57 = vpop.permute.xlu1 %792  ;;  %v5143_v42 = vpop.permute.xlu0 %812  ;;  %v773_v44 = vmul.f32 %v741_v53, %v4449_v3  ;;  %v618_v27 = vsub.f32 1.0, %v5134_v34  ;;  %v1352_v53 = vld [vmem:[#allocation2 + $0x298] sm:$0xff] }
 0x12b   :  { %1173 = vst.msk [vmem:[#allocation2 + $0x1c0] sm:$0xff] %vm1116_vm0, %v644_v36  ;;  %3769 = vmatmul.msk.f32.gmra.mxu1 %vm1116_vm0, %v1313_v20  ;;  %993 = vperm.xlu2 %3911, %v4660_v24   ;;  %v648_v38 = vmul.f32 %v616_v16, %v4449_v3  ;;  %v680_v37 = vmul.f32 %v616_v16, %v4446_v2  ;;  %v1388_v34 = vld [vmem:[#allocation2 + $0x3b8] sm:$0xff] }
 0x12c   :  { %1205 = vst.msk [vmem:[#allocation2 + $0x2c0] sm:$0xff] %vm1116_vm0, %v676_v41  ;;  %3805 = vmatmul.msk.f32.gmra.mxu2 %vm1116_vm0, %v1349_v7  ;;  %989 = vperm.xlu1 %3908, %v4667_v43   ;;  %v650_v43 = vmul.f32 %v618_v27, %v4449_v3  ;;  %v900_v16 = vmul.f32 %v4918_v13, %v4449_v3  ;;  %v1317_v13 = vld [vmem:[#allocation2 + $0x180] sm:$0xff] }
 0x12d   :  { %1237 = vst.msk [vmem:[#allocation2 + $0x3c0] sm:$0xff] %vm1116_vm0, %v772_v19  ;;  %3841 = vmatmul.msk.f32.gmra.mxu3 %vm1116_vm0, %v1385_v29  ;;  %v744_v31 = vmul.f32 %v712_v1, %v648_v38 }
 0x12e   :  { %v3979_v30 = vpop.eup %3978  ;;  %1142 = vst.msk [vmem:[#allocation2 + $0xc8] sm:$0xff] %vm1116_vm0, %v5064_v10  ;;  %v1314_v10 = vld [vmem:[#allocation2 + $0x168] sm:$0xff]  ;;  %v746_v61 = vmul.f32 %v714_v32, %v650_v43  ;;  %v1284_v32 = vld [vmem:[#allocation2 + $0x78] sm:$0xff] }
 0x12f   :  { %1174 = vst.msk [vmem:[#allocation2 + $0x1c8] sm:$0xff] %vm1116_vm0, %v645_v6  ;;  %v587_v24 = vmul.f32 %v3979_v30, %v3979_v30  ;;  %v776_v46 = vmul.f32 %v744_v31, %v4449_v3  ;;  %v715_v40 = vmul.f32 -2.0, %v3979_v30 }
 0x130   :  { %1206 = vst.msk [vmem:[#allocation2 + $0x2c8] sm:$0xff] %vm1116_vm0, %v677_v54  ;;  %v778_v56 = vmul.f32 %v746_v61, %v4449_v3  ;;  %v1387_v62 = vld [vmem:[#allocation2 + $0x3b0] sm:$0xff] }
 0x131   :  { %1238 = vst.msk [vmem:[#allocation2 + $0x3c8] sm:$0xff] %vm1116_vm0, %v773_v44  ;;  %v619_v12 = vsub.f32 1.0, %v587_v24  ;;  %v5167_v36 = vpop.permute.xlu2 %852  ;;  %v1283_v54 = vld [vmem:[#allocation2 + $0x70] sm:$0xff]  ;;  %v5239_v44 = vld [vmem:[%s7071_s8] ss:$0 sm:$0xff]  ;;  %v902_v24 = vmul.f32 %v5141_v57, %v4449_v3 }
 0x132   :  { %1144 = vst.msk [vmem:[#allocation2 + $0xd8] sm:$0xff] %vm1116_vm0, %v5075_v17  ;;  %3736 = vmatmul.msk.f32.gmra.mxu0 %vm1116_vm0, %v1280_v4  ;;  %v5172_v15 = vpop.permute.xlu1 %802  ;;  %v5174_v0 = vpop.permute.xlu0 %827  ;;  %v1386_v17 = vld [vmem:[#allocation2 + $0x3a8] sm:$0xff] }
 0x133   :  { %1176 = vst.msk [vmem:[#allocation2 + $0x1d8] sm:$0xff] %vm1116_vm0, %v647_v28  ;;  %3770 = vmatmul.msk.f32.gmra.mxu1 %vm1116_vm0, %v1314_v10  ;;  %1005 = vperm.xlu2 %3911, %v4672_v26   ;;  %v651_v5 = vmul.f32 %v619_v12, %v4449_v3  ;;  %v682_v26 = vmul.f32 %v618_v27, %v4446_v2 }
 0x134   :  { %1208 = vst.msk [vmem:[#allocation2 + $0x2d8] sm:$0xff] %vm1116_vm0, %v679_v55  ;;  %3806 = vmatmul.msk.f32.gmra.mxu2 %vm1116_vm0, %v1350_v58  ;;  %1001 = vperm.xlu1 %3908, %v4714_v33   ;;  %v1315_v33 = vld [vmem:[#allocation2 + $0x170] sm:$0xff]  ;;  %v1318_v58 = vld [vmem:[#allocation2 + $0x188] sm:$0xff] }
 0x135   :  { %1240 = vst.msk [vmem:[#allocation2 + $0x3d8] sm:$0xff] %vm1116_vm0, %v775_v21  ;;  %3842 = vmatmul.msk.f32.gmra.mxu3 %vm1116_vm0, %v1386_v17  ;;  %v747_v6 = vmul.f32 %v715_v40, %v651_v5  ;;  %v1354_v17 = vld [vmem:[#allocation2 + $0x2a8] sm:$0xff] }
 0x136   :  { %1145 = vst.msk [vmem:[#allocation2 + $0xe0] sm:$0xff] %vm1116_vm0, %v5116_v35  ;;  %v683_v35 = vmul.f32 %v619_v12, %v4446_v2 }
 0x137   :  { %1177 = vst.msk [vmem:[#allocation2 + $0x1e0] sm:$0xff] %vm1116_vm0, %v648_v38  ;;  %v779_v49 = vmul.f32 %v747_v6, %v4449_v3  ;;  %v1353_v38 = vld [vmem:[#allocation2 + $0x2a0] sm:$0xff] }
 0x138   :  { %1209 = vst.msk [vmem:[#allocation2 + $0x2e0] sm:$0xff] %vm1116_vm0, %v680_v37 }
 0x139   :  { %1241 = vst.msk [vmem:[#allocation2 + $0x3e0] sm:$0xff] %vm1116_vm0, %v776_v46  ;;  %v5195_v45 = vpop.permute.xlu2 %867  ;;  %v1390_v46 = vld [vmem:[#allocation2 + $0x3c8] sm:$0xff] }
 0x13a   :  { %1147 = vst.msk [vmem:[#allocation2 + $0xf0] sm:$0xff] %vm1116_vm0, %v5125_v23  ;;  %3737 = vmatmul.msk.f32.gmra.mxu0 %vm1116_vm0, %v1281_v60  ;;  %v5200_v22 = vpop.permute.xlu1 %817  ;;  %v5202_v14 = vpop.permute.xlu0 %842  ;;  %v1316_v23 = vld [vmem:[#allocation2 + $0x178] sm:$0xff] }
 0x13b   :  { %1179 = vst.msk [vmem:[#allocation2 + $0x1f0] sm:$0xff] %vm1116_vm0, %v650_v43  ;;  %3771 = vmatmul.msk.f32.gmra.mxu1 %vm1116_vm0, %v1315_v33  ;;  %1017 = vperm.xlu2 %3911, %v4961_v18   ;;  %v1282_v18 = vld [vmem:[#allocation2 + $0x68] sm:$0xff]  ;;  %v1285_v33 = vld [vmem:[#allocation2 + $0x80] sm:$0xff] }
 0x13c   :  { %1211 = vst.msk [vmem:[#allocation2 + $0x2f0] sm:$0xff] %vm1116_vm0, %v682_v26  ;;  %3807 = vmatmul.msk.f32.gmra.mxu2 %vm1116_vm0, %v1351_v51  ;;  %1013 = vperm.xlu1 %3908, %v4725_v11   ;;  %v1319_v51 = vld [vmem:[#allocation2 + $0x190] sm:$0xff] }
 0x13d   :  { %1243 = vst.msk [vmem:[#allocation2 + $0x3f0] sm:$0xff] %vm1116_vm0, %v778_v56  ;;  %3843 = vmatmul.msk.f32.gmra.mxu3 %vm1116_vm0, %v1387_v62 }
 0x13e   :  { %1148 = vst.msk [vmem:[#allocation2 + $0xf8] sm:$0xff] %vm1116_vm0, %v3979_v30  ;;  %v1389_v30 = vld [vmem:[#allocation2 + $0x3c0] sm:$0xff] }
 0x13f   :  { %1180 = vst.msk [vmem:[#allocation2 + $0x1f8] sm:$0xff] %vm1116_vm0, %v651_v5  ;;  %v904_v5 = vmul.f32 %v5172_v15, %v4449_v3  ;;  %v1355_v15 = vld [vmem:[#allocation2 + $0x2b0] sm:$0xff] }
 0x140   :  { %1212 = vst.msk [vmem:[#allocation2 + $0x2f8] sm:$0xff] %vm1116_vm0, %v683_v35 }
 0x141   :  { %1244 = vst.msk [vmem:[#allocation2 + $0x3f8] sm:$0xff] %vm1116_vm0, %v779_v49  ;;  %v1391_v49 = vld [vmem:[#allocation2 + $0x3d0] sm:$0xff] }
 0x142   :  { %3738 = vmatmul.msk.f32.gmra.mxu0 %vm1116_vm0, %v1282_v18  ;;  %v5224_v41 = vpop.permute.xlu1 %832  ;;  %v5226_v11 = vpop.permute.xlu0 %857 }
 0x143   :  { %3772 = vmatmul.msk.f32.gmra.mxu1 %vm1116_vm0, %v1316_v23  ;;  %v926_v19 = vpop.permute.xlu2 %925  ;;  %v1894_v28 = vpop.f32.mrf.mxu0  ;;  %v906_v23 = vmul.f32 %v5143_v42, %v4449_v3  ;;  %v1356_v42 = vld [vmem:[#allocation2 + $0x2b8] sm:$0xff] }
 0x144   :  { %3808 = vmatmul.msk.f32.gmra.mxu2 %vm1116_vm0, %v1352_v53  ;;  %v1020_v52 = vmul.f32 %v926_v19, %v4446_v2  ;;  %v2353_v20 = vadd.f32 %v5220_v39, %v1894_v28 }
 0x145   :  { %3844 = vmatmul.msk.f32.gmra.mxu3 %vm1116_vm0, %v1388_v34 }
 0x146   :  { %v1044_v47 = vadd.f32 %v1020_v52, %v900_v16  ;;  %3980 = vtanh.f32 %v2353_v20  ;;  %v1286_v52 = vld [vmem:[#allocation2 + $0x88] sm:$0xff]  ;;  %v1320_v20 = vld [vmem:[#allocation2 + $0x198] sm:$0xff] }
 0x148   :  { %v1068_v7 = vadd.f32 %v5009_v63, %v1044_v47 }
 0x14a   :  { %3982 = vtanh.f32 %v1068_v7  ;;  %3739 = vmatmul.msk.f32.gmra.mxu0 %vm1116_vm0, %v1283_v54  ;;  %v5242_v29 = vpop.permute.xlu1 %847  ;;  %v5244_v25 = vpop.permute.xlu0 %872  ;;  %v901_v54 = vmul.f32 %v5098_v50, %v4449_v3 }
 0x14b   :  { %3773 = vmatmul.msk.f32.gmra.mxu1 %vm1116_vm0, %v1317_v13  ;;  %v934_v1 = vpop.permute.xlu2 %933  ;;  %v1897_v10 = vpop.f32.mrf.mxu0  ;;  %v1392_v13 = vld [vmem:[#allocation2 + $0x3d8] sm:$0xff] }
 0x14c   :  { %v5247_v27 = vpop.eup %3980  ;;  %3809 = vmatmul.msk.f32.gmra.mxu2 %vm1116_vm0, %v1353_v38  ;;  %v1022_v55 = vmul.f32 %v934_v1, %v4446_v2  ;;  %v2354_v40 = vadd.f32 %v5220_v39, %v1897_v10  ;;  %v908_v1 = vmul.f32 %v5090_v59, %v4449_v3 }
 0x14d   :  { %3845 = vmatmul.msk.f32.gmra.mxu3 %vm1116_vm0, %v1389_v30  ;;  %v2820_v21 = vmul.f32 %v5247_v27, %v5239_v44 }
 0x14e   :  { %v1046_v31 = vadd.f32 %v1022_v55, %v902_v24 }
 0x14f   :  { %v2852_v43 = vsel %vm1116_vm0, %v2820_v21, 0.0  ;;  %v903_v21 = vmul.f32 %v4971_v9, %v4449_v3 }
 0x150   :  { %v3983_v12 = vpop.eup %3982  ;;  %2853 = vadd.xlane.f32.xlu0 %v2852_v43  ;;  %v1070_v4 = vadd.f32 %v5009_v63, %v1046_v31 }
 0x151   :  { %1245 = vst.msk [vmem:[#allocation2 + $0x400] sm:$0xff] %vm1116_vm0, %v3983_v12 }
 0x152   :  { %3740 = vmatmul.msk.f32.gmra.mxu0 %vm1116_vm0, %v1284_v32  ;;  %v5260_v57 = vpop.permute.xlu1 %862  ;;  %v5262_v37 = vpop.permute.xlu0 %882  ;;  %3984 = vtanh.f32 %v1070_v4 }
 0x153   :  { %3774 = vmatmul.msk.f32.gmra.mxu1 %vm1116_vm0, %v1318_v58  ;;  %v942_v61 = vpop.permute.xlu2 %941  ;;  %3986 = vtanh.f32 %v2354_v40  ;;  %v1393_v40 = vld [vmem:[#allocation2 + $0x3e0] sm:$0xff] }
 0x154   :  { %3810 = vmatmul.msk.f32.gmra.mxu2 %vm1116_vm0, %v1354_v17  ;;  %v1024_v26 = vmul.f32 %v942_v61, %v4446_v2  ;;  %v1321_v61 = vld [vmem:[#allocation2 + $0x1a0] sm:$0xff] }
 0x155   :  { %3846 = vmatmul.msk.f32.gmra.mxu3 %vm1116_vm0, %v1390_v46  ;;  %v1287_v46 = vld [vmem:[#allocation2 + $0x90] sm:$0xff] }
 0x156   :  { %v1048_v56 = vadd.f32 %v1024_v26, %v904_v5  ;;  %v1357_v5 = vld [vmem:[#allocation2 + $0x2c0] sm:$0xff] }
 0x158   :  { %v3985_v6 = vpop.eup %3984  ;;  %v1072_v60 = vadd.f32 %v5009_v63, %v1048_v56 }
 0x159   :  { %1247 = vst.msk [vmem:[#allocation2 + $0x410] sm:$0xff] %vm1116_vm0, %v3985_v6  ;;  %v5284_v19 = vpop.eup %3986  ;;  %v910_v6 = vmul.f32 %v5224_v41, %v4449_v3  ;;  %v1322_v41 = vld [vmem:[#allocation2 + $0x1a8] sm:$0xff] }
 0x15a   :  { %3741 = vmatmul.msk.f32.gmra.mxu0 %vm1116_vm0, %v1285_v33  ;;  %v5274_v35 = vpop.permute.xlu1 %877  ;;  %3988 = vtanh.f32 %v1072_v60  ;;  %v5277_v62 = vpop.permute.xlu0 %892  ;;  %v2821_v47 = vmul.f32 %v5284_v19, %v5239_v44 }
 0x15b   :  { %3775 = vmatmul.msk.f32.gmra.mxu1 %vm1116_vm0, %v1319_v51  ;;  %v950_v18 = vpop.permute.xlu2 %949 }
 0x15c   :  { %3811 = vmatmul.msk.f32.gmra.mxu2 %vm1116_vm0, %v1355_v15  ;;  %v1026_v53 = vmul.f32 %v950_v18, %v4446_v2  ;;  %v2855_v43 = vsel %vm1116_vm0, %v2821_v47, 0.0 }
 0x15d   :  { %3847 = vmatmul.msk.f32.gmra.mxu3 %vm1116_vm0, %v1391_v49 }
 0x15e   :  { %v1050_v28 = vadd.f32 %v1026_v53, %v906_v23  ;;  %v1288_v53 = vld [vmem:[#allocation2 + $0x98] sm:$0xff] }
 0x160   :  { %v3989_v16 = vpop.eup %3988  ;;  %v1074_v34 = vadd.f32 %v5009_v63, %v1050_v28 }
 0x161   :  { %1249 = vst.msk [vmem:[#allocation2 + $0x420] sm:$0xff] %vm1116_vm0, %v3989_v16 }
 0x162   :  { %3742 = vmatmul.msk.f32.gmra.mxu0 %vm1116_vm0, %v1286_v52  ;;  %3990 = vtanh.f32 %v1074_v34  ;;  %v1358_v52 = vld [vmem:[#allocation2 + $0x2c8] sm:$0xff] }
 0x163   :  { %3776 = vmatmul.msk.f32.gmra.mxu1 %vm1116_vm0, %v1320_v20  ;;  %v930_v7 = vpop.permute.xlu1 %929  ;;  %v958_v30 = vpop.permute.xlu2 %957  ;;  %v1394_v20 = vld [vmem:[#allocation2 + $0x3e8] sm:$0xff] }
 0x164   :  { %3812 = vmatmul.msk.f32.gmra.mxu2 %vm1116_vm0, %v1356_v42  ;;  %v1021_v38 = vmul.f32 %v930_v7, %v4446_v2  ;;  %v1028_v24 = vmul.f32 %v958_v30, %v4446_v2  ;;  %v938_v55 = vpop.permute.xlu0 %937  ;;  %v915_v7 = vmul.f32 %v5226_v11, %v4449_v3  ;;  %v912_v30 = vmul.f32 %v5202_v14, %v4449_v3 }
 0x165   :  { %3848 = vmatmul.msk.f32.gmra.mxu3 %vm1116_vm0, %v1392_v13  ;;  %v1023_v50 = vmul.f32 %v938_v55, %v4446_v2 }
 0x166   :  { %v1045_v31 = vadd.f32 %v1021_v38, %v901_v54  ;;  %v1052_v12 = vadd.f32 %v1028_v24, %v908_v1  ;;  %2856 = vadd.xlane.f32.xlu1 %v2855_v43 }
 0x167   :  { %v1900_v4 = vpop.f32.mrf.mxu0  ;;  %v1047_v32 = vadd.f32 %v1023_v50, %v903_v21  ;;  %v5344_v50 = vpop.f32.mrf.mxu1 }
 0x168   :  { %v1069_v10 = vadd.f32 %v5009_v63, %v1045_v31  ;;  %v3991_v59 = vpop.eup %3990  ;;  %v1076_v58 = vadd.f32 %v5009_v63, %v1052_v12  ;;  %v2355_v17 = vadd.f32 %v5220_v39, %v1900_v4  ;;  %v905_v31 = vmul.f32 %v5035_v48, %v4449_v3 }
 0x169   :  { %1251 = vst.msk [vmem:[#allocation2 + $0x430] sm:$0xff] %vm1116_vm0, %v3991_v59  ;;  %v1071_v9 = vadd.f32 %v5009_v63, %v1047_v32 }
 0x16a   :  { %3992 = vtanh.f32 %v1069_v10  ;;  %3743 = vmatmul.msk.f32.gmra.mxu0 %vm1116_vm0, %v1287_v46  ;;  %v1289_v10 = vld [vmem:[#allocation2 + $0xa0] sm:$0xff]  ;;  %v1359_v46 = vld [vmem:[#allocation2 + $0x2d0] sm:$0xff] }
 0x16b   :  { %3994 = vtanh.f32 %v1076_v58  ;;  %3777 = vmatmul.msk.f32.gmra.mxu1 %vm1116_vm0, %v1321_v61  ;;  %v1395_v61 = vld [vmem:[#allocation2 + $0x3f0] sm:$0xff] }
 0x16c   :  { %3996 = vtanh.f32 %v1071_v9  ;;  %3813 = vmatmul.msk.f32.gmra.mxu2 %vm1116_vm0, %v1357_v5  ;;  %v966_v26 = vpop.permute.xlu0 %965  ;;  %v5313_v56 = vpop.permute.xlu2 %897 }
 0x16d   :  { %3998 = vtanh.f32 %v2355_v17  ;;  %3849 = vmatmul.msk.f32.gmra.mxu3 %vm1116_vm0, %v1393_v40  ;;  %v1030_v60 = vmul.f32 %v966_v26, %v4446_v2  ;;  %v5318_v33 = vpop.permute.xlu1 %887  ;;  %v1323_v17 = vld [vmem:[#allocation2 + $0x1b0] sm:$0xff]  ;;  %v918_v26 = vmul.f32 %v5244_v25, %v4449_v3 }
 0x16f   :  { %v1903_v51 = vpop.f32.mrf.mxu0  ;;  %v1054_v49 = vadd.f32 %v1030_v60, %v910_v6 }
 0x170   :  { %v3993_v15 = vpop.eup %3992  ;;  %v2356_v18 = vadd.f32 %v5220_v39, %v1903_v51  ;;  %v914_v51 = vmul.f32 %v5167_v36, %v4449_v3 }
 0x171   :  { %v3995_v23 = vpop.eup %3994  ;;  %1246 = vst.msk [vmem:[#allocation2 + $0x408] sm:$0xff] %vm1116_vm0, %v3993_v15  ;;  %v1078_v16 = vadd.f32 %v5009_v63, %v1054_v49 }
 0x172   :  { %v3997_v28 = vpop.eup %3996  ;;  %1253 = vst.msk [vmem:[#allocation2 + $0x440] sm:$0xff] %vm1116_vm0, %v3995_v23  ;;  %4000 = vtanh.f32 %v2356_v18  ;;  %3744 = vmatmul.msk.f32.gmra.mxu0 %vm1116_vm0, %v1288_v53  ;;  %v907_v53 = vmul.f32 %v5200_v22, %v4449_v3 }
 0x173   :  { %v5325_v34 = vpop.eup %3998  ;;  %1248 = vst.msk [vmem:[#allocation2 + $0x418] sm:$0xff] %vm1116_vm0, %v3997_v28  ;;  %3778 = vmatmul.msk.f32.gmra.mxu1 %vm1116_vm0, %v1322_v41  ;;  %4002 = vtanh.f32 %v1078_v16 }
 0x174   :  { %3814 = vmatmul.msk.f32.gmra.mxu2 %vm1116_vm0, %v1358_v52  ;;  %v2822_v47 = vmul.f32 %v5325_v34, %v5239_v44  ;;  %v986_v42 = vpop.permute.xlu0 %985 }
 0x175   :  { %3850 = vmatmul.msk.f32.gmra.mxu3 %vm1116_vm0, %v1394_v20  ;;  %v1035_v13 = vmul.f32 %v986_v42, %v4446_v2  ;;  %v974_v38 = vpop.permute.xlu2 %973  ;;  %v1290_v20 = vld [vmem:[#allocation2 + $0xa8] sm:$0xff] }
 0x176   :  { %v2858_v54 = vsel %vm1116_vm0, %v2822_v47, 0.0  ;;  %v946_v24 = vpop.permute.xlu1 %945  ;;  %v1032_v55 = vmul.f32 %v974_v38, %v4446_v2  ;;  %v1360_v38 = vld [vmem:[#allocation2 + $0x2d8] sm:$0xff] }
 0x177   :  { %2859 = vadd.xlane.f32.xlu2 %v2858_v54  ;;  %v1906_v1 = vpop.f32.mrf.mxu0  ;;  %v1059_v11 = vadd.f32 %v1035_v13, %v915_v7  ;;  %v1025_v12 = vmul.f32 %v946_v24, %v4446_v2  ;;  %v1324_v54 = vld [vmem:[#allocation2 + $0x1b8] sm:$0xff] }
 0x178   :  { %v5340_v21 = vpop.eup %4000  ;;  %v2357_v43 = vadd.f32 %v5220_v39, %v1906_v1  ;;  %v1056_v4 = vadd.f32 %v1032_v55, %v912_v30  ;;  %v1396_v55 = vld [vmem:[#allocation2 + $0x3f8] sm:$0xff] }
 0x179   :  { %7127 = vst [vmem:[#allocation7_spill] sm:$0xff] %v5340_v21  ;;  %v2823_v14 = vmul.f32 %v5340_v21, %v5239_v44  ;;  %v4003_v32 = vpop.eup %4002  ;;  %v1083_v59 = vadd.f32 %v5009_v63, %v1059_v11  ;;  %v1049_v58 = vadd.f32 %v1025_v12, %v905_v31  ;;  %v917_v11 = vmul.f32 %v5195_v45, %v4449_v3 }
 0x17a   :  { %4004 = vtanh.f32 %v2357_v43  ;;  %3745 = vmatmul.msk.f32.gmra.mxu0 %vm1116_vm0, %v1289_v10  ;;  %1255 = vst.msk [vmem:[#allocation2 + $0x450] sm:$0xff] %vm1116_vm0, %v4003_v32  ;;  %v1080_v48 = vadd.f32 %v5009_v63, %v1056_v4  ;;  %v921_v43 = vmul.f32 %v5318_v33, %v4449_v3  ;;  %v909_v32 = vmul.f32 %v5174_v0, %v4449_v3 }
 0x17b   :  { %3779 = vmatmul.msk.f32.gmra.mxu1 %vm1116_vm0, %v1323_v17  ;;  %4006 = vtanh.f32 %v1083_v59  ;;  %v1073_v9 = vadd.f32 %v5009_v63, %v1049_v58  ;;  %v2861_v5 = vsel %vm1116_vm0, %v2823_v14, 0.0 }
 0x17c   :  { %3815 = vmatmul.msk.f32.gmra.mxu2 %vm1116_vm0, %v1359_v46  ;;  %4008 = vtanh.f32 %v1080_v48  ;;  %v998_v40 = vpop.permute.xlu0 %997  ;;  %v1291_v46 = vld [vmem:[#allocation2 + $0xb0] sm:$0xff] }
 0x17d   :  { %3851 = vmatmul.msk.f32.gmra.mxu3 %vm1116_vm0, %v1395_v61  ;;  %4010 = vtanh.f32 %v1073_v9  ;;  %v1038_v6 = vmul.f32 %v998_v40, %v4446_v2  ;;  %v982_v60 = vpop.permute.xlu2 %981  ;;  %v1325_v40 = vld [vmem:[#allocation2 + $0x1c0] sm:$0xff] }
 0x17e   :  { %v954_v49 = vpop.permute.xlu1 %953  ;;  %v1034_v18 = vmul.f32 %v982_v60, %v4446_v2 }
 0x17f   :  { %2862 = vadd.xlane.f32.xlu2 %v2861_v5  ;;  %v1909_v15 = vpop.f32.mrf.mxu0  ;;  %v1062_v25 = vadd.f32 %v1038_v6, %v918_v26  ;;  %v1027_v41 = vmul.f32 %v954_v49, %v4446_v2  ;;  %v1361_v6 = vld [vmem:[#allocation2 + $0x2e0] sm:$0xff] }
 0x180   :  { %v5365_v23 = vpop.eup %4004  ;;  %v5369_v28 = vpop.f32.mrf.mxu1  ;;  %v2358_v16 = vadd.f32 %v5220_v39, %v1909_v15  ;;  %v1058_v52 = vadd.f32 %v1034_v18, %v914_v51  ;;  %v1397_v18 = vld [vmem:[#allocation2 + $0x400] sm:$0xff] }
 0x181   :  { %v2824_v36 = vmul.f32 %v5365_v23, %v5239_v44  ;;  %v4007_v47 = vpop.eup %4006  ;;  %v1086_v42 = vadd.f32 %v5009_v63, %v1062_v25  ;;  %v1051_v7 = vadd.f32 %v1027_v41, %v907_v53  ;;  %v5413_v25 = vpop.f32.mrf.mxu2  ;;  %v920_v41 = vmul.f32 %v5262_v37, %v4449_v3 }
 0x182   :  { %4012 = vtanh.f32 %v2358_v16  ;;  %3746 = vmatmul.msk.f32.gmra.mxu0 %vm1116_vm0, %v1290_v20  ;;  %v4009_v22 = vpop.eup %4008  ;;  %1260 = vst.msk [vmem:[#allocation2 + $0x478] sm:$0xff] %vm1116_vm0, %v4007_v47  ;;  %v1082_v13 = vadd.f32 %v5009_v63, %v1058_v52 }
 0x183   :  { %3780 = vmatmul.msk.f32.gmra.mxu1 %vm1116_vm0, %v1324_v54  ;;  %v2864_v30 = vsel %vm1116_vm0, %v2824_v36, 0.0  ;;  %v4011_v1 = vpop.eup %4010  ;;  %1257 = vst.msk [vmem:[#allocation2 + $0x460] sm:$0xff] %vm1116_vm0, %v4009_v22  ;;  %4014 = vtanh.f32 %v1086_v42  ;;  %v1075_v24 = vadd.f32 %v5009_v63, %v1051_v7  ;;  %v911_v42 = vmul.f32 %v5136_v8, %v4449_v3  ;;  %v1362_v8 = vld [vmem:[#allocation2 + $0x2e8] sm:$0xff] }
 0x184   :  { %3816 = vmatmul.msk.f32.gmra.mxu2 %vm1116_vm0, %v1360_v38  ;;  %2865 = vadd.xlane.f32.xlu0 %v2864_v30  ;;  %1250 = vst.msk [vmem:[#allocation2 + $0x428] sm:$0xff] %vm1116_vm0, %v4011_v1  ;;  %4016 = vtanh.f32 %v1082_v13  ;;  %v1292_v38 = vld [vmem:[#allocation2 + $0xb8] sm:$0xff] }
 0x185   :  { %3852 = vmatmul.msk.f32.gmra.mxu3 %vm1116_vm0, %v1396_v55  ;;  %4018 = vtanh.f32 %v1075_v24  ;;  %v994_v31 = vpop.permute.xlu2 %993  ;;  %v1010_v48 = vpop.permute.xlu0 %1009  ;;  %7128 = vst [vmem:[#allocation8_spill] sm:$0xff] %v5413_v25  ;;  %v1326_v24 = vld [vmem:[#allocation2 + $0x1c8] sm:$0xff] }
 0x186   :  { %v962_v4 = vpop.permute.xlu1 %961  ;;  %v1037_v10 = vmul.f32 %v994_v31, %v4446_v2  ;;  %v1041_v9 = vmul.f32 %v1010_v48, %v4446_v2 }
 0x187   :  { %v1912_v12 = vpop.f32.mrf.mxu0  ;;  %v1029_v17 = vmul.f32 %v962_v4, %v4446_v2 }
 0x188   :  { %v5391_v14 = vpop.eup %4012  ;;  %v5395_v59 = vpop.f32.mrf.mxu1  ;;  %v2359_v58 = vadd.f32 %v5220_v39, %v1912_v12  ;;  %v1061_v45 = vadd.f32 %v1037_v10, %v917_v11  ;;  %v1065_v51 = vadd.f32 %v1041_v9, %v921_v43  ;;  %v1398_v10 = vld [vmem:[#allocation2 + $0x408] sm:$0xff] }
 0x189   :  { %v2825_v33 = vmul.f32 %v5391_v14, %v5239_v44  ;;  %v4015_v61 = vpop.eup %4014  ;;  %v1053_v5 = vadd.f32 %v1029_v17, %v909_v32 }
 0x18a   :  { %4020 = vtanh.f32 %v2359_v58  ;;  %3747 = vmatmul.msk.f32.gmra.mxu0 %vm1116_vm0, %v1291_v46  ;;  %v4017_v0 = vpop.eup %4016  ;;  %1263 = vst.msk [vmem:[#allocation2 + $0x490] sm:$0xff] %vm1116_vm0, %v4015_v61  ;;  %v1085_v26 = vadd.f32 %v5009_v63, %v1061_v45  ;;  %v1089_v53 = vadd.f32 %v5009_v63, %v1065_v51 }
 0x18b   :  { %3781 = vmatmul.msk.f32.gmra.mxu1 %vm1116_vm0, %v1325_v40  ;;  %v2867_v60 = vsel %vm1116_vm0, %v2825_v33, 0.0  ;;  %v4019_v15 = vpop.eup %4018  ;;  %1259 = vst.msk [vmem:[#allocation2 + $0x470] sm:$0xff] %vm1116_vm0, %v4017_v0  ;;  %v1077_v49 = vadd.f32 %v5009_v63, %v1053_v5  ;;  %v913_v5 = vmul.f32 %v5242_v29, %v4449_v3  ;;  %v1293_v0 = vld [vmem:[#allocation2 + $0xc0] sm:$0xff] }
 0x18c   :  { %3817 = vmatmul.msk.f32.gmra.mxu2 %vm1116_vm0, %v1361_v6  ;;  %2868 = vadd.xlane.f32.xlu1 %v2867_v60  ;;  %1252 = vst.msk [vmem:[#allocation2 + $0x438] sm:$0xff] %vm1116_vm0, %v4019_v15  ;;  %4022 = vtanh.f32 %v1085_v26  ;;  %v1327_v60 = vld [vmem:[#allocation2 + $0x1d0] sm:$0xff] }
 0x18d   :  { %3853 = vmatmul.msk.f32.gmra.mxu3 %vm1116_vm0, %v1397_v18  ;;  %4024 = vtanh.f32 %v1077_v49  ;;  %v1006_v16 = vpop.permute.xlu2 %1005  ;;  %v1363_v18 = vld [vmem:[#allocation2 + $0x2f0] sm:$0xff] }
 0x18e   :  { %4026 = vtanh.f32 %v1089_v53  ;;  %v970_v20 = vpop.permute.xlu1 %969  ;;  %v1040_v36 = vmul.f32 %v1006_v16, %v4446_v2 }
 0x18f   :  { %v1915_v52 = vpop.f32.mrf.mxu0  ;;  %v1031_v22 = vmul.f32 %v970_v20, %v4446_v2 }
 0x190   :  { %v4021_v47 = vpop.eup %4020  ;;  %v5420_v7 = vpop.f32.mrf.mxu1  ;;  %v2360_v54 = vadd.f32 %v5220_v39, %v1915_v52  ;;  %v1064_v13 = vadd.f32 %v1040_v36, %v920_v41  ;;  %v1399_v41 = vld [vmem:[#allocation2 + $0x410] sm:$0xff] }
 0x191   :  { %v2826_v30 = vmul.f32 %v4021_v47, %v5239_v44  ;;  %v2423_v37 = vmul.f32 %v4021_v47, %v4021_v47  ;;  %v1055_v1 = vadd.f32 %v1031_v22, %v911_v42  ;;  %v2583_v17 = vmul.f32 2.0, %v4021_v47  ;;  %v5473_v47 = vpop.f32.mrf.mxu3 }
 0x192   :  { %4028 = vtanh.f32 %v2360_v54  ;;  %3748 = vmatmul.msk.f32.gmra.mxu0 %vm1116_vm0, %v1292_v38  ;;  %v4023_v55 = vpop.eup %4022  ;;  %v1088_v31 = vadd.f32 %v5009_v63, %v1064_v13 }
 0x193   :  { %3782 = vmatmul.msk.f32.gmra.mxu1 %vm1116_vm0, %v1326_v24  ;;  %v2870_v11 = vsel %vm1116_vm0, %v2826_v30, 0.0  ;;  %v5429_v43 = vsub.f32 1.0, %v2423_v37  ;;  %v4025_v12 = vpop.eup %4024  ;;  %1262 = vst.msk [vmem:[#allocation2 + $0x488] sm:$0xff] %vm1116_vm0, %v4023_v55  ;;  %v1079_v4 = vadd.f32 %v5009_v63, %v1055_v1  ;;  %v916_v1 = vmul.f32 %v5260_v57, %v4449_v3  ;;  %v1294_v55 = vld [vmem:[#allocation2 + $0xc8] sm:$0xff] }
 0x194   :  { %3818 = vmatmul.msk.f32.gmra.mxu2 %vm1116_vm0, %v1362_v8  ;;  %2871 = vadd.xlane.f32.xlu2 %v2870_v11  ;;  %v4027_v32 = vpop.eup %4026  ;;  %1254 = vst.msk [vmem:[#allocation2 + $0x448] sm:$0xff] %vm1116_vm0, %v4025_v12  ;;  %4030 = vtanh.f32 %v1088_v31  ;;  %v1328_v11 = vld [vmem:[#allocation2 + $0x1d8] sm:$0xff] }
 0x195   :  { %7129 = vst [vmem:[#allocation9_spill] sm:$0xff] %v5429_v43  ;;  %3854 = vmatmul.msk.f32.gmra.mxu3 %vm1116_vm0, %v1398_v10  ;;  %v5438_v58 = vmul.f32 %v5429_v43, %v5344_v50  ;;  %4032 = vtanh.f32 %v1079_v4  ;;  %v1364_v10 = vld [vmem:[#allocation2 + $0x2f8] sm:$0xff] }
 0x196   :  { %1266 = vst.msk [vmem:[#allocation2 + $0x4a8] sm:$0xff] %vm1116_vm0, %v4027_v32  ;;  %v978_v61 = vpop.permute.xlu1 %977 }
 0x197   :  { %v5441_v48 = vpop.f32.mrf.mxu2  ;;  %v1918_v63 = vpop.f32.mrf.mxu0  ;;  %v2615_v45 = vmul.f32 %v2583_v17, %v5438_v58  ;;  %v1033_v40 = vmul.f32 %v978_v61, %v4446_v2  ;;  %v1400_v17 = vld [vmem:[#allocation2 + $0x418] sm:$0xff] }
 0x198   :  { %7130 = vst [vmem:[#allocation10_spill] sm:$0xff] %v5441_v48  ;;  %v4029_v46 = vpop.eup %4028  ;;  %v5444_v33 = vpop.f32.mrf.mxu1  ;;  %v2361_v9 = vadd.f32 %v5220_v39, %v1918_v63 }
 0x199   :  { %v2827_v26 = vmul.f32 %v4029_v46, %v5239_v44  ;;  %v2424_v6 = vmul.f32 %v4029_v46, %v4029_v46  ;;  %v5453_v51 = vmul.f32 %v2615_v45, %v5344_v50  ;;  %v1057_v49 = vadd.f32 %v1033_v40, %v913_v5  ;;  %v5465_v50 = vld [vmem:[%s7068_s5] ss:$0 sm:$0xff] }
 0x19a   :  { %4034 = vtanh.f32 %v2361_v9  ;;  %3749 = vmatmul.msk.f32.gmra.mxu0 %vm1116_vm0, %v1293_v0  ;;  %v4031_v15 = vpop.eup %4030  ;;  %v2584_v36 = vmul.f32 2.0, %v4029_v46 }
 0x19b   :  { %7131 = vst [vmem:[#allocation11_spill] sm:$0xff] %v5453_v51  ;;  %3783 = vmatmul.msk.f32.gmra.mxu1 %vm1116_vm0, %v1327_v60  ;;  %v2873_v29 = vsel %vm1116_vm0, %v2827_v26, 0.0  ;;  %v5457_v53 = vsub.f32 1.0, %v2424_v6  ;;  %v4033_v16 = vpop.eup %4032  ;;  %v1081_v52 = vadd.f32 %v5465_v50, %v1057_v49  ;;  %v6023_v51 = vld [vmem:[#allocation3] ss:$0 sm:$0xff] }
 0x19c   :  { %1265 = vst.msk [vmem:[#allocation2 + $0x4a0] sm:$0xff] %vm1116_vm0, %v4031_v15  ;;  %3819 = vmatmul.msk.f32.gmra.mxu2 %vm1116_vm0, %v1363_v18  ;;  %2874 = vadd.xlane.f32.xlu0 %v2873_v29  ;;  %v1295_v15 = vld [vmem:[#allocation2 + $0xd0] sm:$0xff] }
 0x19d   :  { %7132 = vst [vmem:[#allocation12_spill] sm:$0xff] %v5457_v53  ;;  %3855 = vmatmul.msk.f32.gmra.mxu3 %vm1116_vm0, %v1399_v41  ;;  %v5471_v20 = vmul.f32 %v5457_v53, %v5369_v28  ;;  %4036 = vtanh.f32 %v1081_v52  ;;  %v1329_v52 = vld [vmem:[#allocation2 + $0x1e0] sm:$0xff] }
 0x19e   :  { %1256 = vst.msk [vmem:[#allocation2 + $0x458] sm:$0xff] %vm1116_vm0, %v4033_v16  ;;  %v990_v37 = vpop.permute.xlu1 %989  ;;  %v919_v16 = vmul.f32 %v5274_v35, %v4449_v3 }
 0x19f   :  { %v5475_v42 = vpop.f32.mrf.mxu2  ;;  %v1921_v54 = vpop.f32.mrf.mxu0  ;;  %v2616_v22 = vmul.f32 %v2584_v36, %v5471_v20  ;;  %v1036_v24 = vmul.f32 %v990_v37, %v4446_v2  ;;  %v1365_v36 = vld [vmem:[#allocation2 + $0x300] sm:$0xff] }
 0x1a0   :  { %7133 = vst [vmem:[#allocation13_spill] sm:$0xff] %v5475_v42  ;;  %v4035_v13 = vpop.eup %4034  ;;  %v5478_v38 = vpop.f32.mrf.mxu1  ;;  %v2362_v30 = vadd.f32 %v5220_v39, %v1921_v54 }
 0x1a1   :  { %v2828_v31 = vmul.f32 %v4035_v13, %v5239_v44  ;;  %v2425_v8 = vmul.f32 %v4035_v13, %v4035_v13  ;;  %v5487_v12 = vmul.f32 %v2616_v22, %v5369_v28  ;;  %v1060_v4 = vadd.f32 %v1036_v24, %v916_v1 }
 0x1a2   :  { %4038 = vtanh.f32 %v2362_v30  ;;  %3750 = vmatmul.msk.f32.gmra.mxu0 %vm1116_vm0, %v1294_v55  ;;  %v2585_v46 = vmul.f32 2.0, %v4035_v13 }
 0x1a3   :  { %7134 = vst [vmem:[#allocation14_spill] sm:$0xff] %v5487_v12  ;;  %3784 = vmatmul.msk.f32.gmra.mxu1 %vm1116_vm0, %v1328_v11  ;;  %v2876_v32 = vsel %vm1116_vm0, %v2828_v31, 0.0  ;;  %v5491_v57 = vsub.f32 1.0, %v2425_v8  ;;  %v4037_v63 = vpop.eup %4036  ;;  %v1084_v45 = vadd.f32 %v5465_v50, %v1060_v4  ;;  %v1382_v12 = vld [vmem:[#allocation2 + $0x388] sm:$0xff] }
 0x1a4   :  { %3820 = vmatmul.msk.f32.gmra.mxu2 %vm1116_vm0, %v1364_v10  ;;  %2877 = vadd.xlane.f32.xlu1 %v2876_v32  ;;  %1258 = vst.msk [vmem:[#allocation2 + $0x468] sm:$0xff] %vm1116_vm0, %v4037_v63 }
 0x1a5   :  { %7135 = vst [vmem:[#allocation15_spill] sm:$0xff] %v5491_v57  ;;  %3856 = vmatmul.msk.f32.gmra.mxu3 %vm1116_vm0, %v1400_v17  ;;  %v5498_v28 = vmul.f32 %v5491_v57, %v5395_v59  ;;  %4040 = vtanh.f32 %v1084_v45  ;;  %v1296_v17 = vld [vmem:[#allocation2 + $0xd8] sm:$0xff] }
 0x1a6   :  { %v1002_v60 = vpop.permute.xlu1 %1001 }
 0x1a7   :  { %v5501_v9 = vpop.f32.mrf.mxu2  ;;  %v1924_v61 = vpop.f32.mrf.mxu0  ;;  %v2617_v5 = vmul.f32 %v2585_v46, %v5498_v28  ;;  %v1039_v41 = vmul.f32 %v1002_v60, %v4446_v2 }
 0x1a8   :  { %7136 = vst [vmem:[#allocation16_spill] sm:$0xff] %v5501_v9  ;;  %v4039_v40 = vpop.eup %4038  ;;  %v5504_v0 = vpop.f32.mrf.mxu1  ;;  %v2363_v26 = vadd.f32 %v5220_v39, %v1924_v61  ;;  %v922_v61 = vmul.f32 %v5277_v62, %v4449_v3 }
 0x1a9   :  { %v5507_v6 = vpop.f32.mrf.mxu3  ;;  %v2829_v49 = vmul.f32 %v4039_v40, %v5239_v44  ;;  %v2426_v18 = vmul.f32 %v4039_v40, %v4039_v40  ;;  %v5511_v29 = vmul.f32 %v2617_v5, %v5395_v59  ;;  %v1063_v13 = vadd.f32 %v1039_v41, %v919_v16  ;;  %v1401_v59 = vld [vmem:[#allocation2 + $0x420] sm:$0xff] }
 0x1aa   :  { %4042 = vtanh.f32 %v2363_v26  ;;  %3751 = vmatmul.msk.f32.gmra.mxu0 %vm1116_vm0, %v1295_v15  ;;  %v2586_v37 = vmul.f32 2.0, %v4039_v40  ;;  %v1330_v40 = vld [vmem:[#allocation2 + $0x1e8] sm:$0xff] }
 0x1ab   :  { %7137 = vst [vmem:[#allocation17_spill] sm:$0xff] %v5511_v29  ;;  %3785 = vmatmul.msk.f32.gmra.mxu1 %vm1116_vm0, %v1329_v52  ;;  %v2879_v54 = vsel %vm1116_vm0, %v2829_v49, 0.0  ;;  %v5519_v22 = vsub.f32 1.0, %v2426_v18  ;;  %v4041_v30 = vpop.eup %4040  ;;  %v1087_v1 = vadd.f32 %v5465_v50, %v1063_v13  ;;  %v1366_v26 = vld [vmem:[#allocation2 + $0x308] sm:$0xff] }
 0x1ac   :  { %3821 = vmatmul.msk.f32.gmra.mxu2 %vm1116_vm0, %v1365_v36  ;;  %2880 = vadd.xlane.f32.xlu2 %v2879_v54  ;;  %1261 = vst.msk [vmem:[#allocation2 + $0x480] sm:$0xff] %vm1116_vm0, %v4041_v30 }
 0x1ad   :  { %7138 = vst [vmem:[#allocation18_spill] sm:$0xff] %v5519_v22  ;;  %3857 = vmatmul.msk.f32.gmra.mxu3 %vm1116_vm0, %v1401_v59  ;;  %v5525_v35 = vmul.f32 %v5519_v22, %v5420_v7  ;;  %4044 = vtanh.f32 %v1087_v1  ;;  %v923_v59 = vmul.f32 %v5313_v56, %v4449_v3  ;;  %v1367_v56 = vld [vmem:[#allocation2 + $0x310] sm:$0xff] }
 0x1ae   :  { %v1014_v32 = vpop.permute.xlu1 %1013 }
 0x1af   :  { %v5529_v24 = vpop.f32.mrf.mxu2  ;;  %v1927_v55 = vpop.f32.mrf.mxu0  ;;  %v2618_v31 = vmul.f32 %v2586_v37, %v5525_v35  ;;  %v1042_v5 = vmul.f32 %v1014_v32, %v4446_v2 }
 0x1b0   :  { %7139 = vst [vmem:[#allocation19_spill] sm:$0xff] %v5529_v24  ;;  %v4043_v8 = vpop.eup %4042  ;;  %v5532_v11 = vpop.f32.mrf.mxu1  ;;  %v2364_v4 = vadd.f32 %v5220_v39, %v1927_v55  ;;  %v1297_v55 = vld [vmem:[#allocation2 + $0xe0] sm:$0xff] }
 0x1b1   :  { %v5535_v10 = vpop.f32.mrf.mxu3  ;;  %v2830_v63 = vmul.f32 %v4043_v8, %v5239_v44  ;;  %v2427_v45 = vmul.f32 %v4043_v8, %v4043_v8  ;;  %v5539_v46 = vmul.f32 %v2618_v31, %v5420_v7  ;;  %v1066_v49 = vadd.f32 %v1042_v5, %v922_v61  ;;  %v1402_v7 = vld [vmem:[#allocation2 + $0x428] sm:$0xff]  ;;  %v1403_v61 = vld [vmem:[#allocation2 + $0x430] sm:$0xff] }
 0x1b2   :  { %4046 = vtanh.f32 %v2364_v4  ;;  %3752 = vmatmul.msk.f32.gmra.mxu0 %vm1116_vm0, %v1296_v17  ;;  %v2587_v18 = vmul.f32 2.0, %v4043_v8  ;;  %v1018_v8 = vpop.permute.xlu2 %1017  ;;  %v1331_v17 = vld [vmem:[#allocation2 + $0x1f0] sm:$0xff] }
 0x1b3   :  { %7140 = vst [vmem:[#allocation20_spill] sm:$0xff] %v5539_v46  ;;  %3786 = vmatmul.msk.f32.gmra.mxu1 %vm1116_vm0, %v1330_v40  ;;  %v2882_v60 = vsel %vm1116_vm0, %v2830_v63, 0.0  ;;  %v5547_v15 = vsub.f32 1.0, %v2427_v45  ;;  %v4045_v16 = vpop.eup %4044  ;;  %v1090_v41 = vadd.f32 %v5465_v50, %v1066_v49  ;;  %v1043_v3 = vmul.f32 %v1018_v8, %v4446_v2 }
 0x1b4   :  { %3822 = vmatmul.msk.f32.gmra.mxu2 %vm1116_vm0, %v1366_v26  ;;  %2883 = vadd.xlane.f32.xlu0 %v2882_v60  ;;  %1264 = vst.msk [vmem:[#allocation2 + $0x498] sm:$0xff] %vm1116_vm0, %v4045_v16 }
 0x1b5   :  { %7141 = vst [vmem:[#allocation21_spill] sm:$0xff] %v5547_v15  ;;  %3858 = vmatmul.msk.f32.gmra.mxu3 %vm1116_vm0, %v1402_v7  ;;  %v5553_v62 = vmul.f32 %v5547_v15, %v5444_v33  ;;  %4048 = vtanh.f32 %v1090_v41  ;;  %v1067_v5 = vadd.f32 %v1043_v3, %v923_v59  ;;  %v2989_v7 = vmul.f32 %v5239_v44, %v5438_v58  ;;  %v1368_v58 = vld [vmem:[#allocation2 + $0x318] sm:$0xff] }
 0x1b7   :  { %v5557_v52 = vpop.f32.mrf.mxu2  ;;  %v1930_v36 = vpop.f32.mrf.mxu0  ;;  %v2619_v54 = vmul.f32 %v2587_v18, %v5553_v62  ;;  %v1091_v26 = vadd.f32 %v5465_v50, %v1067_v5 }
 0x1b8   :  { %7142 = vst [vmem:[#allocation22_spill] sm:$0xff] %v5557_v52  ;;  %v4047_v13 = vpop.eup %4046  ;;  %v5562_v30 = vpop.f32.mrf.mxu1  ;;  %v2365_v37 = vadd.f32 %v5220_v39, %v1930_v36 }
 0x1b9   :  { %v5565_v1 = vpop.f32.mrf.mxu3  ;;  %v2831_v31 = vmul.f32 %v4047_v13, %v5239_v44  ;;  %v2428_v4 = vmul.f32 %v4047_v13, %v4047_v13  ;;  %v5569_v32 = vmul.f32 %v2619_v54, %v5444_v33  ;;  %v2588_v40 = vmul.f32 2.0, %v4047_v13  ;;  %v1298_v13 = vld [vmem:[#allocation2 + $0xe8] sm:$0xff] }
 0x1ba   :  { %4050 = vtanh.f32 %v2365_v37  ;;  %3753 = vmatmul.msk.f32.gmra.mxu0 %vm1116_vm0, %v1297_v55  ;;  %v1332_v55 = vld [vmem:[#allocation2 + $0x1f8] sm:$0xff] }
 0x1bb   :  { %7143 = vst [vmem:[#allocation23_spill] sm:$0xff] %v5569_v32  ;;  %3787 = vmatmul.msk.f32.gmra.mxu1 %vm1116_vm0, %v1331_v17  ;;  %v2885_v63 = vsel %vm1116_vm0, %v2831_v31, 0.0  ;;  %v5575_v45 = vsub.f32 1.0, %v2428_v4  ;;  %v4049_v2 = vpop.eup %4048  ;;  %4052 = vtanh.f32 %v1091_v26  ;;  %v3033_v31 = vsel %vm1116_vm0, %v2989_v7, 0.0  ;;  %v1404_v17 = vld [vmem:[#allocation2 + $0x438] sm:$0xff] }
 0x1bc   :  { %3823 = vmatmul.msk.f32.gmra.mxu2 %vm1116_vm0, %v1367_v56  ;;  %2886 = vadd.xlane.f32.xlu1 %v2885_v63  ;;  %1267 = vst.msk [vmem:[#allocation2 + $0x4b0] sm:$0xff] %vm1116_vm0, %v4049_v2  ;;  %v2990_v7 = vmul.f32 %v5239_v44, %v5471_v20  ;;  %v1405_v20 = vld [vmem:[#allocation2 + $0x440] sm:$0xff] }
 0x1bd   :  { %7144 = vst [vmem:[#allocation24_spill] sm:$0xff] %v5575_v45  ;;  %3859 = vmatmul.msk.f32.gmra.mxu3 %vm1116_vm0, %v1403_v61  ;;  %v5581_v33 = vmul.f32 %v5575_v45, %v5478_v38 }
 0x1bf   :  { %v5585_v60 = vpop.f32.mrf.mxu2  ;;  %v1933_v49 = vpop.f32.mrf.mxu0  ;;  %v2620_v18 = vmul.f32 %v2588_v40, %v5581_v33 }
 0x1c0   :  { %v4051_v16 = vpop.eup %4050  ;;  %v5590_v41 = vpop.f32.mrf.mxu1  ;;  %v2366_v36 = vadd.f32 %v5220_v39, %v1933_v49 }
 0x1c1   :  { %v5593_v54 = vpop.f32.mrf.mxu3  ;;  %v2832_v50 = vmul.f32 %v4051_v16, %v5239_v44  ;;  %v2429_v59 = vmul.f32 %v4051_v16, %v4051_v16  ;;  %v5597_v37 = vmul.f32 %v2620_v18, %v5478_v38  ;;  %v2589_v3 = vmul.f32 2.0, %v4051_v16  ;;  %v4053_v56 = vpop.eup %4052  ;;  %v1299_v18 = vld [vmem:[#allocation2 + $0xf0] sm:$0xff] }
 0x1c2   :  { %4054 = vtanh.f32 %v2366_v36  ;;  %3754 = vmatmul.msk.f32.gmra.mxu0 %vm1116_vm0, %v1298_v13  ;;  %1268 = vst.msk [vmem:[#allocation2 + $0x4b8] sm:$0xff] %vm1116_vm0, %v4053_v56 }
 0x1c3   :  { %7145 = vst [vmem:[#allocation25_spill] sm:$0xff] %v5597_v37  ;;  %3788 = vmatmul.msk.f32.gmra.mxu1 %vm1116_vm0, %v1332_v55  ;;  %v2888_v8 = vsel %vm1116_vm0, %v2832_v50, 0.0  ;;  %v5603_v4 = vsub.f32 1.0, %v2429_v59  ;;  %v1333_v50 = vld [vmem:[#allocation2 + $0x200] sm:$0xff]  ;;  %v1419_v43 = vld [vmem:[#allocation2 + $0x4b0] sm:$0xff] }
 0x1c4   :  { %3824 = vmatmul.msk.f32.gmra.mxu2 %vm1116_vm0, %v1368_v58  ;;  %3034 = vadd.xlane.f32.xlu1 %v3033_v31  ;;  %v1369_v59 = vld [vmem:[#allocation2 + $0x320] sm:$0xff]  ;;  %v3036_v58 = vsel %vm1116_vm0, %v2990_v7, 0.0 }
 0x1c5   :  { %7146 = vst [vmem:[#allocation26_spill] sm:$0xff] %v5603_v4  ;;  %3860 = vmatmul.msk.f32.gmra.mxu3 %vm1116_vm0, %v1404_v17  ;;  %2889 = vadd.xlane.f32.xlu2 %v2888_v8  ;;  %v5609_v38 = vmul.f32 %v5603_v4, %v5504_v0 }
 0x1c7   :  { %v5611_v63 = vpop.f32.mrf.mxu2  ;;  %v1936_v61 = vpop.f32.mrf.mxu0  ;;  %v2621_v5 = vmul.f32 %v2589_v3, %v5609_v38  ;;  %v2991_v3 = vmul.f32 %v5239_v44, %v5498_v28 }
 0x1c8   :  { %v4055_v40 = vpop.eup %4054  ;;  %v5615_v2 = vpop.f32.mrf.mxu1  ;;  %v2367_v49 = vadd.f32 %v5220_v39, %v1936_v61 }
 0x1c9   :  { %v5617_v26 = vpop.f32.mrf.mxu3  ;;  %v2833_v16 = vmul.f32 %v4055_v40, %v5239_v44  ;;  %v2430_v36 = vmul.f32 %v4055_v40, %v4055_v40  ;;  %v5624_v13 = vmul.f32 %v2621_v5, %v5504_v0  ;;  %v2590_v31 = vmul.f32 2.0, %v4055_v40  ;;  %v1300_v40 = vld [vmem:[#allocation2 + $0xf8] sm:$0xff] }
 0x1ca   :  { %4056 = vtanh.f32 %v2367_v49  ;;  %3755 = vmatmul.msk.f32.gmra.mxu0 %vm1116_vm0, %v1299_v18  ;;  %v5648_v49 = vld [vmem:[%s7070_s7] ss:$0 sm:$0xff] }
 0x1cb   :  { %7147 = vst [vmem:[#allocation27_spill] sm:$0xff] %v5624_v13  ;;  %3789 = vmatmul.msk.f32.gmra.mxu1 %vm1116_vm0, %v1333_v50  ;;  %v2891_v55 = vsel %vm1116_vm0, %v2833_v16, 0.0  ;;  %v5629_v39 = vsub.f32 1.0, %v2430_v36  ;;  %v5656_v16 = vld [vmem:[%s7071_s8] ss:$0 sm:$0xff]  ;;  %v1334_v50 = vld [vmem:[#allocation2 + $0x208] sm:$0xff] }
 0x1cc   :  { %3825 = vmatmul.msk.f32.gmra.mxu2 %vm1116_vm0, %v1369_v59  ;;  %2892 = vadd.xlane.f32.xlu0 %v2891_v55  ;;  %v1370_v59 = vld [vmem:[#allocation2 + $0x328] sm:$0xff]  ;;  %v3039_v55 = vsel %vm1116_vm0, %v2991_v3, 0.0  ;;  %v2994_v3 = vmul.f32 %v5656_v16, %v5581_v33  ;;  %v1335_v33 = vld [vmem:[#allocation2 + $0x210] sm:$0xff] }
 0x1cd   :  { %7148 = vst [vmem:[#allocation28_spill] sm:$0xff] %v5629_v39  ;;  %3861 = vmatmul.msk.f32.gmra.mxu3 %vm1116_vm0, %v1405_v20  ;;  %3037 = vadd.xlane.f32.xlu2 %v3036_v58  ;;  %v5636_v0 = vmul.f32 %v5629_v39, %v5532_v11 }
 0x1cf   :  { %v5638_v8 = vpop.f32.mrf.mxu2  ;;  %v1939_v17 = vpop.f32.mrf.mxu0  ;;  %v2622_v56 = vmul.f32 %v2590_v31, %v5636_v0  ;;  %v1406_v31 = vld [vmem:[#allocation2 + $0x448] sm:$0xff] }
 0x1d0   :  { %v4057_v61 = vpop.eup %4056  ;;  %v5643_v5 = vpop.f32.mrf.mxu1  ;;  %v2368_v7 = vadd.f32 %v5648_v49, %v1939_v17 }
 0x1d1   :  { %v5651_v18 = vpop.f32.mrf.mxu3  ;;  %v2834_v44 = vmul.f32 %v5656_v16, %v4057_v61  ;;  %v2431_v28 = vmul.f32 %v4057_v61, %v4057_v61  ;;  %v5660_v36 = vmul.f32 %v2622_v56, %v5532_v11  ;;  %v2591_v17 = vmul.f32 2.0, %v4057_v61 }
 0x1d2   :  { %4058 = vtanh.f32 %v2368_v7  ;;  %3756 = vmatmul.msk.f32.gmra.mxu0 %vm1116_vm0, %v1300_v40 }
 0x1d3   :  { %7149 = vst [vmem:[#allocation29_spill] sm:$0xff] %v5660_v36  ;;  %3790 = vmatmul.msk.f32.gmra.mxu1 %vm1116_vm0, %v1334_v50  ;;  %v2894_v20 = vsel %vm1116_vm0, %v2834_v44, 0.0  ;;  %v5666_v58 = vsub.f32 1.0, %v2431_v28 }
 0x1d4   :  { %3826 = vmatmul.msk.f32.gmra.mxu2 %vm1116_vm0, %v1370_v59  ;;  %3040 = vadd.xlane.f32.xlu0 %v3039_v55  ;;  %v2992_v55 = vmul.f32 %v5656_v16, %v5525_v35  ;;  %v1407_v35 = vld [vmem:[#allocation2 + $0x450] sm:$0xff] }
 0x1d5   :  { %7150 = vst [vmem:[#allocation30_spill] sm:$0xff] %v5666_v58  ;;  %3862 = vmatmul.msk.f32.gmra.mxu3 %vm1116_vm0, %v1406_v31  ;;  %2895 = vadd.xlane.f32.xlu1 %v2894_v20  ;;  %v5672_v11 = vmul.f32 %v5666_v58, %v5562_v30  ;;  %v1301_v20 = vld [vmem:[#allocation2 + $0x100] sm:$0xff] }
 0x1d7   :  { %v5674_v56 = vpop.f32.mrf.mxu2  ;;  %v1942_v7 = vpop.f32.mrf.mxu0  ;;  %v2623_v40 = vmul.f32 %v2591_v17, %v5672_v11  ;;  %v1371_v17 = vld [vmem:[#allocation2 + $0x330] sm:$0xff] }
 0x1d8   :  { %v4059_v44 = vpop.eup %4058  ;;  %v5679_v28 = vpop.f32.mrf.mxu1  ;;  %v2369_v50 = vadd.f32 %v5648_v49, %v1942_v7  ;;  %v3048_v7 = vsel %vm1116_vm0, %v2994_v3, 0.0 }
 0x1d9   :  { %v5682_v59 = vpop.f32.mrf.mxu3  ;;  %v2835_v61 = vmul.f32 %v5656_v16, %v4059_v44  ;;  %v2432_v31 = vmul.f32 %v4059_v44, %v4059_v44  ;;  %v5688_v52 = vmul.f32 %v2623_v40, %v5562_v30  ;;  %v3042_v30 = vsel %vm1116_vm0, %v2992_v55, 0.0 }
 0x1da   :  { %4060 = vtanh.f32 %v2369_v50  ;;  %3757 = vmatmul.msk.f32.gmra.mxu0 %vm1116_vm0, %v1301_v20  ;;  %v2592_v50 = vmul.f32 2.0, %v4059_v44  ;;  %v2993_v44 = vmul.f32 %v5656_v16, %v5553_v62  ;;  %v1408_v62 = vld [vmem:[#allocation2 + $0x458] sm:$0xff] }
 0x1db   :  { %7151 = vst [vmem:[#allocation31_spill] sm:$0xff] %v5688_v52  ;;  %3791 = vmatmul.msk.f32.gmra.mxu1 %vm1116_vm0, %v1335_v33  ;;  %v2897_v24 = vsel %vm1116_vm0, %v2835_v61, 0.0  ;;  %v5694_v37 = vsub.f32 1.0, %v2432_v31 }
 0x1dc   :  { %3827 = vmatmul.msk.f32.gmra.mxu2 %vm1116_vm0, %v1371_v17  ;;  %3049 = vadd.xlane.f32.xlu0 %v3048_v7  ;;  %v2995_v7 = vmul.f32 %v5656_v16, %v5609_v38 }
 0x1dd   :  { %7152 = vst [vmem:[#allocation32_spill] sm:$0xff] %v5694_v37  ;;  %3863 = vmatmul.msk.f32.gmra.mxu3 %vm1116_vm0, %v1407_v35  ;;  %3043 = vadd.xlane.f32.xlu1 %v3042_v30  ;;  %v5701_v40 = vmul.f32 %v5694_v37, %v5590_v41  ;;  %v1302_v35 = vld [vmem:[#allocation2 + $0x108] sm:$0xff]  ;;  %v1375_v37 = vld [vmem:[#allocation2 + $0x350] sm:$0xff] }
 0x1de   :  { %2898 = vadd.xlane.f32.xlu2 %v2897_v24  ;;  %v3051_v9 = vsel %vm1116_vm0, %v2995_v7, 0.0 }
 0x1df   :  { %v5703_v3 = vpop.f32.mrf.mxu2  ;;  %v1945_v20 = vpop.f32.mrf.mxu0  ;;  %v2624_v61 = vmul.f32 %v2592_v50, %v5701_v40  ;;  %v1336_v50 = vld [vmem:[#allocation2 + $0x218] sm:$0xff] }
 0x1e0   :  { %v4061_v31 = vpop.eup %4060  ;;  %v5706_v33 = vpop.f32.mrf.mxu1  ;;  %v2370_v17 = vadd.f32 %v5648_v49, %v1945_v20  ;;  %v1372_v20 = vld [vmem:[#allocation2 + $0x338] sm:$0xff] }
 0x1e1   :  { %v5709_v55 = vpop.f32.mrf.mxu3  ;;  %v2836_v24 = vmul.f32 %v5656_v16, %v4061_v31  ;;  %v2433_v30 = vmul.f32 %v4061_v31, %v4061_v31  ;;  %v5717_v32 = vmul.f32 %v2624_v61, %v5590_v41  ;;  %v3045_v41 = vsel %vm1116_vm0, %v2993_v44, 0.0 }
 0x1e2   :  { %4062 = vtanh.f32 %v2370_v17  ;;  %3758 = vmatmul.msk.f32.gmra.mxu0 %vm1116_vm0, %v1302_v35  ;;  %v2593_v17 = vmul.f32 2.0, %v4061_v31  ;;  %v2996_v31 = vmul.f32 %v5656_v16, %v5636_v0  ;;  %v1409_v0 = vld [vmem:[#allocation2 + $0x460] sm:$0xff] }
 0x1e3   :  { %7153 = vst [vmem:[#allocation33_spill] sm:$0xff] %v5717_v32  ;;  %3792 = vmatmul.msk.f32.gmra.mxu1 %vm1116_vm0, %v1336_v50  ;;  %v2900_v46 = vsel %vm1116_vm0, %v2836_v24, 0.0  ;;  %v5722_v38 = vsub.f32 1.0, %v2433_v30  ;;  %v2997_v30 = vmul.f32 %v5656_v16, %v5672_v11  ;;  %v1337_v11 = vld [vmem:[#allocation2 + $0x220] sm:$0xff] }
 0x1e4   :  { %3828 = vmatmul.msk.f32.gmra.mxu2 %vm1116_vm0, %v1372_v20  ;;  %2901 = vadd.xlane.f32.xlu0 %v2900_v46  ;;  %v1303_v20 = vld [vmem:[#allocation2 + $0x110] sm:$0xff] }
 0x1e5   :  { %7154 = vst [vmem:[#allocation34_spill] sm:$0xff] %v5722_v38  ;;  %3864 = vmatmul.msk.f32.gmra.mxu3 %vm1116_vm0, %v1408_v62  ;;  %3052 = vadd.xlane.f32.xlu1 %v3051_v9  ;;  %v5730_v61 = vmul.f32 %v5722_v38, %v5615_v2  ;;  %v3057_v45 = vsel %vm1116_vm0, %v2997_v30, 0.0 }
 0x1e6   :  { %3046 = vadd.xlane.f32.xlu2 %v3045_v41 }
 0x1e7   :  { %v5732_v35 = vpop.f32.mrf.mxu2  ;;  %v1948_v24 = vpop.f32.mrf.mxu0  ;;  %v2625_v7 = vmul.f32 %v2593_v17, %v5730_v61  ;;  %v1373_v17 = vld [vmem:[#allocation2 + $0x340] sm:$0xff] }
 0x1e8   :  { %v4063_v46 = vpop.eup %4062  ;;  %v5737_v50 = vpop.f32.mrf.mxu1  ;;  %v2371_v44 = vadd.f32 %v5648_v49, %v1948_v24 }
 0x1e9   :  { %v5739_v9 = vpop.f32.mrf.mxu3  ;;  %v2837_v62 = vmul.f32 %v5656_v16, %v4063_v46  ;;  %v2434_v41 = vmul.f32 %v4063_v46, %v4063_v46  ;;  %v5746_v38 = vmul.f32 %v2625_v7, %v5615_v2  ;;  %v3054_v2 = vsel %vm1116_vm0, %v2996_v31, 0.0 }
 0x1ea   :  { %4064 = vtanh.f32 %v2371_v44  ;;  %3759 = vmatmul.msk.f32.gmra.mxu0 %vm1116_vm0, %v1303_v20  ;;  %v2594_v44 = vmul.f32 2.0, %v4063_v46  ;;  %v2998_v31 = vmul.f32 %v5656_v16, %v5701_v40  ;;  %v1410_v40 = vld [vmem:[#allocation2 + $0x468] sm:$0xff] }
 0x1eb   :  { %7155 = vst [vmem:[#allocation35_spill] sm:$0xff] %v5746_v38  ;;  %3793 = vmatmul.msk.f32.gmra.mxu1 %vm1116_vm0, %v1337_v11  ;;  %v2903_v24 = vsel %vm1116_vm0, %v2837_v62, 0.0  ;;  %v5752_v32 = vsub.f32 1.0, %v2434_v41 }
 0x1ec   :  { %3829 = vmatmul.msk.f32.gmra.mxu2 %vm1116_vm0, %v1373_v17  ;;  %3058 = vadd.xlane.f32.xlu0 %v3057_v45  ;;  %v3060_v22 = vsel %vm1116_vm0, %v2998_v31, 0.0 }
 0x1ed   :  { %7156 = vst [vmem:[#allocation36_spill] sm:$0xff] %v5752_v32  ;;  %3865 = vmatmul.msk.f32.gmra.mxu3 %vm1116_vm0, %v1409_v0  ;;  %2904 = vadd.xlane.f32.xlu1 %v2903_v24  ;;  %v2498_v7 = vmul.f32 %v5752_v32, %v5643_v5  ;;  %v1304_v24 = vld [vmem:[#allocation2 + $0x118] sm:$0xff]  ;;  %v1338_v32 = vld [vmem:[#allocation2 + $0x228] sm:$0xff] }
 0x1ee   :  { %3055 = vadd.xlane.f32.xlu2 %v3054_v2 }
 0x1ef   :  { %v5759_v20 = vpop.f32.mrf.mxu2  ;;  %v1951_v30 = vpop.f32.mrf.mxu0  ;;  %v3000_v62 = vmul.f32 %v5656_v16, %v2498_v7  ;;  %v2626_v41 = vmul.f32 %v2594_v44, %v2498_v7  ;;  %v1374_v44 = vld [vmem:[#allocation2 + $0x348] sm:$0xff] }
 0x1f0   :  { %v4065_v11 = vpop.eup %4064  ;;  %v5762_v17 = vpop.f32.mrf.mxu1  ;;  %v2372_v0 = vadd.f32 %v5648_v49, %v1951_v30 }
 0x1f1   :  { %v5764_v45 = vpop.f32.mrf.mxu3  ;;  %v2838_v46 = vmul.f32 %v5656_v16, %v4065_v11  ;;  %v2435_v2 = vmul.f32 %v4065_v11, %v4065_v11  ;;  %v5772_v7 = vmul.f32 %v2626_v41, %v5643_v5  ;;  %v3066_v38 = vsel %vm1116_vm0, %v3000_v62, 0.0 }
 0x1f2   :  { %4066 = vtanh.f32 %v2372_v0  ;;  %3760 = vmatmul.msk.f32.gmra.mxu0 %vm1116_vm0, %v1304_v24  ;;  %v2595_v41 = vmul.f32 2.0, %v4065_v11 }
 0x1f3   :  { %7157 = vst [vmem:[#allocation37_spill] sm:$0xff] %v5772_v7  ;;  %3794 = vmatmul.msk.f32.gmra.mxu1 %vm1116_vm0, %v1338_v32  ;;  %v2906_v30 = vsel %vm1116_vm0, %v2838_v46, 0.0  ;;  %v2467_v15 = vsub.f32 1.0, %v2435_v2  ;;  %v1339_v7 = vld [vmem:[#allocation2 + $0x230] sm:$0xff] }
 0x1f4   :  { %3830 = vmatmul.msk.f32.gmra.mxu2 %vm1116_vm0, %v1374_v44  ;;  %3067 = vadd.xlane.f32.xlu0 %v3066_v38  ;;  %v2999_v38 = vmul.f32 %v5656_v16, %v5730_v61  ;;  %v1305_v44 = vld [vmem:[#allocation2 + $0x120] sm:$0xff] }
 0x1f5   :  { %3866 = vmatmul.msk.f32.gmra.mxu3 %vm1116_vm0, %v1410_v40  ;;  %3061 = vadd.xlane.f32.xlu1 %v3060_v22  ;;  %v2499_v5 = vmul.f32 %v2467_v15, %v5679_v28  ;;  %v5782_v32 = vmul.f32 %v2467_v15, %v5585_v60  ;;  %v2563_v40 = vmul.f32 %v2467_v15, %v5473_v47 }
 0x1f6   :  { %2907 = vadd.xlane.f32.xlu2 %v2906_v30 }
 0x1f7   :  { %v5784_v62 = vpop.f32.mrf.mxu2  ;;  %v2627_v0 = vmul.f32 %v2595_v41, %v2499_v5  ;;  %v3001_v22 = vmul.f32 %v5656_v16, %v2499_v5  ;;  %v1954_v31 = vpop.f32.mrf.mxu0 }
 0x1f8   :  { %v4067_v24 = vpop.eup %4066  ;;  %v5786_v46 = vpop.f32.mrf.mxu1  ;;  %v2373_v41 = vadd.f32 %v5648_v49, %v1954_v31 }
 0x1f9   :  { %v5788_v2 = vpop.f32.mrf.mxu3  ;;  %v2659_v11 = vmul.f32 %v2627_v0, %v5679_v28  ;;  %v2839_v60 = vmul.f32 %v5656_v16, %v4067_v24  ;;  %v2436_v30 = vmul.f32 %v4067_v24, %v4067_v24  ;;  %v1411_v28 = vld [vmem:[#allocation2 + $0x470] sm:$0xff]  ;;  %v3063_v0 = vsel %vm1116_vm0, %v2999_v38, 0.0 }
 0x1fa   :  { %3761 = vmatmul.msk.f32.gmra.mxu0 %vm1116_vm0, %v1305_v44  ;;  %4068 = vtanh.f32 %v2373_v41  ;;  %v3069_v47 = vsel %vm1116_vm0, %v3001_v22, 0.0  ;;  %v1340_v41 = vld [vmem:[#allocation2 + $0x238] sm:$0xff] }
 0x1fb   :  { %3795 = vmatmul.msk.f32.gmra.mxu1 %vm1116_vm0, %v1339_v7  ;;  %v2909_v61 = vsel %vm1116_vm0, %v2839_v60, 0.0  ;;  %v2468_v5 = vsub.f32 1.0, %v2436_v30  ;;  %v2691_v42 = vsub.f32 %v2563_v40, %v2659_v11  ;;  %v2596_v7 = vmul.f32 2.0, %v4067_v24  ;;  %v1306_v40 = vld [vmem:[#allocation2 + $0x128] sm:$0xff] }
 0x1fc   :  { %3831 = vmatmul.msk.f32.gmra.mxu2 %vm1116_vm0, %v1375_v37  ;;  %2910 = vadd.xlane.f32.xlu0 %v2909_v61 }
 0x1fd   :  { %3867 = vmatmul.msk.f32.gmra.mxu3 %vm1116_vm0, %v1411_v28  ;;  %3070 = vadd.xlane.f32.xlu1 %v3069_v47  ;;  %v5805_v15 = vmul.f32 %v2468_v5, %v5706_v33  ;;  %v5807_v31 = vmul.f32 0.003183099, %v2691_v42  ;;  %v5810_v44 = vmul.f32 %v2468_v5, %v5611_v63  ;;  %v2564_v61 = vmul.f32 %v2468_v5, %v5507_v6  ;;  %v1376_v28 = vld [vmem:[#allocation2 + $0x358] sm:$0xff] }
 0x1fe   :  { %3064 = vadd.xlane.f32.xlu2 %v3063_v0 }
 0x1ff   :  { %7158 = vst [vmem:[#allocation38_spill] sm:$0xff] %v5810_v44  ;;  %v5812_v37 = vpop.f32.mrf.mxu2  ;;  %v2628_v38 = vmul.f32 %v2596_v7, %v5805_v15  ;;  %v1957_v30 = vpop.f32.mrf.mxu0  ;;  %v1412_v7 = vld [vmem:[#allocation2 + $0x478] sm:$0xff] }
 0x200   :  { %v5817_v11 = vpop.f32.mrf.mxu1  ;;  %v4069_v24 = vpop.eup %4068  ;;  %v2374_v63 = vadd.f32 %v5648_v49, %v1957_v30 }
 0x201   :  { %v5819_v60 = vpop.f32.mrf.mxu3  ;;  %v2660_v42 = vmul.f32 %v2628_v38, %v5706_v33  ;;  %v2840_v0 = vmul.f32 %v5656_v16, %v4069_v24  ;;  %v2437_v47 = vmul.f32 %v4069_v24, %v4069_v24 }
 0x202   :  { %3762 = vmatmul.msk.f32.gmra.mxu0 %vm1116_vm0, %v1306_v40  ;;  %4070 = vtanh.f32 %v2374_v63  ;;  %v2597_v40 = vmul.f32 2.0, %v4069_v24  ;;  %v1377_v24 = vld [vmem:[#allocation2 + $0x360] sm:$0xff] }
 0x203   :  { %3796 = vmatmul.msk.f32.gmra.mxu1 %vm1116_vm0, %v1340_v41  ;;  %v2692_v22 = vsub.f32 %v2564_v61, %v2660_v42  ;;  %v2912_v33 = vsel %vm1116_vm0, %v2840_v0, 0.0  ;;  %v2469_v38 = vsub.f32 1.0, %v2437_v47  ;;  %v1413_v61 = vld [vmem:[#allocation2 + $0x480] sm:$0xff] }
 0x204   :  { %3832 = vmatmul.msk.f32.gmra.mxu2 %vm1116_vm0, %v1376_v28 }
 0x205   :  { %3868 = vmatmul.msk.f32.gmra.mxu3 %vm1116_vm0, %v1412_v7  ;;  %2913 = vadd.xlane.f32.xlu1 %v2912_v33  ;;  %v5830_v30 = vmul.f32 0.003183099, %v2692_v22  ;;  %v5835_v5 = vmul.f32 %v2469_v38, %v5737_v50  ;;  %v5838_v63 = vmul.f32 %v2469_v38, %v5638_v8  ;;  %v1341_v7 = vld [vmem:[#allocation2 + $0x240] sm:$0xff]  ;;  %v2565_v52 = vmul.f32 %v2469_v38, %v5535_v10 }
 0x207   :  { %7159 = vst [vmem:[#allocation39_spill] sm:$0xff] %v5830_v30  ;;  %v5832_v6 = vpop.f32.mrf.mxu2  ;;  %v1960_v28 = vpop.f32.mrf.mxu0  ;;  %v2629_v22 = vmul.f32 %v2597_v40, %v5835_v5 }
 0x208   :  { %7160 = vst [vmem:[#allocation40_spill] sm:$0xff] %v5838_v63  ;;  %v5840_v41 = vpop.f32.mrf.mxu1  ;;  %v5847_v0 = vpop.eup %4070  ;;  %v2375_v47 = vadd.f32 %v5648_v49, %v1960_v28 }
 0x209   :  { %v5842_v42 = vpop.f32.mrf.mxu3  ;;  %v2661_v8 = vmul.f32 %v2629_v22, %v5737_v50  ;;  %v2438_v33 = vmul.f32 %v5847_v0, %v5847_v0  ;;  %v2598_v50 = vmul.f32 2.0, %v5847_v0 }
 0x20a   :  { %4072 = vtanh.f32 %v2375_v47 }
 0x20b   :  { %3797 = vmatmul.msk.f32.gmra.mxu1 %vm1116_vm0, %v1341_v7  ;;  %v2470_v40 = vsub.f32 1.0, %v2438_v33  ;;  %v2693_v58 = vsub.f32 %v2565_v52, %v2661_v8 }
 0x20c   :  { %3833 = vmatmul.msk.f32.gmra.mxu2 %vm1116_vm0, %v1377_v24 }
 0x20d   :  { %3869 = vmatmul.msk.f32.gmra.mxu3 %vm1116_vm0, %v1413_v61  ;;  %v5860_v7 = vmul.f32 %v2470_v40, %v5762_v17  ;;  %v5863_v22 = vmul.f32 0.003183099, %v2693_v58  ;;  %v5866_v29 = vmul.f32 %v2470_v40, %v5674_v56  ;;  %v1342_v58 = vld [vmem:[#allocation2 + $0x248] sm:$0xff]  ;;  %v2566_v36 = vmul.f32 %v2470_v40, %v5565_v1 }
 0x20e   :  { %v1378_v56 = vld [vmem:[#allocation2 + $0x368] sm:$0xff] }
 0x20f   :  { %v5857_v28 = vpop.f32.mrf.mxu2  ;;  %7161 = vst [vmem:[#allocation41_spill] sm:$0xff] %v5860_v7  ;;  %v1963_v61 = vpop.f32.mrf.mxu0  ;;  %v2630_v52 = vmul.f32 %v2598_v50, %v5860_v7  ;;  %v1414_v50 = vld [vmem:[#allocation2 + $0x488] sm:$0xff] }
 0x210   :  { %7162 = vst [vmem:[#allocation42_spill] sm:$0xff] %v5863_v22  ;;  %v5868_v10 = vpop.f32.mrf.mxu1  ;;  %v5874_v8 = vpop.eup %4072  ;;  %v2376_v33 = vadd.f32 %v5648_v49, %v1963_v61 }
 0x211   :  { %7163 = vst [vmem:[#allocation43_spill] sm:$0xff] %v5866_v29  ;;  %v2278_v38 = vpop.f32.mrf.mxu3  ;;  %v2662_v48 = vmul.f32 %v2630_v52, %v5762_v17  ;;  %v5884_v61 = vpop.xlane.xlu1 %2856 }
 0x212   :  { %v2705_v47 = vadd.f32 %v5648_v49, %v2278_v38  ;;  %v2439_v38 = vmul.f32 %v5874_v8, %v5874_v8  ;;  %7164 = vst [vmem:[#allocation44_spill] sm:$0xff] %v5884_v61  ;;  %v5886_v22 = vpop.xlane.xlu2 %2859  ;;  %v1343_v61 = vld [vmem:[#allocation2 + $0x250] sm:$0xff] }
 0x213   :  { %3798 = vmatmul.msk.f32.gmra.mxu1 %vm1116_vm0, %v1342_v58  ;;  %v2694_v24 = vsub.f32 %v2566_v36, %v2662_v48  ;;  %7165 = vst [vmem:[#allocation45_spill] sm:$0xff] %v5886_v22 }
 0x214   :  { %4074 = vtanh.f32 %v2705_v47  ;;  %3834 = vmatmul.msk.f32.gmra.mxu2 %vm1116_vm0, %v1378_v56  ;;  %v2471_v47 = vsub.f32 1.0, %v2439_v38  ;;  %v1415_v38 = vld [vmem:[#allocation2 + $0x490] sm:$0xff] }
 0x215   :  { %4076 = vtanh.f32 %v2376_v33  ;;  %3870 = vmatmul.msk.f32.gmra.mxu3 %vm1116_vm0, %v1414_v50  ;;  %v5890_v17 = vmul.f32 0.003183099, %v2694_v24  ;;  %v2599_v33 = vmul.f32 2.0, %v5874_v8 }
 0x216   :  { %v5895_v52 = vmul.f32 %v2471_v47, %v5786_v46  ;;  %v5899_v56 = vmul.f32 %v2471_v47, %v5703_v3  ;;  %v1379_v3 = vld [vmem:[#allocation2 + $0x370] sm:$0xff]  ;;  %v2567_v29 = vmul.f32 %v2471_v47, %v5593_v54 }
 0x217   :  { %v5888_v58 = vpop.f32.mrf.mxu2  ;;  %7166 = vst [vmem:[#allocation46_spill] sm:$0xff] %v5890_v17  ;;  %v1966_v50 = vpop.f32.mrf.mxu0 }
 0x218   :  { %v5892_v1 = vpop.f32.mrf.mxu1  ;;  %7167 = vst [vmem:[#allocation47_spill] sm:$0xff] %v5895_v52  ;;  %v2377_v22 = vadd.f32 %v5648_v49, %v1966_v50  ;;  %v2631_v57 = vmul.f32 %v2599_v33, %v5895_v52 }
 0x219   :  { %v2281_v40 = vpop.f32.mrf.mxu3  ;;  %7168 = vst [vmem:[#allocation48_spill] sm:$0xff] %v5899_v56  ;;  %v1381_v56 = vld [vmem:[#allocation2 + $0x380] sm:$0xff] }
 0x21a   :  { %v4075_v48 = vpop.eup %4074  ;;  %v2706_v36 = vadd.f32 %v5648_v49, %v2281_v40  ;;  %v2663_v50 = vmul.f32 %v2631_v57, %v5786_v46 }
 0x21b   :  { %v5904_v24 = vpop.eup %4076  ;;  %v3410_v63 = vmul.f32 %v5656_v16, %v4075_v48  ;;  %3799 = vmatmul.msk.f32.gmra.mxu1 %vm1116_vm0, %v1343_v61  ;;  %v5917_v48 = vpop.xlane.xlu0 %2853 }
 0x21c   :  { %4078 = vtanh.f32 %v2706_v36  ;;  %v2440_v40 = vmul.f32 %v5904_v24, %v5904_v24  ;;  %3835 = vmatmul.msk.f32.gmra.mxu2 %vm1116_vm0, %v1379_v3  ;;  %7169 = vst [vmem:[#allocation49_spill] sm:$0xff] %v5917_v48  ;;  %v2695_v61 = vsub.f32 %v2567_v29, %v2663_v50  ;;  %v5919_v36 = vpop.xlane.xlu1 %2868  ;;  %v1344_v48 = vld [vmem:[#allocation2 + $0x258] sm:$0xff] }
 0x21d   :  { %4080 = vtanh.f32 %v2377_v22  ;;  %v3434_v17 = vsel %vm1116_vm0, %v3410_v63, 0.0  ;;  %3871 = vmatmul.msk.f32.gmra.mxu3 %vm1116_vm0, %v1415_v38  ;;  %7170 = vst [vmem:[#allocation50_spill] sm:$0xff] %v5919_v36  ;;  %v2600_v63 = vmul.f32 2.0, %v5904_v24  ;;  %v5934_v38 = vpop.xlane.xlu2 %2862 }
 0x21e   :  { %3435 = vadd.xlane.f32.xlu2 %v3434_v17  ;;  %v2472_v33 = vsub.f32 1.0, %v2440_v40  ;;  %v5932_v47 = vmul.f32 0.003183099, %v2695_v61  ;;  %7174 = vst [vmem:[#allocation54_spill] sm:$0xff] %v5934_v38  ;;  %v2841_v40 = vmul.f32 %v5656_v16, %v5847_v0 }
 0x21f   :  { %v5921_v52 = vpop.f32.mrf.mxu2  ;;  %v1969_v3 = vpop.f32.mrf.mxu0 }
 0x220   :  { %v5924_v22 = vmul.f32 %v2472_v33, %v5817_v11  ;;  %v5928_v57 = vmul.f32 %v2472_v33, %v5732_v35  ;;  %v5930_v54 = vpop.f32.mrf.mxu1  ;;  %7173 = vst [vmem:[#allocation53_spill] sm:$0xff] %v5932_v47  ;;  %v2378_v35 = vadd.f32 %v5648_v49, %v1969_v3  ;;  %v2568_v0 = vmul.f32 %v2472_v33, %v5617_v26 }
 0x221   :  { %v2284_v46 = vpop.f32.mrf.mxu3 }
 0x222   :  { %7171 = vst [vmem:[#allocation51_spill] sm:$0xff] %v5924_v22  ;;  %v4079_v17 = vpop.eup %4078  ;;  %v2707_v29 = vadd.f32 %v5648_v49, %v2284_v46  ;;  %v2632_v50 = vmul.f32 %v2600_v63, %v5924_v22  ;;  %v1380_v46 = vld [vmem:[#allocation2 + $0x378] sm:$0xff]  ;;  %v2417_v22 = vmul.f32 %v5247_v27, %v5247_v27 }
 0x223   :  { %7172 = vst [vmem:[#allocation52_spill] sm:$0xff] %v5928_v57  ;;  %v5940_v36 = vpop.eup %4080  ;;  %v3411_v39 = vmul.f32 %v5656_v16, %v4079_v17  ;;  %3800 = vmatmul.msk.f32.gmra.mxu1 %vm1116_vm0, %v1344_v48  ;;  %v1416_v63 = vld [vmem:[#allocation2 + $0x498] sm:$0xff]  ;;  %v5955_v61 = vpop.xlane.xlu0 %2865 }
 0x224   :  { %4082 = vtanh.f32 %v2707_v29  ;;  %v2664_v38 = vmul.f32 %v2632_v50, %v5817_v11  ;;  %3836 = vmatmul.msk.f32.gmra.mxu2 %vm1116_vm0, %v1380_v46  ;;  %v2441_v17 = vmul.f32 %v5940_v36, %v5940_v36  ;;  %v2915_v29 = vsel %vm1116_vm0, %v2841_v40, 0.0  ;;  %7175 = vst [vmem:[#allocation55_spill] sm:$0xff] %v5955_v61  ;;  %v5957_v26 = vpop.xlane.xlu1 %2877 }
 0x225   :  { %4084 = vtanh.f32 %v2378_v35  ;;  %v3437_v3 = vsel %vm1116_vm0, %v3411_v39, 0.0  ;;  %3872 = vmatmul.msk.f32.gmra.mxu3 %vm1116_vm0, %v1416_v63  ;;  %v2601_v63 = vmul.f32 2.0, %v5940_v36 }
 0x226   :  { %3438 = vadd.xlane.f32.xlu0 %v3437_v3  ;;  %v2696_v48 = vsub.f32 %v2568_v0, %v2664_v38  ;;  %2916 = vadd.xlane.f32.xlu2 %v2915_v29  ;;  %v2473_v11 = vsub.f32 1.0, %v2441_v17  ;;  %v2872_v0 = vpop.xlane.xlu2 %2871  ;;  %v1417_v29 = vld [vmem:[#allocation2 + $0x4a0] sm:$0xff] }
 0x227   :  { %v5959_v33 = vpop.f32.mrf.mxu2  ;;  %v1972_v17 = vpop.f32.mrf.mxu0 }
 0x228   :  { %v5961_v50 = vmul.f32 0.003183099, %v2696_v48  ;;  %v5963_v39 = vpop.f32.mrf.mxu1  ;;  %v5966_v46 = vmul.f32 %v2473_v11, %v5840_v41  ;;  %v5970_v38 = vmul.f32 %v2473_v11, %v5759_v20  ;;  %v2379_v61 = vadd.f32 %v5648_v49, %v1972_v17 }
 0x229   :  { %v2287_v35 = vpop.f32.mrf.mxu3  ;;  %v2569_v57 = vmul.f32 %v2473_v11, %v5651_v18 }
 0x22a   :  { %7176 = vst [vmem:[#allocation56_spill] sm:$0xff] %v5961_v50  ;;  %v4083_v40 = vpop.eup %4082  ;;  %v2708_v3 = vadd.f32 %v5648_v49, %v2287_v35  ;;  %v2633_v20 = vmul.f32 %v2601_v63, %v5966_v46  ;;  %v5991_v63 = vsub.f32 1.0, %v2417_v22 }
 0x22b   :  { %7177 = vst [vmem:[#allocation57_spill] sm:$0xff] %v5966_v46  ;;  %v5975_v48 = vpop.eup %4084  ;;  %v3412_v47 = vmul.f32 %v5656_v16, %v4083_v40  ;;  %v5989_v25 = vpop.xlane.xlu0 %2874 }
 0x22c   :  { %7178 = vst [vmem:[#allocation58_spill] sm:$0xff] %v5970_v38  ;;  %4086 = vtanh.f32 %v2708_v3  ;;  %v2442_v35 = vmul.f32 %v5975_v48, %v5975_v48  ;;  %3837 = vmatmul.msk.f32.gmra.mxu2 %vm1116_vm0, %v1381_v56  ;;  %v2665_v17 = vmul.f32 %v2633_v20, %v5840_v41 }
 0x22d   :  { %4088 = vtanh.f32 %v2379_v61  ;;  %v3440_v50 = vsel %vm1116_vm0, %v3412_v47, 0.0  ;;  %3873 = vmatmul.msk.f32.gmra.mxu3 %vm1116_vm0, %v1417_v29  ;;  %v2602_v47 = vmul.f32 2.0, %v5975_v48 }
 0x22e   :  { %v2474_v40 = vsub.f32 1.0, %v2442_v35  ;;  %3441 = vadd.xlane.f32.xlu2 %v3440_v50  ;;  %v2697_v3 = vsub.f32 %v2569_v57, %v2665_v17  ;;  %v6009_v50 = vpop.xlane.xlu2 %2880 }
 0x22f   :  { %v2182_v46 = vpop.f32.mrf.mxu2  ;;  %v5993_v61 = vpop.xlane.xlu1 %2886 }
 0x230   :  { %v5996_v56 = vmul.f32 %v2474_v40, %v5868_v10  ;;  %v6000_v41 = vmul.f32 %v2474_v40, %v5784_v62  ;;  %v6003_v18 = vmul.f32 %v5991_v63, %v2182_v46  ;;  %v6005_v11 = vpop.f32.mrf.mxu1  ;;  %v6007_v29 = vmul.f32 0.003183099, %v2697_v3  ;;  %v1975_v35 = vpop.f32.mrf.mxu0 }
 0x231   :  { %v2290_v22 = vpop.f32.mrf.mxu3  ;;  %v2380_v62 = vadd.f32 %v5648_v49, %v1975_v35  ;;  %v2418_v46 = vmul.f32 %v5284_v19, %v5284_v19  ;;  %v2957_v3 = vadd.f32 %v6023_v51, %v2872_v0 }
 0x232   :  { %7179 = vst [vmem:[#allocation59_spill] sm:$0xff] %v5996_v56  ;;  %v4087_v57 = vpop.eup %4086  ;;  %v2709_v20 = vadd.f32 %v5648_v49, %v2290_v22  ;;  %v2634_v17 = vmul.f32 %v2602_v47, %v5996_v56  ;;  %v2570_v22 = vmul.f32 %v2474_v40, %v5682_v59  ;;  %v1418_v47 = vld [vmem:[#allocation2 + $0x4a8] sm:$0xff] }
 0x233   :  { %7180 = vst [vmem:[#allocation60_spill] sm:$0xff] %v6000_v41  ;;  %v6013_v13 = vpop.eup %4088  ;;  %v3413_v4 = vmul.f32 %v5656_v16, %v4087_v57  ;;  %v6033_v59 = vsub.f32 1.0, %v2418_v46 }
 0x234   :  { %7181 = vst [vmem:[#allocation61_spill] sm:$0xff] %v6007_v29  ;;  %4090 = vtanh.f32 %v2709_v20  ;;  %v2666_v53 = vmul.f32 %v2634_v17, %v5868_v10  ;;  %3838 = vmatmul.msk.f32.gmra.mxu2 %vm1116_vm0, %v1382_v12  ;;  %v2443_v57 = vmul.f32 %v6013_v13, %v6013_v13  ;;  %v6031_v10 = vpop.xlane.xlu0 %2883 }
 0x235   :  { %4092 = vtanh.f32 %v2380_v62  ;;  %v3443_v35 = vsel %vm1116_vm0, %v3413_v4, 0.0  ;;  %3874 = vmatmul.msk.f32.gmra.mxu3 %vm1116_vm0, %v1418_v47  ;;  %v2603_v4 = vmul.f32 2.0, %v6013_v13 }
 0x236   :  { %3444 = vadd.xlane.f32.xlu1 %v3443_v35  ;;  %v2698_v20 = vsub.f32 %v2570_v22, %v2666_v53  ;;  %v2475_v40 = vsub.f32 1.0, %v2443_v57 }
 0x237   :  { %v2185_v17 = vpop.f32.mrf.mxu2  ;;  %v3035_v62 = vpop.xlane.xlu1 %3034 }
 0x238   :  { %v6035_v12 = vmul.f32 0.003183099, %v2698_v20  ;;  %v6039_v56 = vmul.f32 %v6033_v59, %v2185_v17  ;;  %v6041_v29 = vpop.f32.mrf.mxu1  ;;  %v6043_v53 = vmul.f32 %v3035_v62, %v2957_v3  ;;  %v6046_v0 = vmul.f32 %v2475_v40, %v5892_v1  ;;  %v6052_v57 = vpop.xlane.xlu2 %2889 }
 0x239   :  { %v2293_v47 = vpop.f32.mrf.mxu3  ;;  %v6049_v46 = vmul.f32 %v2475_v40, %v5812_v37  ;;  %v1978_v20 = vpop.f32.mrf.mxu0  ;;  %v2419_v62 = vmul.f32 %v5325_v34, %v5325_v34 }
 0x23a   :  { %7182 = vst [vmem:[#allocation62_spill] sm:$0xff] %v6035_v12  ;;  %v4091_v22 = vpop.eup %4090  ;;  %v2710_v35 = vadd.f32 %v5648_v49, %v2293_v47  ;;  %v2381_v3 = vadd.f32 %v5648_v49, %v1978_v20  ;;  %v2635_v37 = vmul.f32 %v2603_v4, %v6046_v0  ;;  %v2571_v47 = vmul.f32 %v2475_v40, %v5709_v55 }
 0x23b   :  { %7183 = vst [vmem:[#allocation63_spill] sm:$0xff] %v6043_v53  ;;  %v6056_v38 = vpop.eup %4092  ;;  %v3414_v53 = vmul.f32 %v5656_v16, %v4091_v22  ;;  %v6069_v20 = vsub.f32 1.0, %v2419_v62  ;;  %v2420_v55 = vmul.f32 %v5340_v21, %v5340_v21  ;;  %v2958_v40 = vadd.f32 %v6023_v51, %v5989_v25 }
 0x23c   :  { %7184 = vst [vmem:[#allocation64_spill] sm:$0xff] %v6046_v0  ;;  %4094 = vtanh.f32 %v2710_v35  ;;  %v2667_v17 = vmul.f32 %v2635_v37, %v5892_v1  ;;  %v2444_v12 = vmul.f32 %v6056_v38, %v6056_v38  ;;  %v2604_v25 = vmul.f32 2.0, %v6056_v38 }
 0x23d   :  { %4096 = vtanh.f32 %v2381_v3  ;;  %v3446_v7 = vsel %vm1116_vm0, %v3414_v53, 0.0  ;;  %3875 = vmatmul.msk.f32.gmra.mxu3 %vm1116_vm0, %v1419_v43 }
 0x23e   :  { %3447 = vadd.xlane.f32.xlu0 %v3446_v7  ;;  %v2699_v22 = vsub.f32 %v2571_v47, %v2667_v17  ;;  %v2476_v41 = vsub.f32 1.0, %v2444_v12  ;;  %v2842_v47 = vmul.f32 %v5656_v16, %v5874_v8  ;;  %v1420_v8 = vld [vmem:[#allocation2 + $0x4b8] sm:$0xff] }
 0x23f   :  { %v2188_v4 = vpop.f32.mrf.mxu2  ;;  %v6071_v35 = vpop.xlane.xlu0 %2892 }
 0x240   :  { %v6078_v1 = vmul.f32 %v6069_v20, %v2188_v4  ;;  %v6080_v53 = vpop.f32.mrf.mxu1  ;;  %v6082_v7 = vmul.f32 0.003183099, %v2699_v22  ;;  %v6085_v17 = vmul.f32 %v2476_v41, %v5930_v54  ;;  %v3038_v62 = vpop.xlane.xlu2 %3037  ;;  %v6092_v4 = vmul.f32 %v2476_v41, %v5832_v6 }
 0x241   :  { %v2296_v43 = vpop.f32.mrf.mxu3  ;;  %v1981_v37 = vpop.f32.mrf.mxu0  ;;  %v6096_v22 = vmul.f32 %v3038_v62, %v2958_v40  ;;  %v2918_v40 = vsel %vm1116_vm0, %v2842_v47, 0.0  ;;  %v2572_v62 = vmul.f32 %v2476_v41, %v5739_v9 }
 0x242   :  { %7185 = vst [vmem:[#allocation65_spill] sm:$0xff] %v6078_v1  ;;  %v4095_v12 = vpop.eup %4094  ;;  %v2711_v3 = vadd.f32 %v5648_v49, %v2296_v43  ;;  %v2382_v21 = vadd.f32 %v5648_v49, %v1981_v37  ;;  %v2636_v44 = vmul.f32 %v2604_v25, %v6085_v17  ;;  %v6112_v37 = vsub.f32 1.0, %v2420_v55 }
 0x243   :  { %7186 = vst [vmem:[#allocation66_spill] sm:$0xff] %v6082_v7  ;;  %v6094_v0 = vpop.eup %4096  ;;  %v3415_v30 = vmul.f32 %v5656_v16, %v4095_v12  ;;  %v2844_v43 = vmul.f32 %v5656_v16, %v5940_v36 }
 0x244   :  { %7187 = vst [vmem:[#allocation67_spill] sm:$0xff] %v6085_v17  ;;  %4098 = vtanh.f32 %v2711_v3  ;;  %v2445_v6 = vmul.f32 %v6094_v0, %v6094_v0  ;;  %v2668_v12 = vmul.f32 %v2636_v44, %v5930_v54  ;;  %v2959_v3 = vadd.f32 %v6023_v51, %v5957_v26 }
 0x245   :  { %7188 = vst [vmem:[#allocation68_spill] sm:$0xff] %v6092_v4  ;;  %4100 = vtanh.f32 %v2382_v21  ;;  %v3449_v1 = vsel %vm1116_vm0, %v3415_v30, 0.0  ;;  %3876 = vmatmul.msk.f32.gmra.mxu3 %vm1116_vm0, %v1420_v8 }
 0x246   :  { %7189 = vst [vmem:[#allocation69_spill] sm:$0xff] %v6096_v22  ;;  %3450 = vadd.xlane.f32.xlu2 %v3449_v1  ;;  %2919 = vadd.xlane.f32.xlu0 %v2918_v40  ;;  %v2477_v21 = vsub.f32 1.0, %v2445_v6  ;;  %v2700_v8 = vsub.f32 %v2572_v62, %v2668_v12  ;;  %v2605_v1 = vmul.f32 2.0, %v6094_v0 }
 0x247   :  { %v2191_v30 = vpop.f32.mrf.mxu2  ;;  %v3041_v25 = vpop.xlane.xlu0 %3040 }
 0x248   :  { %v6118_v47 = vmul.f32 %v6112_v37, %v2191_v30  ;;  %v6120_v44 = vpop.f32.mrf.mxu1  ;;  %v6122_v54 = vmul.f32 %v3041_v25, %v2959_v3  ;;  %v6125_v26 = vmul.f32 %v2477_v21, %v5963_v39  ;;  %v6128_v41 = vmul.f32 %v2477_v21, %v5857_v28  ;;  %v6131_v6 = vpop.xlane.xlu1 %2895 }
 0x249   :  { %v2299_v9 = vpop.f32.mrf.mxu3  ;;  %v1984_v40 = vpop.f32.mrf.mxu0  ;;  %v6133_v12 = vmul.f32 0.003183099, %v2700_v8  ;;  %v2421_v3 = vmul.f32 %v5365_v23, %v5365_v23  ;;  %v2573_v8 = vmul.f32 %v2477_v21, %v5764_v45  ;;  %v2960_v45 = vadd.f32 %v6023_v51, %v6009_v50 }
 0x24a   :  { %7190 = vst [vmem:[#allocation70_spill] sm:$0xff] %v6122_v54  ;;  %v4099_v55 = vpop.eup %4098  ;;  %v2712_v36 = vadd.f32 %v5648_v49, %v2299_v9  ;;  %v2383_v30 = vadd.f32 %v5648_v49, %v1984_v40  ;;  %v2637_v28 = vmul.f32 %v2605_v1, %v6125_v26  ;;  %v2924_v54 = vsel %vm1116_vm0, %v2844_v43, 0.0 }
 0x24b   :  { %7191 = vst [vmem:[#allocation71_spill] sm:$0xff] %v6125_v26  ;;  %v6135_v62 = vpop.eup %4100  ;;  %v3416_v25 = vmul.f32 %v5656_v16, %v4099_v55  ;;  %v2962_v1 = vadd.f32 %v6023_v51, %v5993_v61  ;;  %v6152_v55 = vsub.f32 1.0, %v2421_v3 }
 0x24c   :  { %7192 = vst [vmem:[#allocation72_spill] sm:$0xff] %v6128_v41  ;;  %4102 = vtanh.f32 %v2712_v36  ;;  %v2669_v40 = vmul.f32 %v2637_v28, %v5963_v39  ;;  %v2446_v17 = vmul.f32 %v6135_v62, %v6135_v62  ;;  %v2843_v39 = vmul.f32 %v5656_v16, %v5904_v24 }
 0x24d   :  { %7193 = vst [vmem:[#allocation73_spill] sm:$0xff] %v6133_v12  ;;  %4104 = vtanh.f32 %v2383_v30  ;;  %v3452_v22 = vsel %vm1116_vm0, %v3416_v25, 0.0  ;;  %v2606_v24 = vmul.f32 2.0, %v6135_v62 }
 0x24e   :  { %3453 = vadd.xlane.f32.xlu1 %v3452_v22  ;;  %2925 = vadd.xlane.f32.xlu2 %v2924_v54  ;;  %v2701_v43 = vsub.f32 %v2573_v8, %v2669_v40  ;;  %v2478_v36 = vsub.f32 1.0, %v2446_v17 }
 0x24f   :  { %v2194_v21 = vpop.f32.mrf.mxu2  ;;  %v3050_v30 = vpop.xlane.xlu0 %3049 }
 0x250   :  { %v6159_v25 = vmul.f32 %v6152_v55, %v2194_v21  ;;  %v6161_v22 = vpop.f32.mrf.mxu1  ;;  %v6163_v28 = vmul.f32 %v3050_v30, %v2962_v1  ;;  %v6165_v61 = vmul.f32 0.003183099, %v2701_v43  ;;  %v6168_v17 = vmul.f32 %v2478_v36, %v6005_v11  ;;  %v3044_v8 = vpop.xlane.xlu1 %3043 }
 0x251   :  { %v2302_v54 = vpop.f32.mrf.mxu3  ;;  %v6171_v40 = vpop.xlane.xlu2 %2898  ;;  %v6175_v21 = vmul.f32 %v2478_v36, %v5888_v58  ;;  %v6179_v1 = vmul.f32 %v3044_v8, %v2960_v45  ;;  %v2422_v30 = vmul.f32 %v5391_v14, %v5391_v14 }
 0x252   :  { %7194 = vst [vmem:[#allocation74_spill] sm:$0xff] %v6163_v28  ;;  %v4103_v3 = vpop.eup %4102  ;;  %v2713_v50 = vadd.f32 %v5648_v49, %v2302_v54  ;;  %v1987_v43 = vpop.f32.mrf.mxu0  ;;  %v6189_v54 = vld [vmem:[%s7070_s7] ss:$0 sm:$0xff]  ;;  %v2638_v45 = vmul.f32 %v2606_v24, %v6168_v17 }
 0x253   :  { %7195 = vst [vmem:[#allocation75_spill] sm:$0xff] %v6165_v61  ;;  %v6177_v9 = vpop.eup %4104  ;;  %v3417_v28 = vmul.f32 %v5656_v16, %v4103_v3  ;;  %v2384_v58 = vadd.f32 %v6189_v54, %v1987_v43  ;;  %v6199_v49 = vsub.f32 1.0, %v2422_v30  ;;  %v2577_v43 = vmul.f32 2.0, %v5247_v27 }
 0x254   :  { %7196 = vst [vmem:[#allocation76_spill] sm:$0xff] %v6168_v17  ;;  %4106 = vtanh.f32 %v2713_v50  ;;  %v2447_v16 = vmul.f32 %v6177_v9, %v6177_v9  ;;  %v2670_v3 = vmul.f32 %v2638_v45, %v6005_v11  ;;  %v2574_v50 = vmul.f32 %v2478_v36, %v5788_v2  ;;  %v6211_v11 = vld [vmem:[%s7071_s8] ss:$0 sm:$0xff] }
 0x255   :  { %7197 = vst [vmem:[#allocation77_spill] sm:$0xff] %v6179_v1  ;;  %v3455_v8 = vsel %vm1116_vm0, %v3417_v28, 0.0  ;;  %v2921_v1 = vsel %vm1116_vm0, %v2843_v39, 0.0  ;;  %4108 = vtanh.f32 %v2384_v58  ;;  %v2961_v28 = vadd.f32 %v6023_v51, %v6031_v10 }
 0x256   :  { %3456 = vadd.xlane.f32.xlu0 %v3455_v8  ;;  %2922 = vadd.xlane.f32.xlu1 %v2921_v1  ;;  %v2479_v61 = vsub.f32 1.0, %v2447_v16  ;;  %v2963_v39 = vadd.f32 %v6023_v51, %v6052_v57  ;;  %v3002_v2 = vmul.f32 %v6211_v11, %v5805_v15  ;;  %v2702_v36 = vsub.f32 %v2574_v50, %v2670_v3 }
 0x257   :  { %v2197_v24 = vpop.f32.mrf.mxu2  ;;  %v6206_v17 = vpop.xlane.xlu0 %2901  ;;  %v2607_v57 = vmul.f32 2.0, %v6177_v9  ;;  %v2845_v50 = vmul.f32 %v6211_v11, %v5975_v48 }
 0x258   :  { %v6216_v27 = vmul.f32 %v6199_v49, %v2197_v24  ;;  %v2092_v1 = vpop.f32.mrf.mxu1  ;;  %v6219_v30 = vmul.f32 %v2479_v61, %v6041_v29  ;;  %v6223_v58 = vmul.f32 %v2479_v61, %v5921_v52  ;;  %v3053_v16 = vpop.xlane.xlu1 %3052  ;;  %v6231_v24 = vmul.f32 0.003183099, %v2702_v36 }
 0x259   :  { %v2305_v10 = vpop.f32.mrf.mxu3  ;;  %v6226_v8 = vmul.f32 %v6069_v20, %v2092_v1  ;;  %v3047_v3 = vpop.xlane.xlu2 %3046  ;;  %v6233_v41 = vmul.f32 %v3053_v16, %v2963_v39  ;;  %v3072_v7 = vsel %vm1116_vm0, %v3002_v2, 0.0  ;;  %v2575_v36 = vmul.f32 %v2479_v61, %v5819_v60 }
 0x25a   :  { %v4107_v45 = vpop.eup %4106  ;;  %v2714_v15 = vadd.f32 %v6189_v54, %v2305_v10  ;;  %v6235_v26 = vmul.f32 %v3047_v3, %v2961_v28  ;;  %v1990_v12 = vpop.f32.mrf.mxu0  ;;  %v2639_v4 = vmul.f32 %v2607_v57, %v6219_v30  ;;  %v2965_v2 = vadd.f32 %v6023_v51, %v6131_v6 }
 0x25b   :  { %v3418_v52 = vmul.f32 %v6211_v11, %v4107_v45  ;;  %v6239_v1 = vpop.eup %4108  ;;  %v6242_v10 = vmul.f32 %v5991_v63, %v1990_v12  ;;  %v7198_v60 = vsub.f32 %v5782_v32, %v5807_v31 }
 0x25c   :  { %4110 = vtanh.f32 %v2714_v15  ;;  %v2671_v28 = vmul.f32 %v2639_v4, %v6041_v29  ;;  %v2448_v57 = vmul.f32 %v6239_v1, %v6239_v1  ;;  %v2927_v15 = vsel %vm1116_vm0, %v2845_v50, 0.0 }
 0x25d   :  { %v3458_v39 = vsel %vm1116_vm0, %v3418_v52, 0.0  ;;  %v2609_v45 = vmul.f32 %v2577_v43, %v6242_v10  ;;  %v3129_v4 = vmul.f32 %v6211_v11, %v7198_v60 }
 0x25e   :  { %3073 = vadd.xlane.f32.xlu1 %v3072_v7  ;;  %3459 = vadd.xlane.f32.xlu2 %v3458_v39  ;;  %v2703_v16 = vsub.f32 %v2575_v36, %v2671_v28  ;;  %v2480_v3 = vsub.f32 1.0, %v2448_v57  ;;  %v2964_v7 = vadd.f32 %v6023_v51, %v6071_v35  ;;  %v2578_v57 = vmul.f32 2.0, %v5284_v19 }
 0x25f   :  { %2928 = vadd.xlane.f32.xlu0 %v2927_v15  ;;  %v2641_v52 = vmul.f32 %v2609_v45, %v1990_v12  ;;  %v6256_v48 = vpop.f32.mrf.mxu2  ;;  %v3059_v29 = vpop.xlane.xlu0 %3058  ;;  %v6281_v45 = vmul.f32 %v5991_v63, %v6120_v44  ;;  %v3197_v63 = vsel %vm1116_vm0, %v3129_v4, 0.0  ;;  %v2966_v4 = vadd.f32 %v6023_v51, %v6171_v40 }
 0x260   :  { %v6264_v61 = vpop.f32.mrf.mxu1  ;;  %v6266_v50 = vmul.f32 %v3059_v29, %v2965_v2  ;;  %v6268_v6 = vmul.f32 0.003183099, %v2703_v16  ;;  %v6271_v12 = vmul.f32 %v2480_v3, %v6080_v53  ;;  %v2905_v36 = vpop.xlane.xlu1 %2904  ;;  %v6277_v35 = vmul.f32 %v2480_v3, %v5959_v33 }
 0x261   :  { %v2308_v43 = vpop.f32.mrf.mxu3  ;;  %v2673_v28 = vsub.f32 %v6003_v18, %v2641_v52  ;;  %v3056_v31 = vpop.xlane.xlu2 %3055  ;;  %v2608_v18 = vmul.f32 2.0, %v6239_v1  ;;  %v2847_v40 = vmul.f32 %v6211_v11, %v6056_v38 }
 0x262   :  { %v4111_v39 = vpop.eup %4110  ;;  %v2715_v32 = vadd.f32 %v6189_v54, %v2308_v43  ;;  %v6283_v15 = vmul.f32 %v3056_v31, %v2964_v7  ;;  %v1993_v2 = vpop.f32.mrf.mxu0  ;;  %v2968_v43 = vadd.f32 %v6023_v51, %v2905_v36 }
 0x263   :  { %v3419_v16 = vmul.f32 %v6211_v11, %v4111_v39  ;;  %v6287_v52 = vmul.f32 0.003183099, %v2673_v28  ;;  %v6290_v29 = vmul.f32 %v6033_v59, %v1993_v2  ;;  %v2640_v44 = vmul.f32 %v2608_v18, %v6271_v12 }
 0x264   :  { %4112 = vtanh.f32 %v2715_v32  ;;  %v2576_v28 = vmul.f32 %v2480_v3, %v5842_v42 }
 0x265   :  { %v3461_v33 = vsel %vm1116_vm0, %v3419_v16, 0.0  ;;  %v2610_v60 = vmul.f32 %v2578_v57, %v6290_v29  ;;  %v2672_v39 = vmul.f32 %v2640_v44, %v6080_v53 }
 0x266   :  { %3462 = vadd.xlane.f32.xlu1 %v3461_v33  ;;  %3198 = vadd.xlane.f32.xlu2 %v3197_v63  ;;  %v2846_v63 = vmul.f32 %v6211_v11, %v6013_v13 }
 0x267   :  { %v2642_v32 = vmul.f32 %v2610_v60, %v1993_v2  ;;  %v6303_v31 = vpop.f32.mrf.mxu2  ;;  %v3068_v16 = vpop.xlane.xlu0 %3067  ;;  %v2704_v19 = vsub.f32 %v2576_v28, %v2672_v39  ;;  %v6320_v60 = vmul.f32 %v6033_v59, %v6161_v22  ;;  %v2579_v39 = vmul.f32 2.0, %v5325_v34 }
 0x268   :  { %v2098_v18 = vpop.f32.mrf.mxu1  ;;  %v6307_v33 = vmul.f32 %v3068_v16, %v2968_v43  ;;  %v3062_v2 = vpop.xlane.xlu1 %3061  ;;  %v2930_v59 = vsel %vm1116_vm0, %v2846_v63, 0.0  ;;  %v2933_v34 = vsel %vm1116_vm0, %v2847_v40, 0.0  ;;  %v7200_v40 = vld [vmem:[#allocation65_spill] sm:$0xff] }
 0x269   :  { %v2311_v57 = vpop.f32.mrf.mxu3  ;;  %v2674_v53 = vsub.f32 %v6039_v56, %v2642_v32  ;;  %v6313_v42 = vmul.f32 %v6152_v55, %v2098_v18  ;;  %v2908_v44 = vpop.xlane.xlu2 %2907  ;;  %v6322_v43 = vmul.f32 %v3062_v2, %v2966_v4  ;;  %v6331_v16 = vmul.f32 0.003183099, %v2704_v19 }
 0x26a   :  { %7199 = vst [vmem:[#allocation78_spill] sm:$0xff] %v6307_v33  ;;  %v4113_v36 = vpop.eup %4112  ;;  %v2716_v3 = vadd.f32 %v6189_v54, %v2311_v57  ;;  %v1996_v13 = vpop.f32.mrf.mxu0  ;;  %v2967_v57 = vadd.f32 %v6023_v51, %v6206_v17  ;;  %v2969_v63 = vadd.f32 %v6023_v51, %v2908_v44 }
 0x26b   :  { %v3420_v56 = vmul.f32 %v6211_v11, %v4113_v36  ;;  %v6326_v28 = vmul.f32 0.003183099, %v2674_v53  ;;  %v6329_v32 = vmul.f32 %v6069_v20, %v1996_v13 }
 0x26c   :  { %4114 = vtanh.f32 %v2716_v3  ;;  %v3003_v3 = vmul.f32 %v6211_v11, %v5835_v5 }
 0x26d   :  { %v3464_v38 = vsel %vm1116_vm0, %v3420_v56, 0.0  ;;  %v2611_v22 = vmul.f32 %v2579_v39, %v6329_v32 }
 0x26e   :  { %3465 = vadd.xlane.f32.xlu0 %v3464_v38  ;;  %2931 = vadd.xlane.f32.xlu1 %v2930_v59  ;;  %v7201_v59 = vld [vmem:[#allocation38_spill] sm:$0xff] }
 0x26f   :  { %2934 = vadd.xlane.f32.xlu2 %v2933_v34  ;;  %v2643_v18 = vmul.f32 %v2611_v22, %v1996_v13  ;;  %v6341_v19 = vpop.f32.mrf.mxu2  ;;  %v7202_v22 = vld [vmem:[#allocation39_spill] sm:$0xff] }
 0x270   :  { %v2101_v36 = vpop.f32.mrf.mxu1  ;;  %v3071_v13 = vpop.xlane.xlu1 %3070  ;;  %v7203_v34 = vsub.f32 %v7201_v59, %v7202_v22  ;;  %v3075_v22 = vsel %vm1116_vm0, %v3003_v3, 0.0  ;;  %v2848_v3 = vmul.f32 %v6211_v11, %v6094_v0 }
 0x271   :  { %v2314_v53 = vpop.f32.mrf.mxu3  ;;  %v2675_v39 = vsub.f32 %v7200_v40, %v2643_v18  ;;  %v6350_v56 = vmul.f32 %v6199_v49, %v2101_v36  ;;  %v3065_v38 = vpop.xlane.xlu2 %3064  ;;  %v6358_v44 = vmul.f32 %v3071_v13, %v2969_v63  ;;  %v7204_v40 = vld [vmem:[#allocation7_spill] sm:$0xff] }
 0x272   :  { %v4115_v2 = vpop.eup %4114  ;;  %v3130_v17 = vmul.f32 %v6211_v11, %v7203_v34  ;;  %v6356_v20 = vmul.f32 %v3065_v38, %v2967_v57  ;;  %v1999_v4 = vpop.f32.mrf.mxu0  ;;  %v2717_v18 = vadd.f32 %v6189_v54, %v2314_v53  ;;  %v2580_v33 = vmul.f32 2.0, %v7204_v40  ;;  %v7205_v38 = vld [vmem:[#allocation41_spill] sm:$0xff] }
 0x273   :  { %v3421_v5 = vmul.f32 %v6211_v11, %v4115_v2  ;;  %v6361_v7 = vmul.f32 0.003183099, %v2675_v39  ;;  %v6365_v36 = vmul.f32 %v6112_v37, %v1999_v4  ;;  %v3004_v13 = vmul.f32 %v6211_v11, %v7205_v38 }
 0x274   :  { %v3200_v63 = vsel %vm1116_vm0, %v3130_v17, 0.0  ;;  %4116 = vtanh.f32 %v2717_v18  ;;  %v2850_v34 = vmul.f32 %v6211_v11, %v6177_v9  ;;  %v2581_v18 = vmul.f32 2.0, %v5365_v23 }
 0x275   :  { %v3467_v59 = vsel %vm1116_vm0, %v3421_v5, 0.0  ;;  %v2612_v57 = vmul.f32 %v2580_v33, %v6365_v36  ;;  %v2787_v2 = vsub.f32 %v6226_v8, %v6361_v7  ;;  %v7206_v5 = vld [vmem:[#allocation9_spill] sm:$0xff]  ;;  %v2936_v9 = vsel %vm1116_vm0, %v2848_v3, 0.0 }
 0x276   :  { %3468 = vadd.xlane.f32.xlu0 %v3467_v59  ;;  %3076 = vadd.xlane.f32.xlu1 %v3075_v22  ;;  %v2551_v40 = vmul.f32 %v7206_v5, %v6256_v48  ;;  %v6393_v22 = vmul.f32 %v6112_v37, %v6264_v61  ;;  %v2942_v48 = vsel %vm1116_vm0, %v2850_v34, 0.0  ;;  %v2984_v34 = vmul.f32 %v6211_v11, %v6290_v29 }
 0x277   :  { %3201 = vadd.xlane.f32.xlu2 %v3200_v63  ;;  %v2644_v53 = vmul.f32 %v2612_v57, %v1999_v4  ;;  %v6374_v39 = vpop.f32.mrf.mxu2 }
 0x278   :  { %v2104_v0 = vpop.f32.mrf.mxu1 }
 0x279   :  { %v2676_v33 = vsub.f32 %v6118_v47, %v2644_v53  ;;  %v3078_v47 = vsel %vm1116_vm0, %v3004_v13, 0.0  ;;  %v2849_v13 = vmul.f32 %v6211_v11, %v6135_v62  ;;  %v2519_v3 = vmul.f32 %v7206_v5, %v2104_v0 }
 0x27a   :  { %v2002_v17 = vpop.f32.mrf.mxu0  ;;  %v4117_v57 = vpop.eup %4116 }
 0x27b   :  { %v6385_v59 = vmul.f32 0.003183099, %v2676_v33  ;;  %v6388_v4 = vmul.f32 %v6152_v55, %v2002_v17  ;;  %v7207_v55 = vld [vmem:[#allocation11_spill] sm:$0xff]  ;;  %v3422_v38 = vmul.f32 %v6211_v11, %v4117_v57  ;;  %v2939_v62 = vsel %vm1116_vm0, %v2849_v13, 0.0 }
 0x27c   :  { %v2679_v53 = vsub.f32 %v2551_v40, %v7207_v55  ;;  %v2582_v40 = vmul.f32 2.0, %v5391_v14  ;;  %v2851_v14 = vmul.f32 %v6211_v11, %v6239_v1  ;;  %v2983_v55 = vmul.f32 %v6211_v11, %v6242_v10  ;;  %v7209_v10 = vld [vmem:[#allocation14_spill] sm:$0xff] }
 0x27d   :  { %v2613_v63 = vmul.f32 %v2581_v18, %v6388_v4  ;;  %v2788_v23 = vsub.f32 %v6393_v22, %v6385_v59  ;;  %v3470_v57 = vsel %vm1116_vm0, %v3422_v38, 0.0  ;;  %v7208_v38 = vld [vmem:[#allocation12_spill] sm:$0xff] }
 0x27e   :  { %3079 = vadd.xlane.f32.xlu1 %v3078_v47  ;;  %2937 = vadd.xlane.f32.xlu0 %v2936_v9  ;;  %v2759_v47 = vmul.f32 0.003183099, %v2679_v53  ;;  %v2552_v13 = vmul.f32 %v7208_v38, %v6303_v31 }
 0x27f   :  { %2943 = vadd.xlane.f32.xlu2 %v2942_v48  ;;  %v2645_v37 = vmul.f32 %v2613_v63, %v2002_v17  ;;  %v6402_v61 = vpop.f32.mrf.mxu2 }
 0x280   :  { %v2791_v63 = vsub.f32 %v2519_v3, %v2759_v47  ;;  %v2107_v29 = vpop.f32.mrf.mxu1 }
 0x281   :  { %v2677_v33 = vsub.f32 %v6159_v25, %v2645_v37  ;;  %v3018_v25 = vsel %vm1116_vm0, %v2984_v34, 0.0  ;;  %v3015_v34 = vsel %vm1116_vm0, %v2983_v55, 0.0 }
 0x282   :  { %v2005_v18 = vpop.f32.mrf.mxu0  ;;  %v3117_v37 = vmul.f32 %v6211_v11, %v2791_v63  ;;  %v2985_v63 = vmul.f32 %v6211_v11, %v6329_v32 }
 0x283   :  { %v6411_v9 = vmul.f32 0.003183099, %v2677_v33  ;;  %v6414_v17 = vmul.f32 %v6199_v49, %v2005_v18  ;;  %v2945_v33 = vsel %vm1116_vm0, %v2851_v14, 0.0 }
 0x284   :  { %v3161_v1 = vsel %vm1116_vm0, %v3117_v37, 0.0 }
 0x285   :  { %v2614_v5 = vmul.f32 %v2582_v40, %v6414_v17  ;;  %v2789_v0 = vsub.f32 %v6313_v42, %v6411_v9  ;;  %v2520_v40 = vmul.f32 %v7208_v38, %v2107_v29  ;;  %v3530_v29 = vld [vmem:[%s7065_s2] sm:$0xff]  ;;  %v3584_v42 = vld [vmem:[%s7066_s3 + $0x30] sm:$0xff] }
 0x286   :  { %3471 = vadd.xlane.f32.xlu0 %v3470_v57  ;;  %2940 = vadd.xlane.f32.xlu1 %v2939_v62  ;;  %v7210_v57 = vld [vmem:[#allocation26_spill] sm:$0xff] }
 0x287   :  { %3019 = vadd.xlane.f32.xlu2 %v3018_v25  ;;  %v2646_v49 = vmul.f32 %v2614_v5, %v2005_v18  ;;  %v6423_v48 = vpop.f32.mrf.mxu2  ;;  %v6445_v5 = vpop.xlane.xlu0 %2910 }
 0x288   :  { %v2110_v31 = vpop.f32.mrf.mxu1 }
 0x289   :  { %v2678_v53 = vsub.f32 %v6216_v27, %v2646_v49  ;;  %v2680_v27 = vsub.f32 %v2552_v13, %v7209_v10  ;;  %v7211_v49 = vsub.f32 %v6281_v45, %v6287_v52 }
 0x28b   :  { %v6433_v3 = vmul.f32 0.003183099, %v2678_v53  ;;  %v3111_v14 = vmul.f32 %v6211_v11, %v7211_v49  ;;  %v2760_v55 = vmul.f32 0.003183099, %v2680_v27  ;;  %v7212_v53 = vld [vmem:[#allocation27_spill] sm:$0xff] }
 0x28d   :  { %v2792_v38 = vsub.f32 %v2520_v40, %v2760_v55  ;;  %v3143_v45 = vsel %vm1116_vm0, %v3111_v14, 0.0  ;;  %v7215_v40 = vld [vmem:[#allocation15_spill] sm:$0xff]  ;;  %v2987_v14 = vmul.f32 %v6211_v11, %v6388_v4 }
 0x28e   :  { %2946 = vadd.xlane.f32.xlu0 %v2945_v33  ;;  %3016 = vadd.xlane.f32.xlu1 %v3015_v34  ;;  %v7213_v33 = vld [vmem:[#allocation8_spill] sm:$0xff]  ;;  %v2553_v55 = vmul.f32 %v7215_v40, %v6341_v19  ;;  %v3578_v19 = vld [vmem:[%s7066_s3] sm:$0xff] }
 0x28f   :  { %3162 = vadd.xlane.f32.xlu2 %v3161_v1  ;;  %v2218_v47 = vpop.f32.mrf.mxu2  ;;  %v2525_v32 = vmul.f32 %v7210_v57, %v7213_v33  ;;  %v3021_v1 = vsel %vm1116_vm0, %v2985_v63, 0.0  ;;  %v3118_v49 = vmul.f32 %v6211_v11, %v2792_v38 }
 0x290   :  { %v2557_v62 = vmul.f32 %v7210_v57, %v2218_v47  ;;  %v7214_v47 = vld [vmem:[#allocation28_spill] sm:$0xff]  ;;  %v3531_v57 = vld [vmem:[%s7065_s2 + $0x8] sm:$0xff] }
 0x291   :  { %v3436_v25 = vpop.xlane.xlu2 %3435  ;;  %v3164_v4 = vsel %vm1116_vm0, %v3118_v49, 0.0  ;;  %v2986_v49 = vmul.f32 %v6211_v11, %v6365_v36  ;;  %v3114_v36 = vmul.f32 %v6211_v11, %v2788_v23  ;;  %v3580_v23 = vld [vmem:[%s7066_s3 + $0x10] sm:$0xff] }
 0x292   :  { %v2685_v37 = vsub.f32 %v2557_v62, %v7212_v53  ;;  %v3506_v13 = vadd.f32 %v6023_v51, %v3436_v25 }
 0x294   :  { %v2765_v34 = vmul.f32 0.003183099, %v2685_v37  ;;  %v3554_v10 = vsub.f32 %v3506_v13, %v3530_v29  ;;  %v6472_v37 = vpop.f32.mrf.mxu1  ;;  %v7216_v29 = vld [vmem:[#allocation29_spill] sm:$0xff] }
 0x296   :  { %3022 = vadd.xlane.f32.xlu0 %v3021_v1  ;;  %v2797_v52 = vsub.f32 %v2525_v32, %v2765_v34  ;;  %v3602_v13 = vmul.f32 %v3554_v10, %v3554_v10  ;;  %v7217_v34 = vld [vmem:[#allocation10_spill] sm:$0xff] }
 0x297   :  { %3144 = vadd.xlane.f32.xlu2 %v3143_v45  ;;  %v2221_v27 = vpop.f32.mrf.mxu2  ;;  %v2526_v1 = vmul.f32 %v7214_v47, %v7217_v34 }
 0x298   :  { %v2558_v62 = vmul.f32 %v7214_v47, %v2221_v27  ;;  %v3123_v25 = vmul.f32 %v6211_v11, %v2797_v52  ;;  %v7218_v27 = vld [vmem:[#allocation17_spill] sm:$0xff]  ;;  %v2521_v47 = vmul.f32 %v7215_v40, %v2110_v31  ;;  %v3532_v31 = vld [vmem:[%s7065_s2 + $0x10] sm:$0xff] }
 0x299   :  { %v3439_v63 = vpop.xlane.xlu0 %3438  ;;  %v6468_v53 = vpop.xlane.xlu2 %2916  ;;  %v2681_v10 = vsub.f32 %v2553_v55, %v7218_v27  ;;  %v3024_v27 = vsel %vm1116_vm0, %v2986_v49, 0.0 }
 0x29a   :  { %v2686_v33 = vsub.f32 %v2558_v62, %v7216_v29  ;;  %v3507_v38 = vadd.f32 %v6023_v51, %v3439_v63  ;;  %v3179_v32 = vsel %vm1116_vm0, %v3123_v25, 0.0  ;;  %v3579_v62 = vld [vmem:[%s7066_s3 + $0x8] sm:$0xff]  ;;  %v3027_v63 = vsel %vm1116_vm0, %v2987_v14, 0.0 }
 0x29b   :  { %3180 = vadd.xlane.f32.xlu1 %v3179_v32  ;;  %v3626_v29 = vmul.f32 %v3602_v13, %v3578_v19  ;;  %v7220_v14 = vsub.f32 %v6320_v60, %v6326_v28  ;;  %v2761_v19 = vmul.f32 0.003183099, %v2681_v10 }
 0x29c   :  { %v2766_v45 = vmul.f32 0.003183099, %v2686_v33  ;;  %v3555_v52 = vsub.f32 %v3507_v38, %v3531_v57  ;;  %v6491_v33 = vpop.xlane.xlu1 %2913  ;;  %v7219_v38 = vld [vmem:[#allocation30_spill] sm:$0xff]  ;;  %v2116_v10 = vpop.f32.mrf.mxu1 }
 0x29d   :  { %v3112_v13 = vmul.f32 %v6211_v11, %v7220_v14  ;;  %v3650_v34 = vsel %vm3335_vm1, %v3626_v29, 0.0  ;;  %v2793_v28 = vsub.f32 %v2521_v47, %v2761_v19  ;;  %v3152_v29 = vsel %vm1116_vm0, %v3114_v36, 0.0 }
 0x29e   :  { %3165 = vadd.xlane.f32.xlu0 %v3164_v4  ;;  %v2798_v18 = vsub.f32 %v2526_v1, %v2766_v45  ;;  %v3603_v25 = vmul.f32 %v3555_v52, %v3555_v52  ;;  %v7221_v45 = vld [vmem:[#allocation31_spill] sm:$0xff] }
 0x29f   :  { %3028 = vadd.xlane.f32.xlu2 %v3027_v63  ;;  %v2224_v57 = vpop.f32.mrf.mxu2  ;;  %v3146_v22 = vsel %vm1116_vm0, %v3112_v13, 0.0  ;;  %v3533_v13 = vld [vmem:[%s7065_s2 + $0x18] sm:$0xff] }
 0x2a0   :  { %v3627_v55 = vmul.f32 %v3603_v25, %v3579_v62  ;;  %v2559_v32 = vmul.f32 %v7219_v38, %v2224_v57  ;;  %v7222_v62 = vld [vmem:[#allocation13_spill] sm:$0xff] }
 0x2a1   :  { %v3442_v40 = vpop.xlane.xlu2 %3441  ;;  %v2527_v63 = vmul.f32 %v7219_v38, %v7222_v62  ;;  %v7223_v38 = vld [vmem:[#allocation32_spill] sm:$0xff]  ;;  %v6531_v62 = vpop.f32.mrf.mxu3 }
 0x2a2   :  { %v3651_v1 = vsel %vm3335_vm1, %v3627_v55, 0.0  ;;  %v2687_v52 = vsub.f32 %v2559_v32, %v7221_v45  ;;  %v3508_v60 = vadd.f32 %v6023_v51, %v3442_v40  ;;  %v3119_v55 = vmul.f32 %v6211_v11, %v2793_v28  ;;  %v7224_v40 = vld [vmem:[#allocation18_spill] sm:$0xff]  ;;  %v7225_v45 = vld [vmem:[#allocation21_spill] sm:$0xff] }
 0x2a3   :  { %v3652_v4 = vadd.f32 %v3651_v1, %v3650_v34  ;;  %3025 = vadd.xlane.f32.xlu1 %v3024_v27  ;;  %v2554_v36 = vmul.f32 %v7224_v40, %v6374_v39  ;;  %v7226_v28 = vld [vmem:[#allocation33_spill] sm:$0xff] }
 0x2a4   :  { %v2767_v25 = vmul.f32 0.003183099, %v2687_v52  ;;  %v3556_v59 = vsub.f32 %v3508_v60, %v3532_v31  ;;  %v3124_v31 = vmul.f32 %v6211_v11, %v2798_v18  ;;  %v2555_v52 = vmul.f32 %v7225_v45, %v6402_v61  ;;  %v3581_v61 = vld [vmem:[%s7066_s3 + $0x18] sm:$0xff] }
 0x2a5   :  { %v3167_v39 = vsel %vm1116_vm0, %v3119_v55, 0.0  ;;  %v7230_v55 = vld [vmem:[#allocation23_spill] sm:$0xff] }
 0x2a6   :  { %3147 = vadd.xlane.f32.xlu0 %v3146_v22  ;;  %v2799_v47 = vsub.f32 %v2527_v63, %v2767_v25  ;;  %v3604_v57 = vmul.f32 %v3556_v59, %v3556_v59  ;;  %v7227_v63 = vld [vmem:[#allocation24_spill] sm:$0xff] }
 0x2a7   :  { %3153 = vadd.xlane.f32.xlu2 %v3152_v29  ;;  %v2227_v49 = vpop.f32.mrf.mxu2  ;;  %v2556_v25 = vmul.f32 %v7227_v63, %v6423_v48  ;;  %v7228_v22 = vld [vmem:[#allocation16_spill] sm:$0xff] }
 0x2a8   :  { %v3628_v32 = vmul.f32 %v3604_v57, %v3580_v23  ;;  %v2560_v14 = vmul.f32 %v7223_v38, %v2227_v49  ;;  %v3125_v1 = vmul.f32 %v6211_v11, %v2799_v47  ;;  %v6538_v23 = vmul.f32 %v7223_v38, %v7228_v22  ;;  %v7229_v57 = vld [vmem:[#allocation20_spill] sm:$0xff] }
 0x2a9   :  { %v3445_v19 = vpop.xlane.xlu1 %3444  ;;  %v3182_v47 = vsel %vm1116_vm0, %v3124_v31, 0.0  ;;  %v2682_v49 = vsub.f32 %v2554_v36, %v7229_v57  ;;  %v3113_v36 = vmul.f32 %v6211_v11, %v2787_v2 }
 0x2aa   :  { %v3509_v34 = vadd.f32 %v6023_v51, %v3445_v19  ;;  %v3653_v60 = vsel %vm3335_vm1, %v3628_v32, 0.0  ;;  %v2688_v27 = vsub.f32 %v2560_v14, %v7226_v28  ;;  %v2683_v32 = vsub.f32 %v2555_v52, %v7230_v55  ;;  %v2119_v14 = vpop.f32.mrf.mxu1  ;;  %v7232_v28 = vld [vmem:[#allocation34_spill] sm:$0xff] }
 0x2ab   :  { %v3654_v18 = vadd.f32 %v3653_v60, %v3652_v4  ;;  %3168 = vadd.xlane.f32.xlu1 %v3167_v39  ;;  %v3185_v4 = vsel %vm1116_vm0, %v3125_v1, 0.0  ;;  %v2988_v1 = vmul.f32 %v6211_v11, %v6414_v17  ;;  %v2523_v52 = vmul.f32 %v7225_v45, %v2116_v10 }
 0x2ac   :  { %v3557_v59 = vsub.f32 %v3509_v34, %v3533_v13  ;;  %v6540_v29 = vmul.f32 0.003183099, %v2688_v27  ;;  %v7231_v13 = vld [vmem:[#allocation25_spill] sm:$0xff]  ;;  %v2522_v34 = vmul.f32 %v7224_v40, %v6472_v37  ;;  %v7233_v37 = vld [vmem:[#allocation40_spill] sm:$0xff]  ;;  %v7234_v40 = vld [vmem:[#allocation42_spill] sm:$0xff]  ;;  %v2524_v7 = vmul.f32 %v7227_v63, %v2119_v14 }
 0x2ad   :  { %v2684_v19 = vsub.f32 %v2556_v25, %v7231_v13  ;;  %v3534_v25 = vld [vmem:[%s7065_s2 + $0x20] sm:$0xff]  ;;  %v7235_v39 = vsub.f32 %v7233_v37, %v7234_v40  ;;  %v2762_v8 = vmul.f32 0.003183099, %v2682_v49  ;;  %v2763_v10 = vmul.f32 0.003183099, %v2683_v32  ;;  %v6584_v32 = vpop.f32.mrf.mxu3 }
 0x2ae   :  { %v3605_v48 = vmul.f32 %v3557_v59, %v3557_v59  ;;  %3183 = vadd.xlane.f32.xlu0 %v3182_v47  ;;  %v2800_v38 = vsub.f32 %v6538_v23, %v6540_v29  ;;  %v3149_v55 = vsel %vm1116_vm0, %v3113_v36, 0.0  ;;  %v3582_v63 = vld [vmem:[%s7066_s3 + $0x20] sm:$0xff] }
 0x2af   :  { %3186 = vadd.xlane.f32.xlu2 %v3185_v4  ;;  %v2230_v31 = vpop.f32.mrf.mxu2  ;;  %v3131_v22 = vmul.f32 %v6211_v11, %v7235_v39  ;;  %v2764_v57 = vmul.f32 0.003183099, %v2684_v19  ;;  %v2795_v13 = vsub.f32 %v2523_v52, %v2763_v10 }
 0x2b0   :  { %v3629_v60 = vmul.f32 %v3605_v48, %v3581_v61  ;;  %v2561_v27 = vmul.f32 %v7232_v28, %v2230_v31  ;;  %v7236_v61 = vld [vmem:[#allocation35_spill] sm:$0xff]  ;;  %v2794_v48 = vsub.f32 %v2522_v34, %v2762_v8 }
 0x2b1   :  { %v3448_v59 = vpop.xlane.xlu0 %3447  ;;  %v7237_v31 = vld [vmem:[#allocation19_spill] sm:$0xff]  ;;  %v2796_v14 = vsub.f32 %v2524_v7, %v2764_v57  ;;  %v3203_v34 = vsel %vm1116_vm0, %v3131_v22, 0.0  ;;  %v3121_v40 = vmul.f32 %v6211_v11, %v2795_v13 }
 0x2b2   :  { %v3655_v2 = vsel %vm3335_vm1, %v3629_v60, 0.0  ;;  %v3510_v17 = vadd.f32 %v6023_v51, %v3448_v59  ;;  %v2689_v47 = vsub.f32 %v2561_v27, %v7236_v61  ;;  %v6576_v37 = vmul.f32 %v7232_v28, %v7237_v31  ;;  %v7238_v27 = vld [vmem:[#allocation36_spill] sm:$0xff] }
 0x2b3   :  { %v3656_v45 = vadd.f32 %v3655_v2, %v3654_v18  ;;  %3150 = vadd.xlane.f32.xlu1 %v3149_v55  ;;  %v3030_v18 = vsel %vm1116_vm0, %v2988_v1, 0.0  ;;  %v3120_v28 = vmul.f32 %v6211_v11, %v2794_v48  ;;  %v3535_v1 = vld [vmem:[%s7065_s2 + $0x28] sm:$0xff]  ;;  %v3122_v8 = vmul.f32 %v6211_v11, %v2796_v14  ;;  %v7239_v2 = vld [vmem:[#allocation37_spill] sm:$0xff] }
 0x2b4   :  { %v3558_v4 = vsub.f32 %v3510_v17, %v3534_v25  ;;  %v6578_v49 = vmul.f32 0.003183099, %v2689_v47  ;;  %v7240_v47 = vld [vmem:[#allocation22_spill] sm:$0xff]  ;;  %v3173_v55 = vsel %vm1116_vm0, %v3121_v40, 0.0 }
 0x2b5   :  { %v3170_v61 = vsel %vm1116_vm0, %v3120_v28, 0.0  ;;  %v2530_v57 = vmul.f32 %v7238_v27, %v7240_v47  ;;  %v2323_v31 = vpop.f32.mrf.mxu3 }
 0x2b6   :  { %v3606_v19 = vmul.f32 %v3558_v4, %v3558_v4  ;;  %3031 = vadd.xlane.f32.xlu0 %v3030_v18  ;;  %v2801_v60 = vsub.f32 %v6576_v37, %v6578_v49  ;;  %v3583_v4 = vld [vmem:[%s7066_s3 + $0x28] sm:$0xff]  ;;  %v3126_v49 = vmul.f32 %v6211_v11, %v2800_v38  ;;  %v3536_v18 = vld [vmem:[%s7065_s2 + $0x30] sm:$0xff] }
 0x2b7   :  { %3204 = vadd.xlane.f32.xlu2 %v3203_v34  ;;  %v2233_v52 = vpop.f32.mrf.mxu2 }
 0x2b8   :  { %v3630_v36 = vmul.f32 %v3606_v19, %v3582_v63  ;;  %v2562_v25 = vmul.f32 %v7238_v27, %v2233_v52  ;;  %v3115_v19 = vmul.f32 %v6211_v11, %v2789_v0  ;;  %v2718_v52 = vadd.f32 %v6189_v54, %v6531_v62 }
 0x2b9   :  { %v3451_v59 = vpop.xlane.xlu2 %3450  ;;  %v6611_v63 = vpop.xlane.xlu0 %2919  ;;  %v3188_v27 = vsel %vm1116_vm0, %v3126_v49, 0.0  ;;  %v7241_v62 = vsub.f32 %v6350_v56, %v6433_v3 }
 0x2ba   :  { %v3657_v39 = vsel %vm3335_vm1, %v3630_v36, 0.0  ;;  %v3511_v22 = vadd.f32 %v6023_v51, %v3451_v59  ;;  %v2690_v17 = vsub.f32 %v2562_v25, %v7239_v2  ;;  %v6621_v36 = vld [vmem:[#allocation3] ss:$0 sm:$0xff]  ;;  %v3155_v9 = vsel %vm1116_vm0, %v3115_v19, 0.0 }
 0x2bb   :  { %v3658_v7 = vadd.f32 %v3657_v39, %v3656_v45  ;;  %3171 = vadd.xlane.f32.xlu1 %v3170_v61  ;;  %v3176_v45 = vsel %vm1116_vm0, %v3122_v8, 0.0  ;;  %4118 = vtanh.f32 %v2718_v52  ;;  %v3116_v59 = vmul.f32 %v6211_v11, %v7241_v62  ;;  %v3537_v39 = vld [vmem:[%s7065_s2 + $0x38] sm:$0xff]  ;;  %v7243_v61 = vld [vmem:[#allocation46_spill] sm:$0xff] }
 0x2bc   :  { %v3559_v10 = vsub.f32 %v3511_v22, %v3535_v1  ;;  %v2770_v48 = vmul.f32 0.003183099, %v2690_v17  ;;  %v3127_v8 = vmul.f32 %v6211_v11, %v2801_v60  ;;  %v3585_v60 = vld [vmem:[%s7066_s3 + $0x38] sm:$0xff]  ;;  %v3538_v19 = vld [vmem:[%s7065_s2 + $0x40] sm:$0xff] }
 0x2bd   :  { %v2326_v47 = vpop.f32.mrf.mxu3 }
 0x2be   :  { %v3607_v51 = vmul.f32 %v3559_v10, %v3559_v10  ;;  %3174 = vadd.xlane.f32.xlu0 %v3173_v55  ;;  %v2802_v13 = vsub.f32 %v2530_v57, %v2770_v48  ;;  %v7242_v10 = vld [vmem:[#allocation43_spill] sm:$0xff]  ;;  %v2719_v48 = vadd.f32 %v6189_v54, %v6584_v32  ;;  %v3158_v55 = vsel %vm1116_vm0, %v3116_v59, 0.0 }
 0x2bf   :  { %3177 = vadd.xlane.f32.xlu2 %v3176_v45  ;;  %v7244_v56 = vsub.f32 %v7242_v10, %v7243_v61 }
 0x2c0   :  { %v3631_v37 = vmul.f32 %v3607_v51, %v3583_v4  ;;  %v3128_v29 = vmul.f32 %v6211_v11, %v2802_v13  ;;  %v3191_v51 = vsel %vm1116_vm0, %v3127_v8, 0.0  ;;  %4120 = vtanh.f32 %v2719_v48 }
 0x2c1   :  { %v3454_v14 = vpop.xlane.xlu1 %3453  ;;  %v6637_v40 = vpop.xlane.xlu2 %2925  ;;  %v3132_v3 = vmul.f32 %v6211_v11, %v7244_v56 }
 0x2c2   :  { %v3659_v34 = vsel %vm3335_vm1, %v3631_v37, 0.0  ;;  %v3512_v23 = vadd.f32 %v6621_v36, %v3454_v14  ;;  %v3194_v25 = vsel %vm1116_vm0, %v3128_v29, 0.0  ;;  %v4119_v45 = vpop.eup %4118  ;;  %v2970_v14 = vadd.f32 %v6621_v36, %v6445_v5 }
 0x2c3   :  { %v3660_v38 = vadd.f32 %v3659_v34, %v3658_v7  ;;  %3189 = vadd.xlane.f32.xlu1 %v3188_v27  ;;  %v3206_v37 = vsel %vm1116_vm0, %v3132_v3, 0.0  ;;  %v7247_v27 = vld [vmem:[#allocation53_spill] sm:$0xff]  ;;  %v2720_v5 = vadd.f32 %v6189_v54, %v2323_v31  ;;  %v7249_v31 = vld [vmem:[#allocation51_spill] sm:$0xff] }
 0x2c4   :  { %v3560_v28 = vsub.f32 %v3512_v23, %v3536_v18  ;;  %v7245_v18 = vld [vmem:[#allocation47_spill] sm:$0xff]  ;;  %v3423_v23 = vmul.f32 %v6211_v11, %v4119_v45  ;;  %v3006_v61 = vmul.f32 %v6211_v11, %v7249_v31  ;;  %v7251_v45 = vld [vmem:[#allocation56_spill] sm:$0xff] }
 0x2c5   :  { %v3005_v32 = vmul.f32 %v6211_v11, %v7245_v18  ;;  %v2329_v59 = vpop.f32.mrf.mxu3  ;;  %4122 = vtanh.f32 %v2720_v5 }
 0x2c6   :  { %v3608_v0 = vmul.f32 %v3560_v28, %v3560_v28  ;;  %3156 = vadd.xlane.f32.xlu0 %v3155_v9  ;;  %v7246_v28 = vld [vmem:[#allocation48_spill] sm:$0xff]  ;;  %v4121_v8 = vpop.eup %4120 }
 0x2c7   :  { %3195 = vadd.xlane.f32.xlu2 %v3194_v25  ;;  %v3081_v62 = vsel %vm1116_vm0, %v3005_v32, 0.0  ;;  %v2721_v32 = vadd.f32 %v6189_v54, %v2326_v47 }
 0x2c8   :  { %v3632_v1 = vmul.f32 %v3608_v0, %v3584_v42  ;;  %v7248_v42 = vsub.f32 %v7246_v28, %v7247_v27  ;;  %v7253_v28 = vld [vmem:[#allocation57_spill] sm:$0xff] }
 0x2c9   :  { %v3457_v22 = vpop.xlane.xlu0 %3456  ;;  %v6645_v17 = vpop.xlane.xlu1 %2922  ;;  %4124 = vtanh.f32 %v2721_v32  ;;  %v3007_v47 = vmul.f32 %v6211_v11, %v7253_v28 }
 0x2ca   :  { %v3661_v7 = vsel %vm3335_vm1, %v3632_v1, 0.0  ;;  %v3513_v2 = vadd.f32 %v6621_v36, %v3457_v22  ;;  %v3133_v9 = vmul.f32 %v6211_v11, %v7248_v42  ;;  %v3473_v22 = vsel %vm1116_vm0, %v3423_v23, 0.0  ;;  %v3540_v42 = vld [vmem:[%s7065_s2 + $0x50] sm:$0xff] }
 0x2cb   :  { %v3662_v57 = vadd.f32 %v3661_v7, %v3660_v38  ;;  %3159 = vadd.xlane.f32.xlu1 %v3158_v55  ;;  %v4123_v23 = vpop.eup %4122 }
 0x2cc   :  { %v3561_v4 = vsub.f32 %v3513_v2, %v3537_v39  ;;  %v3586_v39 = vld [vmem:[%s7066_s3 + $0x40] sm:$0xff]  ;;  %v3209_v2 = vsel %vm1116_vm0, %v3133_v9, 0.0 }
 0x2ce   :  { %v3609_v13 = vmul.f32 %v3561_v4, %v3561_v4  ;;  %3192 = vadd.xlane.f32.xlu0 %v3191_v51  ;;  %v3539_v4 = vld [vmem:[%s7065_s2 + $0x48] sm:$0xff]  ;;  %v7250_v51 = vld [vmem:[#allocation52_spill] sm:$0xff] }
 0x2cf   :  { %3207 = vadd.xlane.f32.xlu2 %v3206_v37 }
 0x2d0   :  { %v3633_v49 = vmul.f32 %v3609_v13, %v3585_v60  ;;  %v7252_v13 = vsub.f32 %v7250_v51, %v7251_v45 }
 0x2d1   :  { %v3460_v34 = vpop.xlane.xlu2 %3459  ;;  %v3074_v38 = vpop.xlane.xlu1 %3073 }
 0x2d2   :  { %v3663_v29 = vsel %vm3335_vm1, %v3633_v49, 0.0  ;;  %v3514_v52 = vadd.f32 %v6621_v36, %v3460_v34  ;;  %v6673_v25 = vmul.f32 %v3074_v38, %v2970_v14  ;;  %v6684_v56 = vpop.xlane.xlu0 %2928  ;;  %v3134_v37 = vmul.f32 %v6211_v11, %v7252_v13  ;;  %v2332_v38 = vpop.f32.mrf.mxu3 }
 0x2d3   :  { %v3664_v0 = vadd.f32 %v3663_v29, %v3662_v57  ;;  %3082 = vadd.xlane.f32.xlu1 %v3081_v62  ;;  %v3424_v57 = vmul.f32 %v6211_v11, %v4121_v8  ;;  %v3084_v14 = vsel %vm1116_vm0, %v3006_v61, 0.0  ;;  %v2971_v13 = vadd.f32 %v6621_v36, %v6491_v33 }
 0x2d4   :  { %v3562_v1 = vsub.f32 %v3514_v52, %v3538_v19  ;;  %v3212_v29 = vsel %vm1116_vm0, %v3134_v37, 0.0 }
 0x2d5   :  { %v3476_v34 = vsel %vm1116_vm0, %v3424_v57, 0.0  ;;  %v3588_v57 = vld [vmem:[%s7066_s3 + $0x50] sm:$0xff] }
 0x2d6   :  { %v3610_v7 = vmul.f32 %v3562_v1, %v3562_v1  ;;  %3474 = vadd.xlane.f32.xlu0 %v3473_v22  ;;  %v7255_v22 = vld [vmem:[#allocation61_spill] sm:$0xff] }
 0x2d7   :  { %3210 = vadd.xlane.f32.xlu2 %v3209_v2 }
 0x2d8   :  { %v3634_v10 = vmul.f32 %v3610_v7, %v3586_v39  ;;  %v7254_v39 = vld [vmem:[#allocation58_spill] sm:$0xff] }
 0x2d9   :  { %v3199_v3 = vpop.xlane.xlu2 %3198  ;;  %v3463_v55 = vpop.xlane.xlu1 %3462  ;;  %v7256_v8 = vsub.f32 %v7254_v39, %v7255_v22 }
 0x2da   :  { %v3665_v48 = vsel %vm3335_vm1, %v3634_v10, 0.0  ;;  %v6692_v60 = vadd.f32 %v6358_v44, %v3199_v3  ;;  %v3515_v18 = vadd.f32 %v6621_v36, %v3463_v55  ;;  %v3587_v44 = vld [vmem:[%s7066_s3 + $0x48] sm:$0xff]  ;;  %v2722_v10 = vadd.f32 %v6189_v54, %v2329_v59  ;;  %v2335_v37 = vpop.f32.mrf.mxu3 }
 0x2db   :  { %v3666_v49 = vadd.f32 %v3665_v48, %v3664_v0  ;;  %3085 = vadd.xlane.f32.xlu1 %v3084_v14  ;;  %v3425_v0 = vmul.f32 %v6211_v11, %v4123_v23  ;;  %v3135_v7 = vmul.f32 %v6211_v11, %v7256_v8  ;;  %v3087_v3 = vsel %vm1116_vm0, %v3007_v47, 0.0  ;;  %v7257_v54 = vld [vmem:[#allocation59_spill] sm:$0xff] }
 0x2dc   :  { %v3563_v19 = vsub.f32 %v3515_v18, %v3539_v4  ;;  %v4125_v4 = vpop.eup %4124  ;;  %4126 = vtanh.f32 %v2722_v10  ;;  %v3008_v59 = vmul.f32 %v6211_v11, %v7257_v54 }
 0x2dd   :  { %v3479_v48 = vsel %vm1116_vm0, %v3425_v0, 0.0  ;;  %v3215_v51 = vsel %vm1116_vm0, %v3135_v7, 0.0  ;;  %v3426_v32 = vmul.f32 %v6211_v11, %v4125_v4 }
 0x2de   :  { %3477 = vadd.xlane.f32.xlu0 %v3476_v34  ;;  %v3611_v52 = vmul.f32 %v3563_v19, %v3563_v19 }
 0x2df   :  { %3213 = vadd.xlane.f32.xlu2 %v3212_v29  ;;  %v7259_v29 = vld [vmem:[#allocation62_spill] sm:$0xff]  ;;  %v3482_v39 = vsel %vm1116_vm0, %v3426_v32, 0.0 }
 0x2e0   :  { %v3635_v27 = vmul.f32 %v3611_v52, %v3587_v44  ;;  %v7258_v44 = vld [vmem:[#allocation60_spill] sm:$0xff] }
 0x2e1   :  { %v3466_v9 = vpop.xlane.xlu0 %3465  ;;  %v6713_v1 = vpop.xlane.xlu1 %2931  ;;  %v7260_v52 = vsub.f32 %v7258_v44, %v7259_v29 }
 0x2e2   :  { %v3516_v5 = vadd.f32 %v6621_v36, %v3466_v9  ;;  %v6715_v62 = vpop.xlane.xlu2 %2934  ;;  %v3667_v2 = vsel %vm3335_vm1, %v3635_v27, 0.0  ;;  %v4127_v22 = vpop.eup %4126 }
 0x2e3   :  { %v3668_v31 = vadd.f32 %v3667_v2, %v3666_v49  ;;  %3088 = vadd.xlane.f32.xlu1 %v3087_v3  ;;  %v3541_v49 = vld [vmem:[%s7065_s2 + $0x58] sm:$0xff]  ;;  %v3136_v28 = vmul.f32 %v6211_v11, %v7260_v52  ;;  %v2338_v54 = vpop.f32.mrf.mxu3 }
 0x2e4   :  { %v3564_v61 = vsub.f32 %v3516_v5, %v3540_v42  ;;  %v6751_v42 = vld [vmem:[%s7070_s7] ss:$0 sm:$0xff]  ;;  %v3090_v5 = vsel %vm1116_vm0, %v3008_v59, 0.0  ;;  %v3589_v11 = vld [vmem:[%s7066_s3 + $0x58] sm:$0xff] }
 0x2e5   :  { %v2723_v9 = vadd.f32 %v6751_v42, %v2332_v38  ;;  %v3218_v8 = vsel %vm1116_vm0, %v3136_v28, 0.0  ;;  %v6763_v38 = vld [vmem:[%s7071_s8] ss:$0 sm:$0xff]  ;;  %v7261_v2 = vld [vmem:[#allocation64_spill] sm:$0xff] }
 0x2e6   :  { %v3612_v55 = vmul.f32 %v3564_v61, %v3564_v61  ;;  %3480 = vadd.xlane.f32.xlu0 %v3479_v48  ;;  %v3009_v10 = vmul.f32 %v6763_v38, %v7261_v2  ;;  %v3427_v3 = vmul.f32 %v6763_v38, %v4127_v22  ;;  %v2725_v22 = vadd.f32 %v6751_v42, %v2338_v54  ;;  %v3590_v2 = vld [vmem:[%s7066_s3 + $0x60] sm:$0xff] }
 0x2e7   :  { %3216 = vadd.xlane.f32.xlu2 %v3215_v51  ;;  %4128 = vtanh.f32 %v2723_v9  ;;  %v7266_v9 = vld [vmem:[#allocation68_spill] sm:$0xff] }
 0x2e8   :  { %v3636_v45 = vmul.f32 %v3612_v55, %v3588_v57  ;;  %v7262_v55 = vld [vmem:[#allocation66_spill] sm:$0xff] }
 0x2e9   :  { %v3469_v18 = vpop.xlane.xlu0 %3468  ;;  %v3077_v34 = vpop.xlane.xlu1 %3076  ;;  %v7263_v51 = vsub.f32 %v6049_v46, %v7262_v55  ;;  %v7264_v46 = vld [vmem:[#allocation67_spill] sm:$0xff] }
 0x2ea   :  { %v3669_v14 = vsel %vm3335_vm1, %v3636_v45, 0.0  ;;  %v3517_v19 = vadd.f32 %v6621_v36, %v3469_v18  ;;  %v3202_v23 = vpop.xlane.xlu2 %3201  ;;  %v6743_v47 = vmul.f32 %v3077_v34, %v2971_v13  ;;  %v3485_v18 = vsel %vm1116_vm0, %v3427_v3, 0.0  ;;  %v7265_v34 = vld [vmem:[#allocation44_spill] sm:$0xff]  ;;  %v7269_v55 = vld [vmem:[#allocation71_spill] sm:$0xff] }
 0x2eb   :  { %v3670_v33 = vadd.f32 %v3669_v14, %v3668_v31  ;;  %v6746_v27 = vadd.f32 %v6673_v25, %v3202_v23  ;;  %3091 = vadd.xlane.f32.xlu1 %v3090_v5  ;;  %v2972_v31 = vadd.f32 %v6621_v36, %v6468_v53  ;;  %v3137_v45 = vmul.f32 %v6763_v38, %v7263_v51 }
 0x2ec   :  { %v3565_v0 = vsub.f32 %v3517_v19, %v3541_v49  ;;  %v2724_v53 = vadd.f32 %v6751_v42, %v2335_v37  ;;  %v3093_v49 = vsel %vm1116_vm0, %v3009_v10, 0.0  ;;  %v3010_v19 = vmul.f32 %v6763_v38, %v7264_v46  ;;  %v3542_v37 = vld [vmem:[%s7065_s2 + $0x60] sm:$0xff]  ;;  %v7271_v46 = vld [vmem:[#allocation72_spill] sm:$0xff] }
 0x2ed   :  { %v4129_v32 = vpop.eup %4128  ;;  %v3221_v14 = vsel %vm1116_vm0, %v3137_v45, 0.0  ;;  %v2952_v23 = vadd.f32 %v6621_v36, %v7265_v34  ;;  %v3011_v51 = vmul.f32 %v6763_v38, %v7269_v55  ;;  %v7270_v45 = vld [vmem:[#allocation49_spill] sm:$0xff] }
 0x2ee   :  { %v3613_v25 = vmul.f32 %v3565_v0, %v3565_v0  ;;  %3483 = vadd.xlane.f32.xlu0 %v3482_v39  ;;  %4130 = vtanh.f32 %v2724_v53  ;;  %v3428_v29 = vmul.f32 %v6763_v38, %v4129_v32  ;;  %v7267_v0 = vld [vmem:[#allocation73_spill] sm:$0xff]  ;;  %v2951_v54 = vadd.f32 %v6621_v36, %v7270_v45 }
 0x2ef   :  { %3219 = vadd.xlane.f32.xlu2 %v3218_v8  ;;  %v7268_v5 = vsub.f32 %v7266_v9, %v7267_v0  ;;  %v3096_v8 = vsel %vm1116_vm0, %v3010_v19, 0.0  ;;  %4132 = vtanh.f32 %v2725_v22  ;;  %v7272_v19 = vld [vmem:[#allocation75_spill] sm:$0xff]  ;;  %v3099_v9 = vsel %vm1116_vm0, %v3011_v51, 0.0 }
 0x2f0   :  { %v3637_v7 = vmul.f32 %v3613_v25, %v3589_v11  ;;  %v3488_v10 = vsel %vm1116_vm0, %v3428_v29, 0.0  ;;  %v7273_v34 = vsub.f32 %v7271_v46, %v7272_v19  ;;  %v7274_v29 = vld [vmem:[#allocation63_spill] sm:$0xff] }
 0x2f1   :  { %v6769_v61 = vpop.xlane.xlu0 %2937  ;;  %v3080_v48 = vpop.xlane.xlu1 %3079  ;;  %v3138_v11 = vmul.f32 %v6763_v38, %v7268_v5 }
 0x2f2   :  { %v3671_v57 = vsel %vm3335_vm1, %v3637_v7, 0.0  ;;  %v6773_v4 = vpop.xlane.xlu2 %2943  ;;  %v6779_v13 = vmul.f32 %v3080_v48, %v2972_v31  ;;  %v2341_v7 = vpop.f32.mrf.mxu3 }
 0x2f3   :  { %v3672_v59 = vadd.f32 %v3671_v57, %v3670_v33  ;;  %3094 = vadd.xlane.f32.xlu1 %v3093_v49  ;;  %v3224_v57 = vsel %vm1116_vm0, %v3138_v11, 0.0 }
 0x2f4   :  { %v4131_v31 = vpop.eup %4130 }
 0x2f5   :  { %v3429_v49 = vmul.f32 %v6763_v38, %v4131_v31  ;;  %v4133_v5 = vpop.eup %4132 }
 0x2f6   :  { %3486 = vadd.xlane.f32.xlu0 %v3485_v18 }
 0x2f7   :  { %3222 = vadd.xlane.f32.xlu2 %v3221_v14  ;;  %v3491_v0 = vsel %vm1116_vm0, %v3429_v49, 0.0 }
 0x2f9   :  { %v3472_v44 = vpop.xlane.xlu0 %3471  ;;  %v6794_v28 = vpop.xlane.xlu1 %2940 }
 0x2fa   :  { %v3518_v52 = vadd.f32 %v6621_v36, %v3472_v44  ;;  %v3020_v33 = vpop.xlane.xlu2 %3019  ;;  %v2344_v22 = vpop.f32.mrf.mxu3 }
 0x2fb   :  { %v6800_v39 = vmul.f32 %v3020_v33, %v2952_v23  ;;  %3097 = vadd.xlane.f32.xlu1 %v3096_v8  ;;  %v3139_v23 = vmul.f32 %v6763_v38, %v7273_v34  ;;  %v2726_v33 = vadd.f32 %v6751_v42, %v2341_v7  ;;  %v7276_v8 = vld [vmem:[#allocation76_spill] sm:$0xff]  ;;  %v3430_v7 = vmul.f32 %v6763_v38, %v4133_v5 }
 0x2fc   :  { %v3566_v25 = vsub.f32 %v3518_v52, %v3542_v37  ;;  %v2727_v51 = vadd.f32 %v6751_v42, %v2344_v22 }
 0x2fd   :  { %v3227_v11 = vsel %vm1116_vm0, %v3139_v23, 0.0  ;;  %4134 = vtanh.f32 %v2726_v33 }
 0x2fe   :  { %v3614_v3 = vmul.f32 %v3566_v25, %v3566_v25  ;;  %3489 = vadd.xlane.f32.xlu0 %v3488_v10  ;;  %v7275_v25 = vld [vmem:[#allocation45_spill] sm:$0xff]  ;;  %4136 = vtanh.f32 %v2727_v51 }
 0x2ff   :  { %3225 = vadd.xlane.f32.xlu2 %v3224_v57  ;;  %v7277_v57 = vsub.f32 %v6175_v21, %v6231_v24  ;;  %v3013_v21 = vmul.f32 %v6763_v38, %v6219_v30  ;;  %v7278_v24 = vld [vmem:[#allocation55_spill] sm:$0xff] }
 0x300   :  { %v3638_v48 = vmul.f32 %v3614_v3, %v3590_v2  ;;  %v3012_v2 = vmul.f32 %v6763_v38, %v7276_v8 }
 0x301   :  { %v6813_v53 = vpop.xlane.xlu0 %2946  ;;  %v3017_v32 = vpop.xlane.xlu1 %3016 }
 0x302   :  { %v3673_v18 = vsel %vm3335_vm1, %v3638_v48, 0.0  ;;  %v3163_v14 = vpop.xlane.xlu2 %3162  ;;  %v3239_v44 = vmul.f32 %v3017_v32, %v2951_v54  ;;  %v3140_v48 = vmul.f32 %v6763_v38, %v7277_v57  ;;  %v3102_v45 = vsel %vm1116_vm0, %v3012_v2, 0.0  ;;  %v2347_v46 = vpop.f32.mrf.mxu3 }
 0x303   :  { %v6821_v37 = vadd.f32 %v3673_v18, %v3672_v59  ;;  %v6824_v52 = vadd.f32 %v7274_v29, %v3163_v14  ;;  %3100 = vadd.xlane.f32.xlu1 %v3099_v9  ;;  %v2953_v59 = vadd.f32 %v6621_v36, %v7275_v25  ;;  %v3494_v54 = vsel %vm1116_vm0, %v3430_v7, 0.0  ;;  %v4135_v49 = vpop.eup %4134  ;;  %v7279_v29 = vld [vmem:[#allocation69_spill] sm:$0xff] }
 0x304   :  { %v3230_v18 = vsel %vm1116_vm0, %v3140_v48, 0.0  ;;  %v2955_v14 = vadd.f32 %v6621_v36, %v7278_v24  ;;  %v3431_v23 = vmul.f32 %v6763_v38, %v4135_v49  ;;  %v7280_v9 = vsub.f32 %v6223_v58, %v6268_v6  ;;  %v4137_v22 = vpop.eup %4136 }
 0x305   :  { %v2728_v5 = vadd.f32 %v6751_v42, %v2347_v46  ;;  %v3014_v6 = vmul.f32 %v6763_v38, %v6271_v12 }
 0x306   :  { %3492 = vadd.xlane.f32.xlu0 %v3491_v0  ;;  %v3141_v0 = vmul.f32 %v6763_v38, %v7280_v9 }
 0x307   :  { %3228 = vadd.xlane.f32.xlu2 %v3227_v11  ;;  %v3105_v11 = vsel %vm1116_vm0, %v3013_v21, 0.0  ;;  %4138 = vtanh.f32 %v2728_v5  ;;  %v3108_v51 = vsel %vm1116_vm0, %v3014_v6, 0.0 }
 0x308   :  { %v3233_v25 = vsel %vm1116_vm0, %v3141_v0, 0.0 }
 0x309   :  { %v3023_v10 = vpop.xlane.xlu0 %3022 }
 0x30a   :  { %v6835_v31 = vmul.f32 %v3023_v10, %v2953_v59  ;;  %v3145_v3 = vpop.xlane.xlu2 %3144  ;;  %v7281_v59 = vld [vmem:[#allocation54_spill] sm:$0xff]  ;;  %v3432_v10 = vmul.f32 %v6763_v38, %v4137_v22 }
 0x30b   :  { %v3271_v55 = vadd.f32 %v3239_v44, %v3145_v3  ;;  %3103 = vadd.xlane.f32.xlu1 %v3102_v45  ;;  %v2954_v8 = vadd.f32 %v6621_v36, %v7281_v59 }
 0x30c   :  { %v3500_v45 = vsel %vm1116_vm0, %v3432_v10, 0.0 }
 0x30d   :  { %v3303_v7 = vmul.f32 %v3271_v55, %v3271_v55  ;;  %v7282_v55 = vsub.f32 %v6277_v35, %v6331_v16 }
 0x30e   :  { %3495 = vadd.xlane.f32.xlu0 %v3494_v54  ;;  %v3181_v32 = vpop.xlane.xlu1 %3180  ;;  %v4139_v54 = vpop.eup %4138 }
 0x30f   :  { %3231 = vadd.xlane.f32.xlu2 %v3230_v18  ;;  %v6850_v19 = vadd.f32 %v6233_v41, %v3181_v32  ;;  %v3497_v41 = vsel %vm1116_vm0, %v3431_v23, 0.0  ;;  %v3336_v49 = vsel %vm3335_vm1, %v3303_v7, 0.0  ;;  %v3142_v21 = vmul.f32 %v6763_v38, %v7282_v55 }
 0x310   :  { %v3433_v46 = vmul.f32 %v6763_v38, %v4139_v54 }
 0x311   :  { %v3166_v34 = vpop.xlane.xlu0 %3165 }
 0x312   :  { %v3029_v44 = vpop.xlane.xlu2 %3028  ;;  %v6854_v33 = vadd.f32 %v7279_v29, %v3166_v34  ;;  %v3236_v29 = vsel %vm1116_vm0, %v3142_v21, 0.0  ;;  %v3503_v9 = vsel %vm1116_vm0, %v3433_v46, 0.0 }
 0x313   :  { %v3243_v30 = vmul.f32 %v3029_v44, %v2955_v14  ;;  %3106 = vadd.xlane.f32.xlu1 %v3105_v11 }
 0x316   :  { %3498 = vadd.xlane.f32.xlu0 %v3497_v41  ;;  %v3026_v58 = vpop.xlane.xlu1 %3025 }
 0x317   :  { %3234 = vadd.xlane.f32.xlu2 %v3233_v25  ;;  %v3242_v2 = vmul.f32 %v3026_v58, %v2954_v8 }
 0x319   :  { %v3148_v42 = vpop.xlane.xlu0 %3147 }
 0x31a   :  { %v3154_v3 = vpop.xlane.xlu2 %3153  ;;  %v3272_v57 = vadd.f32 %v6800_v39, %v3148_v42  ;;  %v7283_v39 = vld [vmem:[#allocation70_spill] sm:$0xff] }
 0x31b   :  { %3109 = vadd.xlane.f32.xlu1 %v3108_v51  ;;  %v3274_v35 = vadd.f32 %v3242_v2, %v3154_v3 }
 0x31c   :  { %v3304_v48 = vmul.f32 %v3272_v57, %v3272_v57  ;;  %v7284_v57 = vld [vmem:[#allocation50_spill] sm:$0xff] }
 0x31d   :  { %v3306_v41 = vmul.f32 %v3274_v35, %v3274_v35 }
 0x31e   :  { %v3337_v18 = vsel %vm3335_vm1, %v3304_v48, 0.0  ;;  %3501 = vadd.xlane.f32.xlu0 %v3500_v45  ;;  %v3169_v32 = vpop.xlane.xlu1 %3168 }
 0x31f   :  { %v3338_v12 = vadd.f32 %v3337_v18, %v3336_v49  ;;  %v3279_v24 = vadd.f32 %v7283_v39, %v3169_v32  ;;  %v3341_v25 = vsel %vm3335_vm1, %v3306_v41, 0.0  ;;  %v3309_v32 = vmul.f32 %v6824_v52, %v6824_v52  ;;  %v7286_v52 = vld [vmem:[#allocation74_spill] sm:$0xff] }
 0x321   :  { %v3184_v14 = vpop.xlane.xlu0 %3183  ;;  %v3347_v46 = vsel %vm3335_vm1, %v3309_v32, 0.0 }
 0x322   :  { %v3284_v34 = vadd.f32 %v6283_v15, %v3184_v14  ;;  %v3187_v23 = vpop.xlane.xlu2 %3186 }
 0x323   :  { %v6882_v44 = vadd.f32 %v6266_v50, %v3187_v23  ;;  %3237 = vadd.xlane.f32.xlu1 %v3236_v29  ;;  %v3311_v23 = vmul.f32 %v3279_v24, %v3279_v24 }
 0x326   :  { %3504 = vadd.xlane.f32.xlu0 %v3503_v9  ;;  %v3151_v16 = vpop.xlane.xlu1 %3150 }
 0x327   :  { %v3273_v0 = vadd.f32 %v6835_v31, %v3151_v16 }
 0x329   :  { %v3032_v5 = vpop.xlane.xlu0 %3031  ;;  %v3305_v38 = vmul.f32 %v3273_v0, %v3273_v0 }
 0x32a   :  { %v3205_v11 = vpop.xlane.xlu2 %3204 }
 0x32b   :  { %v6888_v15 = vadd.f32 %v6743_v47, %v3205_v11  ;;  %v3339_v50 = vsel %vm3335_vm1, %v3305_v38, 0.0  ;;  %v2956_v47 = vadd.f32 %v6621_v36, %v7284_v57  ;;  %v3351_v38 = vsel %vm3335_vm1, %v3311_v23, 0.0 }
 0x32c   :  { %v3340_v22 = vadd.f32 %v3339_v50, %v3338_v12 }
 0x32d   :  { %v3244_v51 = vmul.f32 %v3032_v5, %v2956_v47 }
 0x32e   :  { %v3172_v59 = vpop.xlane.xlu1 %3171  ;;  %v3342_v8 = vadd.f32 %v3341_v25, %v3340_v22 }
 0x331   :  { %v3175_v58 = vpop.xlane.xlu0 %3174 }
 0x332   :  { %v3178_v6 = vpop.xlane.xlu2 %3177  ;;  %v3281_v29 = vadd.f32 %v6235_v26, %v3175_v58  ;;  %v3315_v26 = vmul.f32 %v6850_v19, %v6850_v19 }
 0x333   :  { %v3282_v5 = vadd.f32 %v7286_v52, %v3178_v6  ;;  %v3316_v6 = vmul.f32 %v3284_v34, %v3284_v34 }
 0x334   :  { %v3313_v50 = vmul.f32 %v3281_v29, %v3281_v29  ;;  %v3359_v47 = vsel %vm3335_vm1, %v3315_v26, 0.0 }
 0x335   :  { %v3314_v24 = vmul.f32 %v3282_v5, %v3282_v5  ;;  %v3361_v19 = vsel %vm3335_vm1, %v3316_v6, 0.0 }
 0x336   :  { %v3190_v2 = vpop.xlane.xlu1 %3189 }
 0x337   :  { %v3286_v42 = vadd.f32 %v6322_v43, %v3190_v2  ;;  %v3310_v43 = vmul.f32 %v6854_v33, %v6854_v33 }
 0x339   :  { %v3157_v31 = vpop.xlane.xlu0 %3156  ;;  %v3349_v16 = vsel %vm3335_vm1, %v3310_v43, 0.0 }
 0x33a   :  { %v3275_v10 = vadd.f32 %v3243_v30, %v3157_v31  ;;  %v3196_v7 = vpop.xlane.xlu2 %3195  ;;  %v7285_v30 = vld [vmem:[#allocation77_spill] sm:$0xff]  ;;  %v3357_v31 = vsel %vm3335_vm1, %v3314_v24, 0.0 }
 0x33b   :  { %v3280_v21 = vadd.f32 %v7285_v30, %v3172_v59 }
 0x33c   :  { %v3307_v3 = vmul.f32 %v3275_v10, %v3275_v10 }
 0x33d   :  { %v3312_v0 = vmul.f32 %v3280_v21, %v3280_v21 }
 0x33e   :  { %v3343_v48 = vsel %vm3335_vm1, %v3307_v3, 0.0  ;;  %v3160_v54 = vpop.xlane.xlu1 %3159 }
 0x33f   :  { %v3344_v45 = vadd.f32 %v3343_v48, %v3342_v8  ;;  %v3276_v49 = vadd.f32 %v3244_v51, %v3160_v54  ;;  %v3353_v25 = vsel %vm3335_vm1, %v3312_v0, 0.0  ;;  %v3355_v8 = vsel %vm3335_vm1, %v3313_v50, 0.0 }
 0x340   :  { %v3317_v48 = vmul.f32 %v6882_v44, %v6882_v44  ;;  %v3318_v54 = vmul.f32 %v3286_v42, %v3286_v42  ;;  %v3321_v42 = vmul.f32 %v6692_v60, %v6692_v60  ;;  %v2976_v50 = vadd.f32 %v6621_v36, %v6684_v56 }
 0x341   :  { %v3193_v18 = vpop.xlane.xlu0 %3192  ;;  %v3308_v55 = vmul.f32 %v3276_v49, %v3276_v49  ;;  %v7287_v49 = vld [vmem:[#allocation78_spill] sm:$0xff] }
 0x342   :  { %v3208_v12 = vpop.xlane.xlu2 %3207  ;;  %v3287_v51 = vadd.f32 %v6356_v20, %v3193_v18  ;;  %v3288_v32 = vadd.f32 %v7287_v49, %v3196_v7  ;;  %v2973_v20 = vadd.f32 %v6621_v36, %v6611_v63  ;;  %v2974_v18 = vadd.f32 %v6621_v36, %v6645_v17 }
 0x343   :  { %v3345_v39 = vsel %vm3335_vm1, %v3308_v55, 0.0  ;;  %v3363_v55 = vsel %vm3335_vm1, %v3317_v48, 0.0  ;;  %v3292_v0 = vadd.f32 %v6779_v13, %v3208_v12  ;;  %v2975_v63 = vadd.f32 %v6621_v36, %v6637_v40 }
 0x344   :  { %v3346_v14 = vadd.f32 %v3345_v39, %v3344_v45  ;;  %v3319_v43 = vmul.f32 %v3287_v51, %v3287_v51  ;;  %v3365_v39 = vsel %vm3335_vm1, %v3318_v54, 0.0  ;;  %v3371_v60 = vsel %vm3335_vm1, %v3321_v42, 0.0 }
 0x345   :  { %v3324_v13 = vmul.f32 %v3292_v0, %v3292_v0 }
 0x346   :  { %v3348_v9 = vadd.f32 %v3347_v46, %v3346_v14  ;;  %v3083_v35 = vpop.xlane.xlu1 %3082  ;;  %v3320_v14 = vmul.f32 %v3288_v32, %v3288_v32  ;;  %v3367_v7 = vsel %vm3335_vm1, %v3319_v43, 0.0 }
 0x347   :  { %v3261_v52 = vmul.f32 %v3083_v35, %v2973_v20 }
 0x348   :  { %v3350_v33 = vadd.f32 %v3349_v16, %v3348_v9  ;;  %v3322_v9 = vmul.f32 %v6746_v27, %v6746_v27  ;;  %v3369_v16 = vsel %vm3335_vm1, %v3320_v14, 0.0  ;;  %v2978_v14 = vadd.f32 %v6621_v36, %v6715_v62 }
 0x349   :  { %v6906_v11 = vpop.xlane.xlu0 %3474 }
 0x34a   :  { %v3211_v41 = vpop.xlane.xlu2 %3210  ;;  %v3352_v22 = vadd.f32 %v3351_v38, %v3350_v33  ;;  %v3323_v33 = vmul.f32 %v6888_v15, %v6888_v15 }
 0x34b   :  { %v3293_v38 = vadd.f32 %v3261_v52, %v3211_v41 }
 0x34c   :  { %v3354_v59 = vadd.f32 %v3353_v25, %v3352_v22  ;;  %v3373_v25 = vsel %vm3335_vm1, %v3322_v9, 0.0  ;;  %v3375_v26 = vsel %vm3335_vm1, %v3323_v33, 0.0 }
 0x34e   :  { %v3356_v58 = vadd.f32 %v3355_v8, %v3354_v59  ;;  %v3086_v2 = vpop.xlane.xlu1 %3085  ;;  %v3325_v8 = vmul.f32 %v3293_v38, %v3293_v38  ;;  %v3519_v38 = vadd.f32 %v6621_v36, %v6906_v11 }
 0x34f   :  { %v3262_v17 = vmul.f32 %v3086_v2, %v2974_v18  ;;  %v3377_v2 = vsel %vm3335_vm1, %v3324_v13, 0.0 }
 0x350   :  { %v3358_v3 = vadd.f32 %v3357_v31, %v3356_v58 }
 0x351   :  { %v6914_v10 = vpop.xlane.xlu0 %3477 }
 0x352   :  { %v3214_v57 = vpop.xlane.xlu2 %3213  ;;  %v3360_v45 = vadd.f32 %v3359_v47, %v3358_v3  ;;  %v2977_v3 = vadd.f32 %v6621_v36, %v6713_v1 }
 0x353   :  { %v3294_v12 = vadd.f32 %v3262_v17, %v3214_v57  ;;  %v3379_v57 = vsel %vm3335_vm1, %v3325_v8, 0.0  ;;  %v3543_v17 = vld [vmem:[%s7065_s2 + $0x68] sm:$0xff] }
 0x354   :  { %v3362_v34 = vadd.f32 %v3361_v19, %v3360_v45  ;;  %v3567_v13 = vsub.f32 %v3519_v38, %v3543_v17 }
 0x355   :  { %v3326_v6 = vmul.f32 %v3294_v12, %v3294_v12  ;;  %v3545_v12 = vld [vmem:[%s7065_s2 + $0x78] sm:$0xff] }
 0x356   :  { %v3364_v30 = vadd.f32 %v3363_v55, %v3362_v34  ;;  %v3089_v21 = vpop.xlane.xlu1 %3088 }
 0x357   :  { %v3263_v35 = vmul.f32 %v3089_v21, %v2975_v63  ;;  %v3381_v45 = vsel %vm3335_vm1, %v3326_v6, 0.0  ;;  %v3591_v6 = vld [vmem:[%s7066_s3 + $0x68] sm:$0xff] }
 0x358   :  { %v3366_v44 = vadd.f32 %v3365_v39, %v3364_v30 }
 0x359   :  { %v6924_v46 = vpop.xlane.xlu0 %3480 }
 0x35a   :  { %v3217_v23 = vpop.xlane.xlu2 %3216  ;;  %v3368_v29 = vadd.f32 %v3367_v7, %v3366_v44 }
 0x35b   :  { %v3295_v58 = vadd.f32 %v3263_v35, %v3217_v23 }
 0x35c   :  { %v3370_v5 = vadd.f32 %v3369_v16, %v3368_v29  ;;  %v2979_v16 = vadd.f32 %v6621_v36, %v6769_v61  ;;  %v2980_v61 = vadd.f32 %v6621_v36, %v6794_v28 }
 0x35d   :  { %v3327_v47 = vmul.f32 %v3295_v58, %v3295_v58 }
 0x35e   :  { %v3372_v27 = vadd.f32 %v3371_v60, %v3370_v5  ;;  %v3092_v22 = vpop.xlane.xlu1 %3091 }
 0x35f   :  { %v3264_v15 = vmul.f32 %v3092_v22, %v2976_v50  ;;  %v3383_v55 = vsel %vm3335_vm1, %v3327_v47, 0.0  ;;  %v3544_v22 = vld [vmem:[%s7065_s2 + $0x70] sm:$0xff]  ;;  %v2981_v47 = vadd.f32 %v6621_v36, %v6773_v4 }
 0x360   :  { %v3374_v40 = vadd.f32 %v3373_v25, %v3372_v27  ;;  %v3520_v27 = vadd.f32 %v6621_v36, %v6914_v10  ;;  %v3521_v25 = vadd.f32 %v6621_v36, %v6924_v46  ;;  %v3546_v46 = vld [vmem:[%s7065_s2 + $0x80] sm:$0xff] }
 0x361   :  { %v3484_v24 = vpop.xlane.xlu0 %3483 }
 0x362   :  { %v3220_v59 = vpop.xlane.xlu2 %3219  ;;  %v3376_v41 = vadd.f32 %v3375_v26, %v3374_v40  ;;  %v3568_v26 = vsub.f32 %v3520_v27, %v3544_v22  ;;  %v3522_v28 = vadd.f32 %v6621_v36, %v3484_v24  ;;  %v3569_v58 = vsub.f32 %v3521_v25, %v3545_v12  ;;  %v3596_v27 = vld [vmem:[%s7066_s3 + $0x90] sm:$0xff] }
 0x363   :  { %v3296_v56 = vadd.f32 %v3264_v15, %v3220_v59 }
 0x364   :  { %v3378_v31 = vadd.f32 %v3377_v2, %v3376_v41  ;;  %v3615_v41 = vmul.f32 %v3567_v13, %v3567_v13  ;;  %v3616_v24 = vmul.f32 %v3568_v26, %v3568_v26 }
 0x365   :  { %v3328_v19 = vmul.f32 %v3296_v56, %v3296_v56  ;;  %v3547_v56 = vld [vmem:[%s7065_s2 + $0x88] sm:$0xff] }
 0x366   :  { %v3380_v48 = vadd.f32 %v3379_v57, %v3378_v31  ;;  %v3095_v51 = vpop.xlane.xlu1 %3094 }
 0x367   :  { %v3265_v54 = vmul.f32 %v3095_v51, %v2977_v3  ;;  %v3385_v21 = vsel %vm3335_vm1, %v3328_v19, 0.0  ;;  %v3570_v3 = vsub.f32 %v3522_v28, %v3546_v46  ;;  %v3617_v51 = vmul.f32 %v3569_v58, %v3569_v58  ;;  %v3598_v46 = vld [vmem:[%s7066_s3 + $0xa0] sm:$0xff] }
 0x368   :  { %v3382_v32 = vadd.f32 %v3381_v45, %v3380_v48  ;;  %v3592_v48 = vld [vmem:[%s7066_s3 + $0x70] sm:$0xff] }
 0x369   :  { %v3487_v49 = vpop.xlane.xlu0 %3486  ;;  %v3548_v45 = vld [vmem:[%s7065_s2 + $0x90] sm:$0xff] }
 0x36a   :  { %v3223_v34 = vpop.xlane.xlu2 %3222  ;;  %v3384_v30 = vadd.f32 %v3383_v55, %v3382_v32  ;;  %v3523_v2 = vadd.f32 %v6621_v36, %v3487_v49  ;;  %v3593_v49 = vld [vmem:[%s7066_s3 + $0x78] sm:$0xff] }
 0x36b   :  { %v3297_v43 = vadd.f32 %v3265_v54, %v3223_v34  ;;  %v3639_v54 = vmul.f32 %v3615_v41, %v3591_v6 }
 0x36c   :  { %v3386_v1 = vadd.f32 %v3385_v21, %v3384_v30  ;;  %v3571_v32 = vsub.f32 %v3523_v2, %v3547_v56  ;;  %v2982_v56 = vadd.f32 %v6621_v36, %v6813_v53 }
 0x36d   :  { %v3329_v39 = vmul.f32 %v3297_v43, %v3297_v43  ;;  %v3549_v43 = vld [vmem:[%s7065_s2 + $0x98] sm:$0xff] }
 0x36e   :  { %v3098_v20 = vpop.xlane.xlu1 %3097 }
 0x36f   :  { %v3387_v44 = vsel %vm3335_vm1, %v3329_v39, 0.0  ;;  %v3266_v42 = vmul.f32 %v3098_v20, %v2978_v14  ;;  %v3640_v39 = vmul.f32 %v3616_v24, %v3592_v48  ;;  %v3641_v20 = vmul.f32 %v3617_v51, %v3593_v49  ;;  %v3599_v24 = vld [vmem:[%s7066_s3 + $0xa8] sm:$0xff] }
 0x370   :  { %v3388_v23 = vadd.f32 %v3387_v44, %v3386_v1  ;;  %v3618_v1 = vmul.f32 %v3570_v3, %v3570_v3 }
 0x371   :  { %v3490_v7 = vpop.xlane.xlu0 %3489 }
 0x372   :  { %v3226_v18 = vpop.xlane.xlu2 %3225  ;;  %v3524_v57 = vadd.f32 %v6621_v36, %v3490_v7  ;;  %v3550_v7 = vld [vmem:[%s7065_s2 + $0xa0] sm:$0xff] }
 0x373   :  { %v3298_v29 = vadd.f32 %v3266_v42, %v3226_v18  ;;  %v3594_v42 = vld [vmem:[%s7066_s3 + $0x80] sm:$0xff] }
 0x374   :  { %v3572_v14 = vsub.f32 %v3524_v57, %v3548_v45  ;;  %v3600_v45 = vld [vmem:[%s7066_s3 + $0xb0] sm:$0xff] }
 0x375   :  { %v3330_v9 = vmul.f32 %v3298_v29, %v3298_v29  ;;  %v3675_v29 = vsel %vm3335_vm1, %v3639_v54, 0.0 }
 0x376   :  { %v3101_v63 = vpop.xlane.xlu1 %3100  ;;  %v3676_v17 = vadd.f32 %v3675_v29, %v6821_v37  ;;  %v3552_v37 = vld [vmem:[%s7065_s2 + $0xb0] sm:$0xff] }
 0x377   :  { %v3389_v0 = vsel %vm3335_vm1, %v3330_v9, 0.0  ;;  %v3267_v5 = vmul.f32 %v3101_v63, %v2979_v16  ;;  %v3619_v9 = vmul.f32 %v3571_v32, %v3571_v32  ;;  %v3551_v63 = vld [vmem:[%s7065_s2 + $0xa8] sm:$0xff]  ;;  %v3553_v32 = vld [vmem:[%s7065_s2 + $0xb8] sm:$0xff] }
 0x378   :  { %v3390_v52 = vadd.f32 %v3389_v0, %v3388_v23 }
 0x379   :  { %v3493_v60 = vpop.xlane.xlu0 %3492 }
 0x37a   :  { %v3229_v33 = vpop.xlane.xlu2 %3228  ;;  %v3525_v34 = vadd.f32 %v6621_v36, %v3493_v60  ;;  %v3677_v60 = vsel %vm3335_vm1, %v3640_v39, 0.0 }
 0x37b   :  { %v3299_v62 = vadd.f32 %v3267_v5, %v3229_v33  ;;  %v3642_v33 = vmul.f32 %v3618_v1, %v3594_v42 }
 0x37c   :  { %v3573_v16 = vsub.f32 %v3525_v34, %v3549_v43  ;;  %v4151_v43 = vld [vmem:[#allocation3] ss:$0 sm:$0xff] }
 0x37d   :  { %v3331_v50 = vmul.f32 %v3299_v62, %v3299_v62  ;;  %v3620_v62 = vmul.f32 %v3572_v14, %v3572_v14 }
 0x37e   :  { %v3104_v40 = vpop.xlane.xlu1 %3103  ;;  %v3621_v25 = vmul.f32 %v3573_v16, %v3573_v16 }
 0x37f   :  { %v3391_v11 = vsel %vm3335_vm1, %v3331_v50, 0.0  ;;  %v3268_v10 = vmul.f32 %v3104_v40, %v2980_v61  ;;  %v3679_v50 = vsel %vm3335_vm1, %v3641_v20, 0.0  ;;  %v3597_v40 = vld [vmem:[%s7066_s3 + $0x98] sm:$0xff]  ;;  %v3644_v26 = vmul.f32 %v3620_v62, %v3596_v27 }
 0x380   :  { %v3392_v35 = vadd.f32 %v3391_v11, %v3390_v52  ;;  %v3595_v52 = vld [vmem:[%s7066_s3 + $0x88] sm:$0xff]  ;;  %v3645_v41 = vmul.f32 %v3621_v25, %v3597_v40  ;;  %v3601_v20 = vld [vmem:[%s7066_s3 + $0xb8] sm:$0xff]  ;;  %s4180_s3 = smov [#allocation4]  }
 0x381   :  { %v3496_v59 = vpop.xlane.xlu0 %3495  ;;  %v3643_v22 = vmul.f32 %v3619_v9, %v3595_v52  ;;  %v3685_v3 = vsel %vm3335_vm1, %v3644_v26, 0.0  ;;  %s3714_s5 = sshll.u32 %s4180_s3, 4  ;;  %s3715_s5 = int_to_ptr.vmem [resolvable:$true] %s3714_s5 }
 0x382   :  { %v3232_v8 = vpop.xlane.xlu2 %3231  ;;  %v3526_v44 = vadd.f32 %v6621_v36, %v3496_v59  ;;  %v3681_v59 = vsel %vm3335_vm1, %v3642_v33, 0.0 }
 0x383   :  { %v3300_v15 = vadd.f32 %v3268_v10, %v3232_v8 }
 0x384   :  { %v3574_v38 = vsub.f32 %v3526_v44, %v3550_v7 }
 0x385   :  { %v3332_v31 = vmul.f32 %v3300_v15, %v3300_v15  ;;  %v3683_v15 = vsel %vm3335_vm1, %v3643_v22, 0.0 }
 0x386   :  { %v3107_v55 = vpop.xlane.xlu1 %3106  ;;  %v3622_v28 = vmul.f32 %v3574_v38, %v3574_v38 }
 0x387   :  { %v3393_v19 = vsel %vm3335_vm1, %v3332_v31, 0.0  ;;  %v3269_v30 = vmul.f32 %v3107_v55, %v2981_v47 }
 0x388   :  { %v3394_v4 = vadd.f32 %v3393_v19, %v3392_v35  ;;  %v3678_v35 = vadd.f32 %v3677_v60, %v3676_v17  ;;  %v3646_v57 = vmul.f32 %v3622_v28, %v3598_v46  ;;  %v3687_v19 = vsel %vm3335_vm1, %v3645_v41, 0.0 }
 0x389   :  { %v3499_v21 = vpop.xlane.xlu0 %3498 }
 0x38a   :  { %v3235_v23 = vpop.xlane.xlu2 %3234  ;;  %v3527_v0 = vadd.f32 %v6621_v36, %v3499_v21  ;;  %v3680_v58 = vadd.f32 %v3679_v50, %v3678_v35 }
 0x38b   :  { %v3301_v18 = vadd.f32 %v3269_v30, %v3235_v23 }
 0x38c   :  { %v3575_v11 = vsub.f32 %v3527_v0, %v3551_v63  ;;  %v3682_v31 = vadd.f32 %v3681_v59, %v3680_v58 }
 0x38d   :  { %v3333_v5 = vmul.f32 %v3301_v18, %v3301_v18 }
 0x38e   :  { %v3110_v12 = vpop.xlane.xlu1 %3109  ;;  %v3623_v2 = vmul.f32 %v3575_v11, %v3575_v11  ;;  %v3684_v48 = vadd.f32 %v3683_v15, %v3682_v31 }
 0x38f   :  { %v3395_v61 = vsel %vm3335_vm1, %v3333_v5, 0.0  ;;  %v3270_v51 = vmul.f32 %v3110_v12, %v2982_v56 }
 0x390   :  { %v3396_v13 = vadd.f32 %v3395_v61, %v3394_v4  ;;  %v3647_v54 = vmul.f32 %v3623_v2, %v3599_v24  ;;  %v3689_v4 = vsel %vm3335_vm1, %v3646_v57, 0.0 }
 0x391   :  { %v3502_v10 = vpop.xlane.xlu0 %3501 }
 0x392   :  { %v3528_v8 = vadd.f32 %v6621_v36, %v3502_v10  ;;  %v3686_v36 = vadd.f32 %v3685_v3, %v3684_v48  ;;  %v3691_v1 = vsel %vm3335_vm1, %v3647_v54, 0.0 }
 0x394   :  { %v3576_v6 = vsub.f32 %v3528_v8, %v3552_v37  ;;  %v3688_v21 = vadd.f32 %v3687_v19, %v3686_v36 }
 0x396   :  { %v3624_v47 = vmul.f32 %v3576_v6, %v3576_v6  ;;  %v3238_v49 = vpop.xlane.xlu1 %3237  ;;  %v3690_v44 = vadd.f32 %v3689_v4, %v3688_v21 }
 0x397   :  { %v3302_v53 = vadd.f32 %v3270_v51, %v3238_v49 }
 0x398   :  { %v3648_v55 = vmul.f32 %v3624_v47, %v3600_v45  ;;  %v3692_v29 = vadd.f32 %v3691_v1, %v3690_v44 }
 0x399   :  { %v3505_v34 = vpop.xlane.xlu0 %3504  ;;  %v3334_v39 = vmul.f32 %v3302_v53, %v3302_v53 }
 0x39a   :  { %v3529_v30 = vadd.f32 %v4151_v43, %v3505_v34  ;;  %v3693_v18 = vsel %vm3335_vm1, %v3648_v55, 0.0 }
 0x39b   :  { %v3397_v23 = vsel %vm3335_vm1, %v3334_v39, 0.0  ;;  %v3694_v16 = vadd.f32 %v3693_v18, %v3692_v29 }
 0x39c   :  { %v3577_v14 = vsub.f32 %v3529_v30, %v3553_v32  ;;  %v3398_v7 = vadd.f32 %v3397_v23, %v3396_v13 }
 0x39e   :  { %v3625_v42 = vmul.f32 %v3577_v14, %v3577_v14  ;;  %3399 = vadd.xlane.f32.xlu2 %v3398_v7 }
 0x3a0   :  { %v3649_v9 = vmul.f32 %v3625_v42, %v3601_v20 }
 0x3a2   :  { %v3695_v0 = vsel %vm3335_vm1, %v3649_v9, 0.0 }
 0x3a3   :  { %v3696_v52 = vadd.f32 %v3695_v0, %v3694_v16 }
 0x3a5   :  { %3697 = vadd.xlane.f32.xlu0 %v3696_v52 }
 0x411   :  { %v3400_v63 = vpop.xlane.xlu2 %3399 }
 0x412   :  { %v3401_v5 = vrot.slane %v3400_v63, 4 }
 0x414   :  { %v3402_v60 = vadd.f32 %v3401_v5, %v3400_v63 }
 0x416   :  { %v3403_v33 = vrot.slane %v3402_v60, 2 }
 0x418   :  { %v3698_v62 = vpop.xlane.xlu0 %3697  ;;  %v3404_v17 = vadd.f32 %v3403_v33, %v3402_v60 }
 0x419   :  { %v3699_v38 = vrot.slane %v3698_v62, 4 }
 0x41a   :  { %v3405_v27 = vrot.slane %v3404_v17, 1 }
 0x41b   :  { %v3700_v50 = vadd.f32 %v3699_v38, %v3698_v62 }
 0x41c   :  { %v3406_v22 = vadd.f32 %v3405_v27, %v3404_v17 }
 0x41d   :  { %v3701_v61 = vrot.slane %v3700_v50, 2 }
 0x41e   :  { %3889 = vpush %v3406_v22 }
 0x41f   :  { %v3702_v25 = vadd.f32 %v3701_v61, %v3700_v50 }
 0x421   :  { %v3703_v11 = vrot.slane %v3702_v25, 1 }
 0x423   :  { %v3704_v13 = vadd.f32 %v3703_v11, %v3702_v25 }
 0x425   :  { %3891 = vpush %v3704_v13 }
 0x44f   :  { %s3890_s2 = spop %3889 }
 0x450   :  { %v3408_v12 = vstv %s3890_s2 }
 0x451   :  { %v3409_v35 = vmul.f32 0.00390625, %v3408_v12 }
 0x456   :  { %s3892_s17 = spop %3891 }
 0x457   :  { %v3706_v40 = vstv %s3892_s17 }
 0x458   :  { %v3707_v37 = vadd.f32 %v3706_v40, %v3409_v35 }
 0x45a   :  { %3708 = vst [vmem:[#allocation4] sm:$0xff] %v3707_v37 }
 0x45b   :  { %3719 = dma.vmem_to_hbm [thread:$0]  %s3715_s5, 128, %s3717_s16, [#allocation5]  }
 0x45c   :  { %4176 = dma.done.wait [#allocation5], 128  }
 0x45d   :  { %4177 = vsyncadd [#allocation5], 4294967168 }
 0x45e   :  { %3724 = vsyncpa [#allocation5], 1 }

</bundles_post_ra>
